<compile_context>
chip_gen: v7x
topology: tpu7x:2x2x1
jax: 0.10.0
libtpu: 0.0.40
codegen_flags: <defaults>
</compile_context>

<pallas_src>
import math

import jax
import jax.numpy as jnp
from jax.experimental import pallas as pl
from jax.experimental.pallas import tpu as pltpu

# ------------------------- model hyper-parameters (small synthetic ESM) -------------------------
B = 2             # batch
T = 8             # sequence length
E = 32            # embed_dim (esm1.args.embed_dim)
H = 4             # attention heads
DH = E // H       # head dim
FFN = 4 * E       # ffn hidden dim
L = 2             # number of transformer layers (stand-in for the 33-layer ESM-1b)
VOCAB = 33        # ESM alphabet size
PAD = 1           # esm1_alphabet.padding_idx
CLS_TOK = 0       # cls token id
NUM_LABELS = 1195
CLS_HIDDEN = 512  # SequenceClassificationHead -> SimpleMLP(embed_dim, 512, num_labels)
MAXPOS = T + PAD + 1
N_PAD = ((NUM_LABELS + 127) // 128) * 128   # 1280: lane-dense padded logits width


# ----------------------------------- fused Pallas kernel -----------------------------------------
def _encoder_cls_kernel(x_ref, bias_ref,
                        emb_g_ref, emb_b_ref,
                        ln1_g_ref, ln1_b_ref, wqkv_ref, bqkv_ref, wo_ref, bo_ref,
                        ln2_g_ref, ln2_b_ref, w1_ref, b1_ref, w2_ref, b2_ref,
                        fin_g_ref, fin_b_ref,
                        cw1_hbm_ref, cb1_ref, cw2_hbm_ref, cb2_ref,
                        out_ref,
                        cw1_buf, cw2_buf, dma_sem):
    """Fused: emb-LN -> L x (MHSA + FFN, pre-LN) -> final LN -> cls-pool -> MLP head."""

    # ---- kick off classifier-weight DMAs now; they complete under the encoder compute ----
    cp1 = pltpu.make_async_copy(cw1_hbm_ref, cw1_buf, dma_sem.at[0])
    cp2 = pltpu.make_async_copy(cw2_hbm_ref, cw2_buf, dma_sem.at[1])
    cp1.start()
    cp2.start()

    def ln(v, g, bb):                       # f32 layernorm (v5e-safe)
        v = v.astype(jnp.float32)
        mu = jnp.mean(v, axis=-1, keepdims=True)
        vc = v - mu
        var = jnp.mean(vc * vc, axis=-1, keepdims=True)
        return vc * jax.lax.rsqrt(var + 1e-5) * g + bb

    def mmw(a, w):                          # bf16 MXU operands, f32 accumulation
        return jnp.dot(a.astype(jnp.bfloat16), w, preferred_element_type=jnp.float32)

    def gelu(v):
        # tanh-approx GELU (ESM uses erf-GELU)
        # TODO(synk): swap to exact erf-based GELU if bit-exact parity with PyTorch is required.
        return 0.5 * v * (1.0 + jnp.tanh(0.7978845608028654 * (v + 0.044715 * v * v * v)))

    x = ln(x_ref[...], emb_g_ref[...], emb_b_ref[...])                     # (B*T, E) f32

    # Hoisted additive key-padding bias, shared by every layer / head (no per-iter re-broadcast).
    bias_tt = jnp.broadcast_to(bias_ref[...], (B, T, T)).astype(jnp.float32)

    for l in range(L):
        # ---- multi-head self-attention sub-block (pre-LN), batched over B ----
        h = ln(x, ln1_g_ref[l], ln1_b_ref[l])
        qkv = mmw(h, wqkv_ref[l]) + bqkv_ref[l]                            # (B*T, 3E); q pre-scaled
        wo_l = wo_ref[l]                                                   # (H, DH, E) bf16

        attn = jnp.zeros((B * T, E), jnp.float32)
        for hh in range(H):
            q_h = qkv[:, hh * DH:(hh + 1) * DH].reshape(B, T, DH).astype(jnp.bfloat16)
            k_h = qkv[:, E + hh * DH:E + (hh + 1) * DH].reshape(B, T, DH).astype(jnp.bfloat16)
            v_h = qkv[:, 2 * E + hh * DH:2 * E + (hh + 1) * DH].reshape(B, T, DH).astype(jnp.bfloat16)
            s = jnp.einsum('bqd,bkd->bqk', q_h, k_h,
                           preferred_element_type=jnp.float32) + bias_tt   # (B, T, T)
            s = s - jnp.max(s, axis=-1, keepdims=True)
            p = jnp.exp(s)
            p = p * pl.reciprocal(jnp.sum(p, axis=-1, keepdims=True), approx=True)
            o_h = jnp.einsum('bqk,bkd->bqd', p.astype(jnp.bfloat16), v_h,
                             preferred_element_type=jnp.float32)           # (B, T, DH)
            # head-concat eliminated: accumulate per-head out-projection contributions on the MXU
            attn = attn + mmw(o_h.reshape(B * T, DH), wo_l[hh])
        x = x + attn + bo_ref[l]

        # ---- feed-forward sub-block (pre-LN, GELU) ----
        h = ln(x, ln2_g_ref[l], ln2_b_ref[l])
        h = gelu(mmw(h, w1_ref[l]) + b1_ref[l])
        x = x + mmw(h, w2_ref[l]) + b2_ref[l]

    x = ln(x, fin_g_ref[...], fin_b_ref[...])                              # final encoder LN

    # ---- Pooler('cls'): row 0 of each sequence (reshape view, no gather/concat) ----
    pooled = x.reshape(B, T, E)[:, 0, :]                                   # (B, E)

    # ---- classification head: Linear -> ReLU -> Linear (lane-dense, N padded to 1280) ----
    cp1.wait()
    cp2.wait()
    hc = jnp.maximum(mmw(pooled, cw1_buf[...]) + cb1_ref[...], 0.0)
    out_ref[...] = (mmw(hc, cw2_buf[...]) + cb2_ref[...]).astype(out_ref.dtype)


# ----------------------------------- parameters --------------------------------------------------
def init_params(key):
    keys = iter(jax.random.split(key, 256))

    def nrm(shape, scale=0.02):
        return scale * jax.random.normal(next(keys), shape, dtype=jnp.float32)

    p = {}
    p["embed_tokens"] = nrm((VOCAB, E)).at[PAD].set(0.0)          # padding_idx row zeroed
    p["embed_positions"] = nrm((MAXPOS + 1, E)).at[PAD].set(0.0)  # learned positional embedding
    p["emb_ln_before_g"] = jnp.ones((E,), jnp.float32)
    p["emb_ln_before_b"] = jnp.zeros((E,), jnp.float32)
    p["emb_ln_after_g"] = jnp.ones((E,), jnp.float32)
    p["emb_ln_after_b"] = jnp.zeros((E,), jnp.float32)

    layers = []
    for _ in range(L):
        layers.append(dict(
            ln1_g=jnp.ones((E,), jnp.float32), ln1_b=jnp.zeros((E,), jnp.float32),
            wq=nrm((E, E)), bq=jnp.zeros((E,), jnp.float32),
            wk=nrm((E, E)), bk=jnp.zeros((E,), jnp.float32),
            wv=nrm((E, E)), bv=jnp.zeros((E,), jnp.float32),
            wo=nrm((E, E)), bo=jnp.zeros((E,), jnp.float32),
            ln2_g=jnp.ones((E,), jnp.float32), ln2_b=jnp.zeros((E,), jnp.float32),
            w1=nrm((E, FFN)), b1=jnp.zeros((FFN,), jnp.float32),
            w2=nrm((FFN, E)), b2=jnp.zeros((E,), jnp.float32),
        ))
    p["layers"] = layers

    # SequenceClassificationHead ~ SimpleMLP(embed_dim, 512, num_labels): Linear -> ReLU -> Linear
    # TODO(synk): exact SequenceClassificationHead definition (weight-norm / dropout) not provided.
    p["cls_w1"] = nrm((E, CLS_HIDDEN)); p["cls_b1"] = jnp.zeros((CLS_HIDDEN,), jnp.float32)
    p["cls_w2"] = nrm((CLS_HIDDEN, NUM_LABELS)); p["cls_b2"] = jnp.zeros((NUM_LABELS,), jnp.float32)
    return p


def prepare_params(p):
    """Stack layers, fuse QKV (folding 1/sqrt(DH) into Wq/bq), split Wo per head,
    pad cls_w2 lane-dense, cast matmul weights to bf16."""
    scale = 1.0 / math.sqrt(DH)
    bf = jnp.bfloat16
    ls = p["layers"]

    wqkv = jnp.stack([jnp.concatenate([l["wq"] * scale, l["wk"], l["wv"]], axis=1) for l in ls])
    bqkv = jnp.stack([jnp.concatenate([l["bq"] * scale, l["bk"], l["bv"]]) for l in ls])

    # out-projection rows grouped per head: (L, H, DH, E) so head-concat becomes MXU accumulation
    wo = jnp.stack([l["wo"] for l in ls]).reshape(L, H, DH, E)

    cls_w2p = jnp.zeros((CLS_HIDDEN, N_PAD), jnp.float32).at[:, :NUM_LABELS].set(p["cls_w2"])
    cls_b2p = jnp.zeros((1, N_PAD), jnp.float32).at[:, :NUM_LABELS].set(p["cls_b2"][None, :])

    return dict(
        embed_tokens=p["embed_tokens"],
        embed_positions=p["embed_positions"],
        emb_g=p["emb_ln_before_g"].reshape(1, E), emb_b=p["emb_ln_before_b"].reshape(1, E),
        ln1_g=jnp.stack([l["ln1_g"] for l in ls]).reshape(L, 1, E),
        ln1_b=jnp.stack([l["ln1_b"] for l in ls]).reshape(L, 1, E),
        wqkv=wqkv.astype(bf),
        bqkv=bqkv.reshape(L, 1, 3 * E),
        wo=wo.astype(bf),
        bo=jnp.stack([l["bo"] for l in ls]).reshape(L, 1, E),
        ln2_g=jnp.stack([l["ln2_g"] for l in ls]).reshape(L, 1, E),
        ln2_b=jnp.stack([l["ln2_b"] for l in ls]).reshape(L, 1, E),
        w1=jnp.stack([l["w1"] for l in ls]).astype(bf),
        b1=jnp.stack([l["b1"] for l in ls]).reshape(L, 1, FFN),
        w2=jnp.stack([l["w2"] for l in ls]).astype(bf),
        b2=jnp.stack([l["b2"] for l in ls]).reshape(L, 1, E),
        fin_g=p["emb_ln_after_g"].reshape(1, E), fin_b=p["emb_ln_after_b"].reshape(1, E),
        cls_w1=p["cls_w1"].astype(bf), cls_b1=p["cls_b1"].reshape(1, CLS_HIDDEN),
        cls_w2=cls_w2p.astype(bf), cls_b2=cls_b2p,
    )


# ----------------------------------- forward pass ------------------------------------------------
def forward(pp, input_ids):
    """ProteinBertForSequenceClassification.forward (eval mode): returns logits (B, NUM_LABELS)."""
    b, t = input_ids.shape
    assert b == B and t == T
    mask = (input_ids != PAD).astype(jnp.float32)                          # (B, T)

    # --- embeddings (JAX glue: gathers) ---
    x = pp["embed_tokens"][input_ids]                                      # (B, T, E)
    positions = (jnp.cumsum(mask, axis=1) * mask).astype(jnp.int32) + PAD  # padding-aware positions
    x = x + pp["embed_positions"][positions]
    x = x * mask[..., None]                                                # zero padded embeddings
    x2d = x.reshape(b * t, E)

    # additive key-padding bias, shared across heads: (B, 1, T)
    bias = ((1.0 - mask) * (-1e9)).reshape(b, 1, t)

    vmem = pl.BlockSpec(memory_space=pltpu.MemorySpace.VMEM)
    hbm = pl.BlockSpec(memory_space=pl.ANY)                 # classifier weights: DMA'd in-kernel
    in_specs = [vmem] * 18 + [hbm, vmem, hbm, vmem]

    # --- one fused kernel: encoder + 'cls' pooler + classification head ---
    logits_pad = pl.pallas_call(
        _encoder_cls_kernel,
        out_shape=jax.ShapeDtypeStruct((b, N_PAD), jnp.float32),
        in_specs=in_specs,
        out_specs=pl.BlockSpec(memory_space=pltpu.MemorySpace.VMEM),
        scratch_shapes=[
            pltpu.VMEM((E, CLS_HIDDEN), jnp.bfloat16),      # cls_w1 landing buffer
            pltpu.VMEM((CLS_HIDDEN, N_PAD), jnp.bfloat16),  # cls_w2 landing buffer
            pltpu.SemaphoreType.DMA((2,)),
        ],
    )(x2d, bias,
      pp["emb_g"], pp["emb_b"],
      pp["ln1_g"], pp["ln1_b"], pp["wqkv"], pp["bqkv"], pp["wo"], pp["bo"],
      pp["ln2_g"], pp["ln2_b"], pp["w1"], pp["b1"], pp["w2"], pp["b2"],
      pp["fin_g"], pp["fin_b"],
      pp["cls_w1"], pp["cls_b1"], pp["cls_w2"], pp["cls_b2"])

    return logits_pad[:, :NUM_LABELS]                                      # (B, NUM_LABELS)


# ----------------------------------- driver ------------------------------------------------------
if __name__ == "__main__":
    key = jax.random.PRNGKey(0)
    pkey, tkey = jax.random.split(key)
    params = init_params(pkey)
    pp = prepare_params(params)

    # deterministic example tokens: CLS token first, random amino-acid tokens, padding at the tail
    tokens = jax.random.randint(tkey, (B, T), 4, 24, dtype=jnp.int32)
    tokens = tokens.at[:, 0].set(CLS_TOK)
    tokens = tokens.at[1, T - 2:].set(PAD)   # pad the tail of the 2nd sequence

    logits = jax.jit(forward)(pp, tokens)
    logits = jax.block_until_ready(logits)

    assert logits.shape == (B, NUM_LABELS)
    assert bool(jnp.all(jnp.isfinite(logits)))
    print("KERNEL_OK")
</pallas_src>

<mosaic_0001>
module attributes {stable_mosaic.version = 11 : i64} {
  func.func @_encoder_cls_kernel(%arg0: memref<16x32xf32, #tpu.memory_space<vmem>>, %arg1: memref<2x1x8xf32, #tpu.memory_space<vmem>>, %arg2: memref<1x32xf32, #tpu.memory_space<vmem>>, %arg3: memref<1x32xf32, #tpu.memory_space<vmem>>, %arg4: memref<2x1x32xf32, #tpu.memory_space<vmem>>, %arg5: memref<2x1x32xf32, #tpu.memory_space<vmem>>, %arg6: memref<2x32x96xbf16, #tpu.memory_space<vmem>>, %arg7: memref<2x1x96xf32, #tpu.memory_space<vmem>>, %arg8: memref<2x4x8x32xbf16, #tpu.memory_space<vmem>>, %arg9: memref<2x1x32xf32, #tpu.memory_space<vmem>>, %arg10: memref<2x1x32xf32, #tpu.memory_space<vmem>>, %arg11: memref<2x1x32xf32, #tpu.memory_space<vmem>>, %arg12: memref<2x32x128xbf16, #tpu.memory_space<vmem>>, %arg13: memref<2x1x128xf32, #tpu.memory_space<vmem>>, %arg14: memref<2x128x32xbf16, #tpu.memory_space<vmem>>, %arg15: memref<2x1x32xf32, #tpu.memory_space<vmem>>, %arg16: memref<1x32xf32, #tpu.memory_space<vmem>>, %arg17: memref<1x32xf32, #tpu.memory_space<vmem>>, %arg18: memref<32x512xbf16, #tpu.memory_space<any>>, %arg19: memref<1x512xf32, #tpu.memory_space<vmem>>, %arg20: memref<512x1280xbf16, #tpu.memory_space<any>>, %arg21: memref<1x1280xf32, #tpu.memory_space<vmem>>, %arg22: memref<2x1280xf32, #tpu.memory_space<vmem>>, %arg23: memref<32x512xbf16, #tpu.memory_space<vmem>>, %arg24: memref<512x1280xbf16, #tpu.memory_space<vmem>>, %arg25: memref<2x!tpu.dma_semaphore, #tpu.memory_space<semaphore_mem>>) attributes {dimension_semantics = [], scalar_prefetch = 0 : i64, scratch_operands = 3 : i64, tpu.core_type = #tpu.core_type<tc>} {
    %c0_i32 = arith.constant 0 : i32
    %0 = tpu.memref_slice %arg25[%c0_i32] : memref<2x!tpu.dma_semaphore, #tpu.memory_space<semaphore_mem>> -> memref<1x!tpu.dma_semaphore, #tpu.memory_space<semaphore_mem>>
    %1 = tpu.memref_squeeze %0 : memref<1x!tpu.dma_semaphore, #tpu.memory_space<semaphore_mem>> -> memref<!tpu.dma_semaphore, #tpu.memory_space<semaphore_mem>>
    tpu.enqueue_dma source(%arg18 : memref<32x512xbf16, #tpu.memory_space<any>>) target(%arg23 : memref<32x512xbf16, #tpu.memory_space<vmem>>) target_semaphore(%1 : memref<!tpu.dma_semaphore, #tpu.memory_space<semaphore_mem>>)
    %c1_i32 = arith.constant 1 : i32
    %2 = tpu.memref_slice %arg25[%c1_i32] : memref<2x!tpu.dma_semaphore, #tpu.memory_space<semaphore_mem>> -> memref<1x!tpu.dma_semaphore, #tpu.memory_space<semaphore_mem>>
    %3 = tpu.memref_squeeze %2 : memref<1x!tpu.dma_semaphore, #tpu.memory_space<semaphore_mem>> -> memref<!tpu.dma_semaphore, #tpu.memory_space<semaphore_mem>>
    tpu.enqueue_dma source(%arg20 : memref<512x1280xbf16, #tpu.memory_space<any>>) target(%arg24 : memref<512x1280xbf16, #tpu.memory_space<vmem>>) target_semaphore(%3 : memref<!tpu.dma_semaphore, #tpu.memory_space<semaphore_mem>>)
    %c0 = arith.constant 0 : index
    %c0_0 = arith.constant 0 : index
    %4 = vector.load %arg0[%c0, %c0_0] : memref<16x32xf32, #tpu.memory_space<vmem>>, vector<16x32xf32>
    %c0_1 = arith.constant 0 : index
    %c0_2 = arith.constant 0 : index
    %5 = vector.load %arg2[%c0_1, %c0_2] : memref<1x32xf32, #tpu.memory_space<vmem>>, vector<1x32xf32>
    %c0_3 = arith.constant 0 : index
    %c0_4 = arith.constant 0 : index
    %6 = vector.load %arg3[%c0_3, %c0_4] : memref<1x32xf32, #tpu.memory_space<vmem>>, vector<1x32xf32>
    %cst = arith.constant dense<0.000000e+00> : vector<16xf32>
    %7 = vector.multi_reduction <add>, %4, %cst [1] : vector<16x32xf32> to vector<16xf32>
    %8 = vector.shape_cast %7 : vector<16xf32> to vector<16x1xf32>
    %cst_5 = arith.constant 3.200000e+01 : f32
    %9 = vector.broadcast %cst_5 : f32 to vector<16x1xf32>
    %10 = arith.divf %8, %9 : vector<16x1xf32>
    %11 = vector.broadcast %10 : vector<16x1xf32> to vector<16x32xf32>
    %12 = arith.subf %4, %11 : vector<16x32xf32>
    %13 = arith.mulf %12, %12 : vector<16x32xf32>
    %cst_6 = arith.constant dense<0.000000e+00> : vector<16xf32>
    %14 = vector.multi_reduction <add>, %13, %cst_6 [1] : vector<16x32xf32> to vector<16xf32>
    %15 = vector.shape_cast %14 : vector<16xf32> to vector<16x1xf32>
    %cst_7 = arith.constant 3.200000e+01 : f32
    %16 = vector.broadcast %cst_7 : f32 to vector<16x1xf32>
    %17 = arith.divf %15, %16 : vector<16x1xf32>
    %cst_8 = arith.constant 9.99999974E-6 : f32
    %18 = vector.broadcast %cst_8 : f32 to vector<16x1xf32>
    %19 = arith.addf %17, %18 : vector<16x1xf32>
    %20 = math.rsqrt %19 : vector<16x1xf32>
    %21 = vector.broadcast %20 : vector<16x1xf32> to vector<16x32xf32>
    %22 = arith.mulf %12, %21 : vector<16x32xf32>
    %23 = vector.broadcast %5 : vector<1x32xf32> to vector<16x32xf32>
    %24 = arith.mulf %22, %23 : vector<16x32xf32>
    %25 = vector.broadcast %6 : vector<1x32xf32> to vector<16x32xf32>
    %26 = arith.addf %24, %25 : vector<16x32xf32>
    %c0_9 = arith.constant 0 : index
    %c0_10 = arith.constant 0 : index
    %c0_11 = arith.constant 0 : index
    %27 = vector.load %arg1[%c0_9, %c0_10, %c0_11] : memref<2x1x8xf32, #tpu.memory_space<vmem>>, vector<2x1x8xf32>
    %28 = vector.shape_cast %27 : vector<2x1x8xf32> to vector<2x1x8xf32>
    %29 = vector.broadcast %28 : vector<2x1x8xf32> to vector<2x8x8xf32>
    %c0_12 = arith.constant 0 : index
    %c0_13 = arith.constant 0 : index
    %c0_14 = arith.constant 0 : index
    %30 = vector.load %arg4[%c0_12, %c0_13, %c0_14] : memref<2x1x32xf32, #tpu.memory_space<vmem>>, vector<1x1x32xf32>
    %31 = vector.shape_cast %30 : vector<1x1x32xf32> to vector<1x32xf32>
    %c0_15 = arith.constant 0 : index
    %c0_16 = arith.constant 0 : index
    %c0_17 = arith.constant 0 : index
    %32 = vector.load %arg5[%c0_15, %c0_16, %c0_17] : memref<2x1x32xf32, #tpu.memory_space<vmem>>, vector<1x1x32xf32>
    %33 = vector.shape_cast %32 : vector<1x1x32xf32> to vector<1x32xf32>
    %cst_18 = arith.constant dense<0.000000e+00> : vector<16xf32>
    %34 = vector.multi_reduction <add>, %26, %cst_18 [1] : vector<16x32xf32> to vector<16xf32>
    %35 = vector.shape_cast %34 : vector<16xf32> to vector<16x1xf32>
    %cst_19 = arith.constant 3.200000e+01 : f32
    %36 = vector.broadcast %cst_19 : f32 to vector<16x1xf32>
    %37 = arith.divf %35, %36 : vector<16x1xf32>
    %38 = vector.broadcast %37 : vector<16x1xf32> to vector<16x32xf32>
    %39 = arith.subf %26, %38 : vector<16x32xf32>
    %40 = arith.mulf %39, %39 : vector<16x32xf32>
    %cst_20 = arith.constant dense<0.000000e+00> : vector<16xf32>
    %41 = vector.multi_reduction <add>, %40, %cst_20 [1] : vector<16x32xf32> to vector<16xf32>
    %42 = vector.shape_cast %41 : vector<16xf32> to vector<16x1xf32>
    %cst_21 = arith.constant 3.200000e+01 : f32
    %43 = vector.broadcast %cst_21 : f32 to vector<16x1xf32>
    %44 = arith.divf %42, %43 : vector<16x1xf32>
    %cst_22 = arith.constant 9.99999974E-6 : f32
    %45 = vector.broadcast %cst_22 : f32 to vector<16x1xf32>
    %46 = arith.addf %44, %45 : vector<16x1xf32>
    %47 = math.rsqrt %46 : vector<16x1xf32>
    %48 = vector.broadcast %47 : vector<16x1xf32> to vector<16x32xf32>
    %49 = arith.mulf %39, %48 : vector<16x32xf32>
    %50 = vector.broadcast %31 : vector<1x32xf32> to vector<16x32xf32>
    %51 = arith.mulf %49, %50 : vector<16x32xf32>
    %52 = vector.broadcast %33 : vector<1x32xf32> to vector<16x32xf32>
    %53 = arith.addf %51, %52 : vector<16x32xf32>
    %c0_23 = arith.constant 0 : index
    %c0_24 = arith.constant 0 : index
    %c0_25 = arith.constant 0 : index
    %54 = vector.load %arg6[%c0_23, %c0_24, %c0_25] : memref<2x32x96xbf16, #tpu.memory_space<vmem>>, vector<1x32x96xbf16>
    %55 = vector.shape_cast %54 : vector<1x32x96xbf16> to vector<32x96xbf16>
    %56 = arith.truncf %53 : vector<16x32xf32> to vector<16x32xbf16>
    %cst_26 = arith.constant dense<0.000000e+00> : vector<16x96xf32>
    %57 = tpu.matmul %56, %55, %cst_26 {dimension_numbers = #tpu.dot_dimension_numbers<[1], [0], [0], [1], [0, 0, 1, 1], [], []>} : vector<16x32xbf16>, vector<32x96xbf16>, vector<16x96xf32> -> vector<16x96xf32>
    %c0_27 = arith.constant 0 : index
    %c0_28 = arith.constant 0 : index
    %c0_29 = arith.constant 0 : index
    %58 = vector.load %arg7[%c0_27, %c0_28, %c0_29] : memref<2x1x96xf32, #tpu.memory_space<vmem>>, vector<1x1x96xf32>
    %59 = vector.shape_cast %58 : vector<1x1x96xf32> to vector<1x96xf32>
    %60 = vector.broadcast %59 : vector<1x96xf32> to vector<16x96xf32>
    %61 = arith.addf %57, %60 : vector<16x96xf32>
    %c0_30 = arith.constant 0 : index
    %c0_31 = arith.constant 0 : index
    %c0_32 = arith.constant 0 : index
    %c0_33 = arith.constant 0 : index
    %62 = vector.load %arg8[%c0_30, %c0_31, %c0_32, %c0_33] : memref<2x4x8x32xbf16, #tpu.memory_space<vmem>>, vector<1x4x8x32xbf16>
    %63 = vector.shape_cast %62 : vector<1x4x8x32xbf16> to vector<4x8x32xbf16>
    %cst_34 = arith.constant 0.000000e+00 : f32
    %64 = vector.broadcast %cst_34 : f32 to vector<16x32xf32>
    %65 = vector.extract_strided_slice %61 {offsets = [0, 0], sizes = [16, 8], strides = [1, 1]} : vector<16x96xf32> to vector<16x8xf32>
    %66 = vector.shape_cast %65 : vector<16x8xf32> to vector<2x8x8xf32>
    %67 = arith.truncf %66 : vector<2x8x8xf32> to vector<2x8x8xbf16>
    %68 = vector.extract_strided_slice %61 {offsets = [0, 32], sizes = [16, 8], strides = [1, 1]} : vector<16x96xf32> to vector<16x8xf32>
    %69 = vector.shape_cast %68 : vector<16x8xf32> to vector<2x8x8xf32>
    %70 = arith.truncf %69 : vector<2x8x8xf32> to vector<2x8x8xbf16>
    %71 = vector.extract_strided_slice %61 {offsets = [0, 64], sizes = [16, 8], strides = [1, 1]} : vector<16x96xf32> to vector<16x8xf32>
    %72 = vector.shape_cast %71 : vector<16x8xf32> to vector<2x8x8xf32>
    %73 = arith.truncf %72 : vector<2x8x8xf32> to vector<2x8x8xbf16>
    "tpu.trace_start"() <{level = 10 : i32, message = "bqd,bkd->bqk"}> : () -> ()
    %cst_35 = arith.constant dense<0.000000e+00> : vector<2x8x8xf32>
    %74 = tpu.matmul %67, %70, %cst_35 {dimension_numbers = #tpu.dot_dimension_numbers<[2], [2], [1], [1], [0, 0, 0, 1, 1, 1], [0], [0]>} : vector<2x8x8xbf16>, vector<2x8x8xbf16>, vector<2x8x8xf32> -> vector<2x8x8xf32>
    "tpu.trace_stop"() : () -> ()
    %75 = arith.addf %74, %29 : vector<2x8x8xf32>
    %cst_36 = arith.constant dense<0xFF800000> : vector<2x8xf32>
    %76 = vector.multi_reduction <maximumf>, %75, %cst_36 [2] : vector<2x8x8xf32> to vector<2x8xf32>
    %77 = vector.shape_cast %76 : vector<2x8xf32> to vector<2x8x1xf32>
    %78 = vector.broadcast %77 : vector<2x8x1xf32> to vector<2x8x8xf32>
    %79 = arith.subf %75, %78 : vector<2x8x8xf32>
    %80 = math.exp %79 : vector<2x8x8xf32>
    %cst_37 = arith.constant dense<0.000000e+00> : vector<2x8xf32>
    %81 = vector.multi_reduction <add>, %80, %cst_37 [2] : vector<2x8x8xf32> to vector<2x8xf32>
    %82 = vector.shape_cast %81 : vector<2x8xf32> to vector<2x8x1xf32>
    %83 = tpu.reciprocal %82 {approx = true} : vector<2x8x1xf32> -> vector<2x8x1xf32>
    %84 = vector.broadcast %83 : vector<2x8x1xf32> to vector<2x8x8xf32>
    %85 = arith.mulf %80, %84 : vector<2x8x8xf32>
    %86 = arith.truncf %85 : vector<2x8x8xf32> to vector<2x8x8xbf16>
    "tpu.trace_start"() <{level = 10 : i32, message = "bqk,bkd->bqd"}> : () -> ()
    %cst_38 = arith.constant dense<0.000000e+00> : vector<2x8x8xf32>
    %87 = tpu.matmul %86, %73, %cst_38 {dimension_numbers = #tpu.dot_dimension_numbers<[2], [1], [1], [2], [0, 0, 0, 1, 1, 2], [0], [0]>} : vector<2x8x8xbf16>, vector<2x8x8xbf16>, vector<2x8x8xf32> -> vector<2x8x8xf32>
    "tpu.trace_stop"() : () -> ()
    %88 = vector.shape_cast %87 : vector<2x8x8xf32> to vector<16x8xf32>
    %89 = vector.extract_strided_slice %63 {offsets = [0, 0, 0], sizes = [1, 8, 32], strides = [1, 1, 1]} : vector<4x8x32xbf16> to vector<1x8x32xbf16>
    %90 = vector.shape_cast %89 : vector<1x8x32xbf16> to vector<8x32xbf16>
    %91 = arith.truncf %88 : vector<16x8xf32> to vector<16x8xbf16>
    %cst_39 = arith.constant dense<0.000000e+00> : vector<16x32xf32>
    %92 = tpu.matmul %91, %90, %cst_39 {dimension_numbers = #tpu.dot_dimension_numbers<[1], [0], [0], [1], [0, 0, 1, 1], [], []>} : vector<16x8xbf16>, vector<8x32xbf16>, vector<16x32xf32> -> vector<16x32xf32>
    %93 = arith.addf %64, %92 : vector<16x32xf32>
    %94 = vector.extract_strided_slice %61 {offsets = [0, 8], sizes = [16, 8], strides = [1, 1]} : vector<16x96xf32> to vector<16x8xf32>
    %95 = vector.shape_cast %94 : vector<16x8xf32> to vector<2x8x8xf32>
    %96 = arith.truncf %95 : vector<2x8x8xf32> to vector<2x8x8xbf16>
    %97 = vector.extract_strided_slice %61 {offsets = [0, 40], sizes = [16, 8], strides = [1, 1]} : vector<16x96xf32> to vector<16x8xf32>
    %98 = vector.shape_cast %97 : vector<16x8xf32> to vector<2x8x8xf32>
    %99 = arith.truncf %98 : vector<2x8x8xf32> to vector<2x8x8xbf16>
    %100 = vector.extract_strided_slice %61 {offsets = [0, 72], sizes = [16, 8], strides = [1, 1]} : vector<16x96xf32> to vector<16x8xf32>
    %101 = vector.shape_cast %100 : vector<16x8xf32> to vector<2x8x8xf32>
    %102 = arith.truncf %101 : vector<2x8x8xf32> to vector<2x8x8xbf16>
    "tpu.trace_start"() <{level = 10 : i32, message = "bqd,bkd->bqk"}> : () -> ()
    %cst_40 = arith.constant dense<0.000000e+00> : vector<2x8x8xf32>
    %103 = tpu.matmul %96, %99, %cst_40 {dimension_numbers = #tpu.dot_dimension_numbers<[2], [2], [1], [1], [0, 0, 0, 1, 1, 1], [0], [0]>} : vector<2x8x8xbf16>, vector<2x8x8xbf16>, vector<2x8x8xf32> -> vector<2x8x8xf32>
    "tpu.trace_stop"() : () -> ()
    %104 = arith.addf %103, %29 : vector<2x8x8xf32>
    %cst_41 = arith.constant dense<0xFF800000> : vector<2x8xf32>
    %105 = vector.multi_reduction <maximumf>, %104, %cst_41 [2] : vector<2x8x8xf32> to vector<2x8xf32>
    %106 = vector.shape_cast %105 : vector<2x8xf32> to vector<2x8x1xf32>
    %107 = vector.broadcast %106 : vector<2x8x1xf32> to vector<2x8x8xf32>
    %108 = arith.subf %104, %107 : vector<2x8x8xf32>
    %109 = math.exp %108 : vector<2x8x8xf32>
    %cst_42 = arith.constant dense<0.000000e+00> : vector<2x8xf32>
    %110 = vector.multi_reduction <add>, %109, %cst_42 [2] : vector<2x8x8xf32> to vector<2x8xf32>
    %111 = vector.shape_cast %110 : vector<2x8xf32> to vector<2x8x1xf32>
    %112 = tpu.reciprocal %111 {approx = true} : vector<2x8x1xf32> -> vector<2x8x1xf32>
    %113 = vector.broadcast %112 : vector<2x8x1xf32> to vector<2x8x8xf32>
    %114 = arith.mulf %109, %113 : vector<2x8x8xf32>
    %115 = arith.truncf %114 : vector<2x8x8xf32> to vector<2x8x8xbf16>
    "tpu.trace_start"() <{level = 10 : i32, message = "bqk,bkd->bqd"}> : () -> ()
    %cst_43 = arith.constant dense<0.000000e+00> : vector<2x8x8xf32>
    %116 = tpu.matmul %115, %102, %cst_43 {dimension_numbers = #tpu.dot_dimension_numbers<[2], [1], [1], [2], [0, 0, 0, 1, 1, 2], [0], [0]>} : vector<2x8x8xbf16>, vector<2x8x8xbf16>, vector<2x8x8xf32> -> vector<2x8x8xf32>
    "tpu.trace_stop"() : () -> ()
    %117 = vector.shape_cast %116 : vector<2x8x8xf32> to vector<16x8xf32>
    %118 = vector.extract_strided_slice %63 {offsets = [1, 0, 0], sizes = [1, 8, 32], strides = [1, 1, 1]} : vector<4x8x32xbf16> to vector<1x8x32xbf16>
    %119 = vector.shape_cast %118 : vector<1x8x32xbf16> to vector<8x32xbf16>
    %120 = arith.truncf %117 : vector<16x8xf32> to vector<16x8xbf16>
    %cst_44 = arith.constant dense<0.000000e+00> : vector<16x32xf32>
    %121 = tpu.matmul %120, %119, %cst_44 {dimension_numbers = #tpu.dot_dimension_numbers<[1], [0], [0], [1], [0, 0, 1, 1], [], []>} : vector<16x8xbf16>, vector<8x32xbf16>, vector<16x32xf32> -> vector<16x32xf32>
    %122 = arith.addf %93, %121 : vector<16x32xf32>
    %123 = vector.extract_strided_slice %61 {offsets = [0, 16], sizes = [16, 8], strides = [1, 1]} : vector<16x96xf32> to vector<16x8xf32>
    %124 = vector.shape_cast %123 : vector<16x8xf32> to vector<2x8x8xf32>
    %125 = arith.truncf %124 : vector<2x8x8xf32> to vector<2x8x8xbf16>
    %126 = vector.extract_strided_slice %61 {offsets = [0, 48], sizes = [16, 8], strides = [1, 1]} : vector<16x96xf32> to vector<16x8xf32>
    %127 = vector.shape_cast %126 : vector<16x8xf32> to vector<2x8x8xf32>
    %128 = arith.truncf %127 : vector<2x8x8xf32> to vector<2x8x8xbf16>
    %129 = vector.extract_strided_slice %61 {offsets = [0, 80], sizes = [16, 8], strides = [1, 1]} : vector<16x96xf32> to vector<16x8xf32>
    %130 = vector.shape_cast %129 : vector<16x8xf32> to vector<2x8x8xf32>
    %131 = arith.truncf %130 : vector<2x8x8xf32> to vector<2x8x8xbf16>
    "tpu.trace_start"() <{level = 10 : i32, message = "bqd,bkd->bqk"}> : () -> ()
    %cst_45 = arith.constant dense<0.000000e+00> : vector<2x8x8xf32>
    %132 = tpu.matmul %125, %128, %cst_45 {dimension_numbers = #tpu.dot_dimension_numbers<[2], [2], [1], [1], [0, 0, 0, 1, 1, 1], [0], [0]>} : vector<2x8x8xbf16>, vector<2x8x8xbf16>, vector<2x8x8xf32> -> vector<2x8x8xf32>
    "tpu.trace_stop"() : () -> ()
    %133 = arith.addf %132, %29 : vector<2x8x8xf32>
    %cst_46 = arith.constant dense<0xFF800000> : vector<2x8xf32>
    %134 = vector.multi_reduction <maximumf>, %133, %cst_46 [2] : vector<2x8x8xf32> to vector<2x8xf32>
    %135 = vector.shape_cast %134 : vector<2x8xf32> to vector<2x8x1xf32>
    %136 = vector.broadcast %135 : vector<2x8x1xf32> to vector<2x8x8xf32>
    %137 = arith.subf %133, %136 : vector<2x8x8xf32>
    %138 = math.exp %137 : vector<2x8x8xf32>
    %cst_47 = arith.constant dense<0.000000e+00> : vector<2x8xf32>
    %139 = vector.multi_reduction <add>, %138, %cst_47 [2] : vector<2x8x8xf32> to vector<2x8xf32>
    %140 = vector.shape_cast %139 : vector<2x8xf32> to vector<2x8x1xf32>
    %141 = tpu.reciprocal %140 {approx = true} : vector<2x8x1xf32> -> vector<2x8x1xf32>
    %142 = vector.broadcast %141 : vector<2x8x1xf32> to vector<2x8x8xf32>
    %143 = arith.mulf %138, %142 : vector<2x8x8xf32>
    %144 = arith.truncf %143 : vector<2x8x8xf32> to vector<2x8x8xbf16>
    "tpu.trace_start"() <{level = 10 : i32, message = "bqk,bkd->bqd"}> : () -> ()
    %cst_48 = arith.constant dense<0.000000e+00> : vector<2x8x8xf32>
    %145 = tpu.matmul %144, %131, %cst_48 {dimension_numbers = #tpu.dot_dimension_numbers<[2], [1], [1], [2], [0, 0, 0, 1, 1, 2], [0], [0]>} : vector<2x8x8xbf16>, vector<2x8x8xbf16>, vector<2x8x8xf32> -> vector<2x8x8xf32>
    "tpu.trace_stop"() : () -> ()
    %146 = vector.shape_cast %145 : vector<2x8x8xf32> to vector<16x8xf32>
    %147 = vector.extract_strided_slice %63 {offsets = [2, 0, 0], sizes = [1, 8, 32], strides = [1, 1, 1]} : vector<4x8x32xbf16> to vector<1x8x32xbf16>
    %148 = vector.shape_cast %147 : vector<1x8x32xbf16> to vector<8x32xbf16>
    %149 = arith.truncf %146 : vector<16x8xf32> to vector<16x8xbf16>
    %cst_49 = arith.constant dense<0.000000e+00> : vector<16x32xf32>
    %150 = tpu.matmul %149, %148, %cst_49 {dimension_numbers = #tpu.dot_dimension_numbers<[1], [0], [0], [1], [0, 0, 1, 1], [], []>} : vector<16x8xbf16>, vector<8x32xbf16>, vector<16x32xf32> -> vector<16x32xf32>
    %151 = arith.addf %122, %150 : vector<16x32xf32>
    %152 = vector.extract_strided_slice %61 {offsets = [0, 24], sizes = [16, 8], strides = [1, 1]} : vector<16x96xf32> to vector<16x8xf32>
    %153 = vector.shape_cast %152 : vector<16x8xf32> to vector<2x8x8xf32>
    %154 = arith.truncf %153 : vector<2x8x8xf32> to vector<2x8x8xbf16>
    %155 = vector.extract_strided_slice %61 {offsets = [0, 56], sizes = [16, 8], strides = [1, 1]} : vector<16x96xf32> to vector<16x8xf32>
    %156 = vector.shape_cast %155 : vector<16x8xf32> to vector<2x8x8xf32>
    %157 = arith.truncf %156 : vector<2x8x8xf32> to vector<2x8x8xbf16>
    %158 = vector.extract_strided_slice %61 {offsets = [0, 88], sizes = [16, 8], strides = [1, 1]} : vector<16x96xf32> to vector<16x8xf32>
    %159 = vector.shape_cast %158 : vector<16x8xf32> to vector<2x8x8xf32>
    %160 = arith.truncf %159 : vector<2x8x8xf32> to vector<2x8x8xbf16>
    "tpu.trace_start"() <{level = 10 : i32, message = "bqd,bkd->bqk"}> : () -> ()
    %cst_50 = arith.constant dense<0.000000e+00> : vector<2x8x8xf32>
    %161 = tpu.matmul %154, %157, %cst_50 {dimension_numbers = #tpu.dot_dimension_numbers<[2], [2], [1], [1], [0, 0, 0, 1, 1, 1], [0], [0]>} : vector<2x8x8xbf16>, vector<2x8x8xbf16>, vector<2x8x8xf32> -> vector<2x8x8xf32>
    "tpu.trace_stop"() : () -> ()
    %162 = arith.addf %161, %29 : vector<2x8x8xf32>
    %cst_51 = arith.constant dense<0xFF800000> : vector<2x8xf32>
    %163 = vector.multi_reduction <maximumf>, %162, %cst_51 [2] : vector<2x8x8xf32> to vector<2x8xf32>
    %164 = vector.shape_cast %163 : vector<2x8xf32> to vector<2x8x1xf32>
    %165 = vector.broadcast %164 : vector<2x8x1xf32> to vector<2x8x8xf32>
    %166 = arith.subf %162, %165 : vector<2x8x8xf32>
    %167 = math.exp %166 : vector<2x8x8xf32>
    %cst_52 = arith.constant dense<0.000000e+00> : vector<2x8xf32>
    %168 = vector.multi_reduction <add>, %167, %cst_52 [2] : vector<2x8x8xf32> to vector<2x8xf32>
    %169 = vector.shape_cast %168 : vector<2x8xf32> to vector<2x8x1xf32>
    %170 = tpu.reciprocal %169 {approx = true} : vector<2x8x1xf32> -> vector<2x8x1xf32>
    %171 = vector.broadcast %170 : vector<2x8x1xf32> to vector<2x8x8xf32>
    %172 = arith.mulf %167, %171 : vector<2x8x8xf32>
    %173 = arith.truncf %172 : vector<2x8x8xf32> to vector<2x8x8xbf16>
    "tpu.trace_start"() <{level = 10 : i32, message = "bqk,bkd->bqd"}> : () -> ()
    %cst_53 = arith.constant dense<0.000000e+00> : vector<2x8x8xf32>
    %174 = tpu.matmul %173, %160, %cst_53 {dimension_numbers = #tpu.dot_dimension_numbers<[2], [1], [1], [2], [0, 0, 0, 1, 1, 2], [0], [0]>} : vector<2x8x8xbf16>, vector<2x8x8xbf16>, vector<2x8x8xf32> -> vector<2x8x8xf32>
    "tpu.trace_stop"() : () -> ()
    %175 = vector.shape_cast %174 : vector<2x8x8xf32> to vector<16x8xf32>
    %176 = vector.extract_strided_slice %63 {offsets = [3, 0, 0], sizes = [1, 8, 32], strides = [1, 1, 1]} : vector<4x8x32xbf16> to vector<1x8x32xbf16>
    %177 = vector.shape_cast %176 : vector<1x8x32xbf16> to vector<8x32xbf16>
    %178 = arith.truncf %175 : vector<16x8xf32> to vector<16x8xbf16>
    %cst_54 = arith.constant dense<0.000000e+00> : vector<16x32xf32>
    %179 = tpu.matmul %178, %177, %cst_54 {dimension_numbers = #tpu.dot_dimension_numbers<[1], [0], [0], [1], [0, 0, 1, 1], [], []>} : vector<16x8xbf16>, vector<8x32xbf16>, vector<16x32xf32> -> vector<16x32xf32>
    %180 = arith.addf %151, %179 : vector<16x32xf32>
    %181 = arith.addf %26, %180 : vector<16x32xf32>
    %c0_55 = arith.constant 0 : index
    %c0_56 = arith.constant 0 : index
    %c0_57 = arith.constant 0 : index
    %182 = vector.load %arg9[%c0_55, %c0_56, %c0_57] : memref<2x1x32xf32, #tpu.memory_space<vmem>>, vector<1x1x32xf32>
    %183 = vector.shape_cast %182 : vector<1x1x32xf32> to vector<1x32xf32>
    %184 = vector.broadcast %183 : vector<1x32xf32> to vector<16x32xf32>
    %185 = arith.addf %181, %184 : vector<16x32xf32>
    %c0_58 = arith.constant 0 : index
    %c0_59 = arith.constant 0 : index
    %c0_60 = arith.constant 0 : index
    %186 = vector.load %arg10[%c0_58, %c0_59, %c0_60] : memref<2x1x32xf32, #tpu.memory_space<vmem>>, vector<1x1x32xf32>
    %187 = vector.shape_cast %186 : vector<1x1x32xf32> to vector<1x32xf32>
    %c0_61 = arith.constant 0 : index
    %c0_62 = arith.constant 0 : index
    %c0_63 = arith.constant 0 : index
    %188 = vector.load %arg11[%c0_61, %c0_62, %c0_63] : memref<2x1x32xf32, #tpu.memory_space<vmem>>, vector<1x1x32xf32>
    %189 = vector.shape_cast %188 : vector<1x1x32xf32> to vector<1x32xf32>
    %cst_64 = arith.constant dense<0.000000e+00> : vector<16xf32>
    %190 = vector.multi_reduction <add>, %185, %cst_64 [1] : vector<16x32xf32> to vector<16xf32>
    %191 = vector.shape_cast %190 : vector<16xf32> to vector<16x1xf32>
    %cst_65 = arith.constant 3.200000e+01 : f32
    %192 = vector.broadcast %cst_65 : f32 to vector<16x1xf32>
    %193 = arith.divf %191, %192 : vector<16x1xf32>
    %194 = vector.broadcast %193 : vector<16x1xf32> to vector<16x32xf32>
    %195 = arith.subf %185, %194 : vector<16x32xf32>
    %196 = arith.mulf %195, %195 : vector<16x32xf32>
    %cst_66 = arith.constant dense<0.000000e+00> : vector<16xf32>
    %197 = vector.multi_reduction <add>, %196, %cst_66 [1] : vector<16x32xf32> to vector<16xf32>
    %198 = vector.shape_cast %197 : vector<16xf32> to vector<16x1xf32>
    %cst_67 = arith.constant 3.200000e+01 : f32
    %199 = vector.broadcast %cst_67 : f32 to vector<16x1xf32>
    %200 = arith.divf %198, %199 : vector<16x1xf32>
    %cst_68 = arith.constant 9.99999974E-6 : f32
    %201 = vector.broadcast %cst_68 : f32 to vector<16x1xf32>
    %202 = arith.addf %200, %201 : vector<16x1xf32>
    %203 = math.rsqrt %202 : vector<16x1xf32>
    %204 = vector.broadcast %203 : vector<16x1xf32> to vector<16x32xf32>
    %205 = arith.mulf %195, %204 : vector<16x32xf32>
    %206 = vector.broadcast %187 : vector<1x32xf32> to vector<16x32xf32>
    %207 = arith.mulf %205, %206 : vector<16x32xf32>
    %208 = vector.broadcast %189 : vector<1x32xf32> to vector<16x32xf32>
    %209 = arith.addf %207, %208 : vector<16x32xf32>
    %c0_69 = arith.constant 0 : index
    %c0_70 = arith.constant 0 : index
    %c0_71 = arith.constant 0 : index
    %210 = vector.load %arg12[%c0_69, %c0_70, %c0_71] : memref<2x32x128xbf16, #tpu.memory_space<vmem>>, vector<1x32x128xbf16>
    %211 = vector.shape_cast %210 : vector<1x32x128xbf16> to vector<32x128xbf16>
    %212 = arith.truncf %209 : vector<16x32xf32> to vector<16x32xbf16>
    %cst_72 = arith.constant dense<0.000000e+00> : vector<16x128xf32>
    %213 = tpu.matmul %212, %211, %cst_72 {dimension_numbers = #tpu.dot_dimension_numbers<[1], [0], [0], [1], [0, 0, 1, 1], [], []>} : vector<16x32xbf16>, vector<32x128xbf16>, vector<16x128xf32> -> vector<16x128xf32>
    %c0_73 = arith.constant 0 : index
    %c0_74 = arith.constant 0 : index
    %c0_75 = arith.constant 0 : index
    %214 = vector.load %arg13[%c0_73, %c0_74, %c0_75] : memref<2x1x128xf32, #tpu.memory_space<vmem>>, vector<1x1x128xf32>
    %215 = vector.shape_cast %214 : vector<1x1x128xf32> to vector<1x128xf32>
    %216 = vector.broadcast %215 : vector<1x128xf32> to vector<16x128xf32>
    %217 = arith.addf %213, %216 : vector<16x128xf32>
    %cst_76 = arith.constant 5.000000e-01 : f32
    %218 = vector.broadcast %cst_76 : f32 to vector<16x128xf32>
    %219 = arith.mulf %218, %217 : vector<16x128xf32>
    %cst_77 = arith.constant 4.471500e-02 : f32
    %220 = vector.broadcast %cst_77 : f32 to vector<16x128xf32>
    %221 = arith.mulf %220, %217 : vector<16x128xf32>
    %222 = arith.mulf %221, %217 : vector<16x128xf32>
    %223 = arith.mulf %222, %217 : vector<16x128xf32>
    %224 = arith.addf %217, %223 : vector<16x128xf32>
    %cst_78 = arith.constant 0.797884583 : f32
    %225 = vector.broadcast %cst_78 : f32 to vector<16x128xf32>
    %226 = arith.mulf %225, %224 : vector<16x128xf32>
    %227 = math.tanh %226 : vector<16x128xf32>
    %cst_79 = arith.constant 1.000000e+00 : f32
    %228 = vector.broadcast %cst_79 : f32 to vector<16x128xf32>
    %229 = arith.addf %228, %227 : vector<16x128xf32>
    %230 = arith.mulf %219, %229 : vector<16x128xf32>
    %c0_80 = arith.constant 0 : index
    %c0_81 = arith.constant 0 : index
    %c0_82 = arith.constant 0 : index
    %231 = vector.load %arg14[%c0_80, %c0_81, %c0_82] : memref<2x128x32xbf16, #tpu.memory_space<vmem>>, vector<1x128x32xbf16>
    %232 = vector.shape_cast %231 : vector<1x128x32xbf16> to vector<128x32xbf16>
    %233 = arith.truncf %230 : vector<16x128xf32> to vector<16x128xbf16>
    %cst_83 = arith.constant dense<0.000000e+00> : vector<16x32xf32>
    %234 = tpu.matmul %233, %232, %cst_83 {dimension_numbers = #tpu.dot_dimension_numbers<[1], [0], [0], [1], [0, 0, 1, 1], [], []>} : vector<16x128xbf16>, vector<128x32xbf16>, vector<16x32xf32> -> vector<16x32xf32>
    %235 = arith.addf %185, %234 : vector<16x32xf32>
    %c0_84 = arith.constant 0 : index
    %c0_85 = arith.constant 0 : index
    %c0_86 = arith.constant 0 : index
    %236 = vector.load %arg15[%c0_84, %c0_85, %c0_86] : memref<2x1x32xf32, #tpu.memory_space<vmem>>, vector<1x1x32xf32>
    %237 = vector.shape_cast %236 : vector<1x1x32xf32> to vector<1x32xf32>
    %238 = vector.broadcast %237 : vector<1x32xf32> to vector<16x32xf32>
    %239 = arith.addf %235, %238 : vector<16x32xf32>
    %c1 = arith.constant 1 : index
    %c0_87 = arith.constant 0 : index
    %c0_88 = arith.constant 0 : index
    %240 = vector.load %arg4[%c1, %c0_87, %c0_88] : memref<2x1x32xf32, #tpu.memory_space<vmem>>, vector<1x1x32xf32>
    %241 = vector.shape_cast %240 : vector<1x1x32xf32> to vector<1x32xf32>
    %c1_89 = arith.constant 1 : index
    %c0_90 = arith.constant 0 : index
    %c0_91 = arith.constant 0 : index
    %242 = vector.load %arg5[%c1_89, %c0_90, %c0_91] : memref<2x1x32xf32, #tpu.memory_space<vmem>>, vector<1x1x32xf32>
    %243 = vector.shape_cast %242 : vector<1x1x32xf32> to vector<1x32xf32>
    %cst_92 = arith.constant dense<0.000000e+00> : vector<16xf32>
    %244 = vector.multi_reduction <add>, %239, %cst_92 [1] : vector<16x32xf32> to vector<16xf32>
    %245 = vector.shape_cast %244 : vector<16xf32> to vector<16x1xf32>
    %cst_93 = arith.constant 3.200000e+01 : f32
    %246 = vector.broadcast %cst_93 : f32 to vector<16x1xf32>
    %247 = arith.divf %245, %246 : vector<16x1xf32>
    %248 = vector.broadcast %247 : vector<16x1xf32> to vector<16x32xf32>
    %249 = arith.subf %239, %248 : vector<16x32xf32>
    %250 = arith.mulf %249, %249 : vector<16x32xf32>
    %cst_94 = arith.constant dense<0.000000e+00> : vector<16xf32>
    %251 = vector.multi_reduction <add>, %250, %cst_94 [1] : vector<16x32xf32> to vector<16xf32>
    %252 = vector.shape_cast %251 : vector<16xf32> to vector<16x1xf32>
    %cst_95 = arith.constant 3.200000e+01 : f32
    %253 = vector.broadcast %cst_95 : f32 to vector<16x1xf32>
    %254 = arith.divf %252, %253 : vector<16x1xf32>
    %cst_96 = arith.constant 9.99999974E-6 : f32
    %255 = vector.broadcast %cst_96 : f32 to vector<16x1xf32>
    %256 = arith.addf %254, %255 : vector<16x1xf32>
    %257 = math.rsqrt %256 : vector<16x1xf32>
    %258 = vector.broadcast %257 : vector<16x1xf32> to vector<16x32xf32>
    %259 = arith.mulf %249, %258 : vector<16x32xf32>
    %260 = vector.broadcast %241 : vector<1x32xf32> to vector<16x32xf32>
    %261 = arith.mulf %259, %260 : vector<16x32xf32>
    %262 = vector.broadcast %243 : vector<1x32xf32> to vector<16x32xf32>
    %263 = arith.addf %261, %262 : vector<16x32xf32>
    %c1_97 = arith.constant 1 : index
    %c0_98 = arith.constant 0 : index
    %c0_99 = arith.constant 0 : index
    %264 = vector.load %arg6[%c1_97, %c0_98, %c0_99] : memref<2x32x96xbf16, #tpu.memory_space<vmem>>, vector<1x32x96xbf16>
    %265 = vector.shape_cast %264 : vector<1x32x96xbf16> to vector<32x96xbf16>
    %266 = arith.truncf %263 : vector<16x32xf32> to vector<16x32xbf16>
    %cst_100 = arith.constant dense<0.000000e+00> : vector<16x96xf32>
    %267 = tpu.matmul %266, %265, %cst_100 {dimension_numbers = #tpu.dot_dimension_numbers<[1], [0], [0], [1], [0, 0, 1, 1], [], []>} : vector<16x32xbf16>, vector<32x96xbf16>, vector<16x96xf32> -> vector<16x96xf32>
    %c1_101 = arith.constant 1 : index
    %c0_102 = arith.constant 0 : index
    %c0_103 = arith.constant 0 : index
    %268 = vector.load %arg7[%c1_101, %c0_102, %c0_103] : memref<2x1x96xf32, #tpu.memory_space<vmem>>, vector<1x1x96xf32>
    %269 = vector.shape_cast %268 : vector<1x1x96xf32> to vector<1x96xf32>
    %270 = vector.broadcast %269 : vector<1x96xf32> to vector<16x96xf32>
    %271 = arith.addf %267, %270 : vector<16x96xf32>
    %c1_104 = arith.constant 1 : index
    %c0_105 = arith.constant 0 : index
    %c0_106 = arith.constant 0 : index
    %c0_107 = arith.constant 0 : index
    %272 = vector.load %arg8[%c1_104, %c0_105, %c0_106, %c0_107] : memref<2x4x8x32xbf16, #tpu.memory_space<vmem>>, vector<1x4x8x32xbf16>
    %273 = vector.shape_cast %272 : vector<1x4x8x32xbf16> to vector<4x8x32xbf16>
    %cst_108 = arith.constant 0.000000e+00 : f32
    %274 = vector.broadcast %cst_108 : f32 to vector<16x32xf32>
    %275 = vector.extract_strided_slice %271 {offsets = [0, 0], sizes = [16, 8], strides = [1, 1]} : vector<16x96xf32> to vector<16x8xf32>
    %276 = vector.shape_cast %275 : vector<16x8xf32> to vector<2x8x8xf32>
    %277 = arith.truncf %276 : vector<2x8x8xf32> to vector<2x8x8xbf16>
    %278 = vector.extract_strided_slice %271 {offsets = [0, 32], sizes = [16, 8], strides = [1, 1]} : vector<16x96xf32> to vector<16x8xf32>
    %279 = vector.shape_cast %278 : vector<16x8xf32> to vector<2x8x8xf32>
    %280 = arith.truncf %279 : vector<2x8x8xf32> to vector<2x8x8xbf16>
    %281 = vector.extract_strided_slice %271 {offsets = [0, 64], sizes = [16, 8], strides = [1, 1]} : vector<16x96xf32> to vector<16x8xf32>
    %282 = vector.shape_cast %281 : vector<16x8xf32> to vector<2x8x8xf32>
    %283 = arith.truncf %282 : vector<2x8x8xf32> to vector<2x8x8xbf16>
    "tpu.trace_start"() <{level = 10 : i32, message = "bqd,bkd->bqk"}> : () -> ()
    %cst_109 = arith.constant dense<0.000000e+00> : vector<2x8x8xf32>
    %284 = tpu.matmul %277, %280, %cst_109 {dimension_numbers = #tpu.dot_dimension_numbers<[2], [2], [1], [1], [0, 0, 0, 1, 1, 1], [0], [0]>} : vector<2x8x8xbf16>, vector<2x8x8xbf16>, vector<2x8x8xf32> -> vector<2x8x8xf32>
    "tpu.trace_stop"() : () -> ()
    %285 = arith.addf %284, %29 : vector<2x8x8xf32>
    %cst_110 = arith.constant dense<0xFF800000> : vector<2x8xf32>
    %286 = vector.multi_reduction <maximumf>, %285, %cst_110 [2] : vector<2x8x8xf32> to vector<2x8xf32>
    %287 = vector.shape_cast %286 : vector<2x8xf32> to vector<2x8x1xf32>
    %288 = vector.broadcast %287 : vector<2x8x1xf32> to vector<2x8x8xf32>
    %289 = arith.subf %285, %288 : vector<2x8x8xf32>
    %290 = math.exp %289 : vector<2x8x8xf32>
    %cst_111 = arith.constant dense<0.000000e+00> : vector<2x8xf32>
    %291 = vector.multi_reduction <add>, %290, %cst_111 [2] : vector<2x8x8xf32> to vector<2x8xf32>
    %292 = vector.shape_cast %291 : vector<2x8xf32> to vector<2x8x1xf32>
    %293 = tpu.reciprocal %292 {approx = true} : vector<2x8x1xf32> -> vector<2x8x1xf32>
    %294 = vector.broadcast %293 : vector<2x8x1xf32> to vector<2x8x8xf32>
    %295 = arith.mulf %290, %294 : vector<2x8x8xf32>
    %296 = arith.truncf %295 : vector<2x8x8xf32> to vector<2x8x8xbf16>
    "tpu.trace_start"() <{level = 10 : i32, message = "bqk,bkd->bqd"}> : () -> ()
    %cst_112 = arith.constant dense<0.000000e+00> : vector<2x8x8xf32>
    %297 = tpu.matmul %296, %283, %cst_112 {dimension_numbers = #tpu.dot_dimension_numbers<[2], [1], [1], [2], [0, 0, 0, 1, 1, 2], [0], [0]>} : vector<2x8x8xbf16>, vector<2x8x8xbf16>, vector<2x8x8xf32> -> vector<2x8x8xf32>
    "tpu.trace_stop"() : () -> ()
    %298 = vector.shape_cast %297 : vector<2x8x8xf32> to vector<16x8xf32>
    %299 = vector.extract_strided_slice %273 {offsets = [0, 0, 0], sizes = [1, 8, 32], strides = [1, 1, 1]} : vector<4x8x32xbf16> to vector<1x8x32xbf16>
    %300 = vector.shape_cast %299 : vector<1x8x32xbf16> to vector<8x32xbf16>
    %301 = arith.truncf %298 : vector<16x8xf32> to vector<16x8xbf16>
    %cst_113 = arith.constant dense<0.000000e+00> : vector<16x32xf32>
    %302 = tpu.matmul %301, %300, %cst_113 {dimension_numbers = #tpu.dot_dimension_numbers<[1], [0], [0], [1], [0, 0, 1, 1], [], []>} : vector<16x8xbf16>, vector<8x32xbf16>, vector<16x32xf32> -> vector<16x32xf32>
    %303 = arith.addf %274, %302 : vector<16x32xf32>
    %304 = vector.extract_strided_slice %271 {offsets = [0, 8], sizes = [16, 8], strides = [1, 1]} : vector<16x96xf32> to vector<16x8xf32>
    %305 = vector.shape_cast %304 : vector<16x8xf32> to vector<2x8x8xf32>
    %306 = arith.truncf %305 : vector<2x8x8xf32> to vector<2x8x8xbf16>
    %307 = vector.extract_strided_slice %271 {offsets = [0, 40], sizes = [16, 8], strides = [1, 1]} : vector<16x96xf32> to vector<16x8xf32>
    %308 = vector.shape_cast %307 : vector<16x8xf32> to vector<2x8x8xf32>
    %309 = arith.truncf %308 : vector<2x8x8xf32> to vector<2x8x8xbf16>
    %310 = vector.extract_strided_slice %271 {offsets = [0, 72], sizes = [16, 8], strides = [1, 1]} : vector<16x96xf32> to vector<16x8xf32>
    %311 = vector.shape_cast %310 : vector<16x8xf32> to vector<2x8x8xf32>
    %312 = arith.truncf %311 : vector<2x8x8xf32> to vector<2x8x8xbf16>
    "tpu.trace_start"() <{level = 10 : i32, message = "bqd,bkd->bqk"}> : () -> ()
    %cst_114 = arith.constant dense<0.000000e+00> : vector<2x8x8xf32>
    %313 = tpu.matmul %306, %309, %cst_114 {dimension_numbers = #tpu.dot_dimension_numbers<[2], [2], [1], [1], [0, 0, 0, 1, 1, 1], [0], [0]>} : vector<2x8x8xbf16>, vector<2x8x8xbf16>, vector<2x8x8xf32> -> vector<2x8x8xf32>
    "tpu.trace_stop"() : () -> ()
    %314 = arith.addf %313, %29 : vector<2x8x8xf32>
    %cst_115 = arith.constant dense<0xFF800000> : vector<2x8xf32>
    %315 = vector.multi_reduction <maximumf>, %314, %cst_115 [2] : vector<2x8x8xf32> to vector<2x8xf32>
    %316 = vector.shape_cast %315 : vector<2x8xf32> to vector<2x8x1xf32>
    %317 = vector.broadcast %316 : vector<2x8x1xf32> to vector<2x8x8xf32>
    %318 = arith.subf %314, %317 : vector<2x8x8xf32>
    %319 = math.exp %318 : vector<2x8x8xf32>
    %cst_116 = arith.constant dense<0.000000e+00> : vector<2x8xf32>
    %320 = vector.multi_reduction <add>, %319, %cst_116 [2] : vector<2x8x8xf32> to vector<2x8xf32>
    %321 = vector.shape_cast %320 : vector<2x8xf32> to vector<2x8x1xf32>
    %322 = tpu.reciprocal %321 {approx = true} : vector<2x8x1xf32> -> vector<2x8x1xf32>
    %323 = vector.broadcast %322 : vector<2x8x1xf32> to vector<2x8x8xf32>
    %324 = arith.mulf %319, %323 : vector<2x8x8xf32>
    %325 = arith.truncf %324 : vector<2x8x8xf32> to vector<2x8x8xbf16>
    "tpu.trace_start"() <{level = 10 : i32, message = "bqk,bkd->bqd"}> : () -> ()
    %cst_117 = arith.constant dense<0.000000e+00> : vector<2x8x8xf32>
    %326 = tpu.matmul %325, %312, %cst_117 {dimension_numbers = #tpu.dot_dimension_numbers<[2], [1], [1], [2], [0, 0, 0, 1, 1, 2], [0], [0]>} : vector<2x8x8xbf16>, vector<2x8x8xbf16>, vector<2x8x8xf32> -> vector<2x8x8xf32>
    "tpu.trace_stop"() : () -> ()
    %327 = vector.shape_cast %326 : vector<2x8x8xf32> to vector<16x8xf32>
    %328 = vector.extract_strided_slice %273 {offsets = [1, 0, 0], sizes = [1, 8, 32], strides = [1, 1, 1]} : vector<4x8x32xbf16> to vector<1x8x32xbf16>
    %329 = vector.shape_cast %328 : vector<1x8x32xbf16> to vector<8x32xbf16>
    %330 = arith.truncf %327 : vector<16x8xf32> to vector<16x8xbf16>
    %cst_118 = arith.constant dense<0.000000e+00> : vector<16x32xf32>
    %331 = tpu.matmul %330, %329, %cst_118 {dimension_numbers = #tpu.dot_dimension_numbers<[1], [0], [0], [1], [0, 0, 1, 1], [], []>} : vector<16x8xbf16>, vector<8x32xbf16>, vector<16x32xf32> -> vector<16x32xf32>
    %332 = arith.addf %303, %331 : vector<16x32xf32>
    %333 = vector.extract_strided_slice %271 {offsets = [0, 16], sizes = [16, 8], strides = [1, 1]} : vector<16x96xf32> to vector<16x8xf32>
    %334 = vector.shape_cast %333 : vector<16x8xf32> to vector<2x8x8xf32>
    %335 = arith.truncf %334 : vector<2x8x8xf32> to vector<2x8x8xbf16>
    %336 = vector.extract_strided_slice %271 {offsets = [0, 48], sizes = [16, 8], strides = [1, 1]} : vector<16x96xf32> to vector<16x8xf32>
    %337 = vector.shape_cast %336 : vector<16x8xf32> to vector<2x8x8xf32>
    %338 = arith.truncf %337 : vector<2x8x8xf32> to vector<2x8x8xbf16>
    %339 = vector.extract_strided_slice %271 {offsets = [0, 80], sizes = [16, 8], strides = [1, 1]} : vector<16x96xf32> to vector<16x8xf32>
    %340 = vector.shape_cast %339 : vector<16x8xf32> to vector<2x8x8xf32>
    %341 = arith.truncf %340 : vector<2x8x8xf32> to vector<2x8x8xbf16>
    "tpu.trace_start"() <{level = 10 : i32, message = "bqd,bkd->bqk"}> : () -> ()
    %cst_119 = arith.constant dense<0.000000e+00> : vector<2x8x8xf32>
    %342 = tpu.matmul %335, %338, %cst_119 {dimension_numbers = #tpu.dot_dimension_numbers<[2], [2], [1], [1], [0, 0, 0, 1, 1, 1], [0], [0]>} : vector<2x8x8xbf16>, vector<2x8x8xbf16>, vector<2x8x8xf32> -> vector<2x8x8xf32>
    "tpu.trace_stop"() : () -> ()
    %343 = arith.addf %342, %29 : vector<2x8x8xf32>
    %cst_120 = arith.constant dense<0xFF800000> : vector<2x8xf32>
    %344 = vector.multi_reduction <maximumf>, %343, %cst_120 [2] : vector<2x8x8xf32> to vector<2x8xf32>
    %345 = vector.shape_cast %344 : vector<2x8xf32> to vector<2x8x1xf32>
    %346 = vector.broadcast %345 : vector<2x8x1xf32> to vector<2x8x8xf32>
    %347 = arith.subf %343, %346 : vector<2x8x8xf32>
    %348 = math.exp %347 : vector<2x8x8xf32>
    %cst_121 = arith.constant dense<0.000000e+00> : vector<2x8xf32>
    %349 = vector.multi_reduction <add>, %348, %cst_121 [2] : vector<2x8x8xf32> to vector<2x8xf32>
    %350 = vector.shape_cast %349 : vector<2x8xf32> to vector<2x8x1xf32>
    %351 = tpu.reciprocal %350 {approx = true} : vector<2x8x1xf32> -> vector<2x8x1xf32>
    %352 = vector.broadcast %351 : vector<2x8x1xf32> to vector<2x8x8xf32>
    %353 = arith.mulf %348, %352 : vector<2x8x8xf32>
    %354 = arith.truncf %353 : vector<2x8x8xf32> to vector<2x8x8xbf16>
    "tpu.trace_start"() <{level = 10 : i32, message = "bqk,bkd->bqd"}> : () -> ()
    %cst_122 = arith.constant dense<0.000000e+00> : vector<2x8x8xf32>
    %355 = tpu.matmul %354, %341, %cst_122 {dimension_numbers = #tpu.dot_dimension_numbers<[2], [1], [1], [2], [0, 0, 0, 1, 1, 2], [0], [0]>} : vector<2x8x8xbf16>, vector<2x8x8xbf16>, vector<2x8x8xf32> -> vector<2x8x8xf32>
    "tpu.trace_stop"() : () -> ()
    %356 = vector.shape_cast %355 : vector<2x8x8xf32> to vector<16x8xf32>
    %357 = vector.extract_strided_slice %273 {offsets = [2, 0, 0], sizes = [1, 8, 32], strides = [1, 1, 1]} : vector<4x8x32xbf16> to vector<1x8x32xbf16>
    %358 = vector.shape_cast %357 : vector<1x8x32xbf16> to vector<8x32xbf16>
    %359 = arith.truncf %356 : vector<16x8xf32> to vector<16x8xbf16>
    %cst_123 = arith.constant dense<0.000000e+00> : vector<16x32xf32>
    %360 = tpu.matmul %359, %358, %cst_123 {dimension_numbers = #tpu.dot_dimension_numbers<[1], [0], [0], [1], [0, 0, 1, 1], [], []>} : vector<16x8xbf16>, vector<8x32xbf16>, vector<16x32xf32> -> vector<16x32xf32>
    %361 = arith.addf %332, %360 : vector<16x32xf32>
    %362 = vector.extract_strided_slice %271 {offsets = [0, 24], sizes = [16, 8], strides = [1, 1]} : vector<16x96xf32> to vector<16x8xf32>
    %363 = vector.shape_cast %362 : vector<16x8xf32> to vector<2x8x8xf32>
    %364 = arith.truncf %363 : vector<2x8x8xf32> to vector<2x8x8xbf16>
    %365 = vector.extract_strided_slice %271 {offsets = [0, 56], sizes = [16, 8], strides = [1, 1]} : vector<16x96xf32> to vector<16x8xf32>
    %366 = vector.shape_cast %365 : vector<16x8xf32> to vector<2x8x8xf32>
    %367 = arith.truncf %366 : vector<2x8x8xf32> to vector<2x8x8xbf16>
    %368 = vector.extract_strided_slice %271 {offsets = [0, 88], sizes = [16, 8], strides = [1, 1]} : vector<16x96xf32> to vector<16x8xf32>
    %369 = vector.shape_cast %368 : vector<16x8xf32> to vector<2x8x8xf32>
    %370 = arith.truncf %369 : vector<2x8x8xf32> to vector<2x8x8xbf16>
    "tpu.trace_start"() <{level = 10 : i32, message = "bqd,bkd->bqk"}> : () -> ()
    %cst_124 = arith.constant dense<0.000000e+00> : vector<2x8x8xf32>
    %371 = tpu.matmul %364, %367, %cst_124 {dimension_numbers = #tpu.dot_dimension_numbers<[2], [2], [1], [1], [0, 0, 0, 1, 1, 1], [0], [0]>} : vector<2x8x8xbf16>, vector<2x8x8xbf16>, vector<2x8x8xf32> -> vector<2x8x8xf32>
    "tpu.trace_stop"() : () -> ()
    %372 = arith.addf %371, %29 : vector<2x8x8xf32>
    %cst_125 = arith.constant dense<0xFF800000> : vector<2x8xf32>
    %373 = vector.multi_reduction <maximumf>, %372, %cst_125 [2] : vector<2x8x8xf32> to vector<2x8xf32>
    %374 = vector.shape_cast %373 : vector<2x8xf32> to vector<2x8x1xf32>
    %375 = vector.broadcast %374 : vector<2x8x1xf32> to vector<2x8x8xf32>
    %376 = arith.subf %372, %375 : vector<2x8x8xf32>
    %377 = math.exp %376 : vector<2x8x8xf32>
    %cst_126 = arith.constant dense<0.000000e+00> : vector<2x8xf32>
    %378 = vector.multi_reduction <add>, %377, %cst_126 [2] : vector<2x8x8xf32> to vector<2x8xf32>
    %379 = vector.shape_cast %378 : vector<2x8xf32> to vector<2x8x1xf32>
    %380 = tpu.reciprocal %379 {approx = true} : vector<2x8x1xf32> -> vector<2x8x1xf32>
    %381 = vector.broadcast %380 : vector<2x8x1xf32> to vector<2x8x8xf32>
    %382 = arith.mulf %377, %381 : vector<2x8x8xf32>
    %383 = arith.truncf %382 : vector<2x8x8xf32> to vector<2x8x8xbf16>
    "tpu.trace_start"() <{level = 10 : i32, message = "bqk,bkd->bqd"}> : () -> ()
    %cst_127 = arith.constant dense<0.000000e+00> : vector<2x8x8xf32>
    %384 = tpu.matmul %383, %370, %cst_127 {dimension_numbers = #tpu.dot_dimension_numbers<[2], [1], [1], [2], [0, 0, 0, 1, 1, 2], [0], [0]>} : vector<2x8x8xbf16>, vector<2x8x8xbf16>, vector<2x8x8xf32> -> vector<2x8x8xf32>
    "tpu.trace_stop"() : () -> ()
    %385 = vector.shape_cast %384 : vector<2x8x8xf32> to vector<16x8xf32>
    %386 = vector.extract_strided_slice %273 {offsets = [3, 0, 0], sizes = [1, 8, 32], strides = [1, 1, 1]} : vector<4x8x32xbf16> to vector<1x8x32xbf16>
    %387 = vector.shape_cast %386 : vector<1x8x32xbf16> to vector<8x32xbf16>
    %388 = arith.truncf %385 : vector<16x8xf32> to vector<16x8xbf16>
    %cst_128 = arith.constant dense<0.000000e+00> : vector<16x32xf32>
    %389 = tpu.matmul %388, %387, %cst_128 {dimension_numbers = #tpu.dot_dimension_numbers<[1], [0], [0], [1], [0, 0, 1, 1], [], []>} : vector<16x8xbf16>, vector<8x32xbf16>, vector<16x32xf32> -> vector<16x32xf32>
    %390 = arith.addf %361, %389 : vector<16x32xf32>
    %391 = arith.addf %239, %390 : vector<16x32xf32>
    %c1_129 = arith.constant 1 : index
    %c0_130 = arith.constant 0 : index
    %c0_131 = arith.constant 0 : index
    %392 = vector.load %arg9[%c1_129, %c0_130, %c0_131] : memref<2x1x32xf32, #tpu.memory_space<vmem>>, vector<1x1x32xf32>
    %393 = vector.shape_cast %392 : vector<1x1x32xf32> to vector<1x32xf32>
    %394 = vector.broadcast %393 : vector<1x32xf32> to vector<16x32xf32>
    %395 = arith.addf %391, %394 : vector<16x32xf32>
    %c1_132 = arith.constant 1 : index
    %c0_133 = arith.constant 0 : index
    %c0_134 = arith.constant 0 : index
    %396 = vector.load %arg10[%c1_132, %c0_133, %c0_134] : memref<2x1x32xf32, #tpu.memory_space<vmem>>, vector<1x1x32xf32>
    %397 = vector.shape_cast %396 : vector<1x1x32xf32> to vector<1x32xf32>
    %c1_135 = arith.constant 1 : index
    %c0_136 = arith.constant 0 : index
    %c0_137 = arith.constant 0 : index
    %398 = vector.load %arg11[%c1_135, %c0_136, %c0_137] : memref<2x1x32xf32, #tpu.memory_space<vmem>>, vector<1x1x32xf32>
    %399 = vector.shape_cast %398 : vector<1x1x32xf32> to vector<1x32xf32>
    %cst_138 = arith.constant dense<0.000000e+00> : vector<16xf32>
    %400 = vector.multi_reduction <add>, %395, %cst_138 [1] : vector<16x32xf32> to vector<16xf32>
    %401 = vector.shape_cast %400 : vector<16xf32> to vector<16x1xf32>
    %cst_139 = arith.constant 3.200000e+01 : f32
    %402 = vector.broadcast %cst_139 : f32 to vector<16x1xf32>
    %403 = arith.divf %401, %402 : vector<16x1xf32>
    %404 = vector.broadcast %403 : vector<16x1xf32> to vector<16x32xf32>
    %405 = arith.subf %395, %404 : vector<16x32xf32>
    %406 = arith.mulf %405, %405 : vector<16x32xf32>
    %cst_140 = arith.constant dense<0.000000e+00> : vector<16xf32>
    %407 = vector.multi_reduction <add>, %406, %cst_140 [1] : vector<16x32xf32> to vector<16xf32>
    %408 = vector.shape_cast %407 : vector<16xf32> to vector<16x1xf32>
    %cst_141 = arith.constant 3.200000e+01 : f32
    %409 = vector.broadcast %cst_141 : f32 to vector<16x1xf32>
    %410 = arith.divf %408, %409 : vector<16x1xf32>
    %cst_142 = arith.constant 9.99999974E-6 : f32
    %411 = vector.broadcast %cst_142 : f32 to vector<16x1xf32>
    %412 = arith.addf %410, %411 : vector<16x1xf32>
    %413 = math.rsqrt %412 : vector<16x1xf32>
    %414 = vector.broadcast %413 : vector<16x1xf32> to vector<16x32xf32>
    %415 = arith.mulf %405, %414 : vector<16x32xf32>
    %416 = vector.broadcast %397 : vector<1x32xf32> to vector<16x32xf32>
    %417 = arith.mulf %415, %416 : vector<16x32xf32>
    %418 = vector.broadcast %399 : vector<1x32xf32> to vector<16x32xf32>
    %419 = arith.addf %417, %418 : vector<16x32xf32>
    %c1_143 = arith.constant 1 : index
    %c0_144 = arith.constant 0 : index
    %c0_145 = arith.constant 0 : index
    %420 = vector.load %arg12[%c1_143, %c0_144, %c0_145] : memref<2x32x128xbf16, #tpu.memory_space<vmem>>, vector<1x32x128xbf16>
    %421 = vector.shape_cast %420 : vector<1x32x128xbf16> to vector<32x128xbf16>
    %422 = arith.truncf %419 : vector<16x32xf32> to vector<16x32xbf16>
    %cst_146 = arith.constant dense<0.000000e+00> : vector<16x128xf32>
    %423 = tpu.matmul %422, %421, %cst_146 {dimension_numbers = #tpu.dot_dimension_numbers<[1], [0], [0], [1], [0, 0, 1, 1], [], []>} : vector<16x32xbf16>, vector<32x128xbf16>, vector<16x128xf32> -> vector<16x128xf32>
    %c1_147 = arith.constant 1 : index
    %c0_148 = arith.constant 0 : index
    %c0_149 = arith.constant 0 : index
    %424 = vector.load %arg13[%c1_147, %c0_148, %c0_149] : memref<2x1x128xf32, #tpu.memory_space<vmem>>, vector<1x1x128xf32>
    %425 = vector.shape_cast %424 : vector<1x1x128xf32> to vector<1x128xf32>
    %426 = vector.broadcast %425 : vector<1x128xf32> to vector<16x128xf32>
    %427 = arith.addf %423, %426 : vector<16x128xf32>
    %cst_150 = arith.constant 5.000000e-01 : f32
    %428 = vector.broadcast %cst_150 : f32 to vector<16x128xf32>
    %429 = arith.mulf %428, %427 : vector<16x128xf32>
    %cst_151 = arith.constant 4.471500e-02 : f32
    %430 = vector.broadcast %cst_151 : f32 to vector<16x128xf32>
    %431 = arith.mulf %430, %427 : vector<16x128xf32>
    %432 = arith.mulf %431, %427 : vector<16x128xf32>
    %433 = arith.mulf %432, %427 : vector<16x128xf32>
    %434 = arith.addf %427, %433 : vector<16x128xf32>
    %cst_152 = arith.constant 0.797884583 : f32
    %435 = vector.broadcast %cst_152 : f32 to vector<16x128xf32>
    %436 = arith.mulf %435, %434 : vector<16x128xf32>
    %437 = math.tanh %436 : vector<16x128xf32>
    %cst_153 = arith.constant 1.000000e+00 : f32
    %438 = vector.broadcast %cst_153 : f32 to vector<16x128xf32>
    %439 = arith.addf %438, %437 : vector<16x128xf32>
    %440 = arith.mulf %429, %439 : vector<16x128xf32>
    %c1_154 = arith.constant 1 : index
    %c0_155 = arith.constant 0 : index
    %c0_156 = arith.constant 0 : index
    %441 = vector.load %arg14[%c1_154, %c0_155, %c0_156] : memref<2x128x32xbf16, #tpu.memory_space<vmem>>, vector<1x128x32xbf16>
    %442 = vector.shape_cast %441 : vector<1x128x32xbf16> to vector<128x32xbf16>
    %443 = arith.truncf %440 : vector<16x128xf32> to vector<16x128xbf16>
    %cst_157 = arith.constant dense<0.000000e+00> : vector<16x32xf32>
    %444 = tpu.matmul %443, %442, %cst_157 {dimension_numbers = #tpu.dot_dimension_numbers<[1], [0], [0], [1], [0, 0, 1, 1], [], []>} : vector<16x128xbf16>, vector<128x32xbf16>, vector<16x32xf32> -> vector<16x32xf32>
    %445 = arith.addf %395, %444 : vector<16x32xf32>
    %c1_158 = arith.constant 1 : index
    %c0_159 = arith.constant 0 : index
    %c0_160 = arith.constant 0 : index
    %446 = vector.load %arg15[%c1_158, %c0_159, %c0_160] : memref<2x1x32xf32, #tpu.memory_space<vmem>>, vector<1x1x32xf32>
    %447 = vector.shape_cast %446 : vector<1x1x32xf32> to vector<1x32xf32>
    %448 = vector.broadcast %447 : vector<1x32xf32> to vector<16x32xf32>
    %449 = arith.addf %445, %448 : vector<16x32xf32>
    %c0_161 = arith.constant 0 : index
    %c0_162 = arith.constant 0 : index
    %450 = vector.load %arg16[%c0_161, %c0_162] : memref<1x32xf32, #tpu.memory_space<vmem>>, vector<1x32xf32>
    %c0_163 = arith.constant 0 : index
    %c0_164 = arith.constant 0 : index
    %451 = vector.load %arg17[%c0_163, %c0_164] : memref<1x32xf32, #tpu.memory_space<vmem>>, vector<1x32xf32>
    %cst_165 = arith.constant dense<0.000000e+00> : vector<16xf32>
    %452 = vector.multi_reduction <add>, %449, %cst_165 [1] : vector<16x32xf32> to vector<16xf32>
    %453 = vector.shape_cast %452 : vector<16xf32> to vector<16x1xf32>
    %cst_166 = arith.constant 3.200000e+01 : f32
    %454 = vector.broadcast %cst_166 : f32 to vector<16x1xf32>
    %455 = arith.divf %453, %454 : vector<16x1xf32>
    %456 = vector.broadcast %455 : vector<16x1xf32> to vector<16x32xf32>
    %457 = arith.subf %449, %456 : vector<16x32xf32>
    %458 = arith.mulf %457, %457 : vector<16x32xf32>
    %cst_167 = arith.constant dense<0.000000e+00> : vector<16xf32>
    %459 = vector.multi_reduction <add>, %458, %cst_167 [1] : vector<16x32xf32> to vector<16xf32>
    %460 = vector.shape_cast %459 : vector<16xf32> to vector<16x1xf32>
    %cst_168 = arith.constant 3.200000e+01 : f32
    %461 = vector.broadcast %cst_168 : f32 to vector<16x1xf32>
    %462 = arith.divf %460, %461 : vector<16x1xf32>
    %cst_169 = arith.constant 9.99999974E-6 : f32
    %463 = vector.broadcast %cst_169 : f32 to vector<16x1xf32>
    %464 = arith.addf %462, %463 : vector<16x1xf32>
    %465 = math.rsqrt %464 : vector<16x1xf32>
    %466 = vector.broadcast %465 : vector<16x1xf32> to vector<16x32xf32>
    %467 = arith.mulf %457, %466 : vector<16x32xf32>
    %468 = vector.broadcast %450 : vector<1x32xf32> to vector<16x32xf32>
    %469 = arith.mulf %467, %468 : vector<16x32xf32>
    %470 = vector.broadcast %451 : vector<1x32xf32> to vector<16x32xf32>
    %471 = arith.addf %469, %470 : vector<16x32xf32>
    %472 = vector.shape_cast %471 : vector<16x32xf32> to vector<2x8x32xf32>
    %473 = vector.extract_strided_slice %472 {offsets = [0, 0, 0], sizes = [2, 1, 32], strides = [1, 1, 1]} : vector<2x8x32xf32> to vector<2x1x32xf32>
    %474 = vector.shape_cast %473 : vector<2x1x32xf32> to vector<2x32xf32>
    %c0_i32_170 = arith.constant 0 : i32
    %475 = tpu.memref_slice %arg25[%c0_i32_170] : memref<2x!tpu.dma_semaphore, #tpu.memory_space<semaphore_mem>> -> memref<1x!tpu.dma_semaphore, #tpu.memory_space<semaphore_mem>>
    %476 = tpu.memref_squeeze %475 : memref<1x!tpu.dma_semaphore, #tpu.memory_space<semaphore_mem>> -> memref<!tpu.dma_semaphore, #tpu.memory_space<semaphore_mem>>
    tpu.wait_dma2 semaphore(%476 : memref<!tpu.dma_semaphore, #tpu.memory_space<semaphore_mem>>) src(%arg18 : memref<32x512xbf16, #tpu.memory_space<any>>) dst(%arg23 : memref<32x512xbf16, #tpu.memory_space<vmem>>)
    %c1_i32_171 = arith.constant 1 : i32
    %477 = tpu.memref_slice %arg25[%c1_i32_171] : memref<2x!tpu.dma_semaphore, #tpu.memory_space<semaphore_mem>> -> memref<1x!tpu.dma_semaphore, #tpu.memory_space<semaphore_mem>>
    %478 = tpu.memref_squeeze %477 : memref<1x!tpu.dma_semaphore, #tpu.memory_space<semaphore_mem>> -> memref<!tpu.dma_semaphore, #tpu.memory_space<semaphore_mem>>
    tpu.wait_dma2 semaphore(%478 : memref<!tpu.dma_semaphore, #tpu.memory_space<semaphore_mem>>) src(%arg20 : memref<512x1280xbf16, #tpu.memory_space<any>>) dst(%arg24 : memref<512x1280xbf16, #tpu.memory_space<vmem>>)
    %c0_172 = arith.constant 0 : index
    %c0_173 = arith.constant 0 : index
    %479 = vector.load %arg23[%c0_172, %c0_173] : memref<32x512xbf16, #tpu.memory_space<vmem>>, vector<32x512xbf16>
    %480 = arith.truncf %474 : vector<2x32xf32> to vector<2x32xbf16>
    %cst_174 = arith.constant dense<0.000000e+00> : vector<2x512xf32>
    %481 = tpu.matmul %480, %479, %cst_174 {dimension_numbers = #tpu.dot_dimension_numbers<[1], [0], [0], [1], [0, 0, 1, 1], [], []>} : vector<2x32xbf16>, vector<32x512xbf16>, vector<2x512xf32> -> vector<2x512xf32>
    %c0_175 = arith.constant 0 : index
    %c0_176 = arith.constant 0 : index
    %482 = vector.load %arg19[%c0_175, %c0_176] : memref<1x512xf32, #tpu.memory_space<vmem>>, vector<1x512xf32>
    %483 = vector.broadcast %482 : vector<1x512xf32> to vector<2x512xf32>
    %484 = arith.addf %481, %483 : vector<2x512xf32>
    %cst_177 = arith.constant 0.000000e+00 : f32
    %485 = vector.broadcast %cst_177 : f32 to vector<2x512xf32>
    %486 = arith.maximumf %484, %485 : vector<2x512xf32>
    %c0_178 = arith.constant 0 : index
    %c0_179 = arith.constant 0 : index
    %487 = vector.load %arg24[%c0_178, %c0_179] : memref<512x1280xbf16, #tpu.memory_space<vmem>>, vector<512x1280xbf16>
    %488 = arith.truncf %486 : vector<2x512xf32> to vector<2x512xbf16>
    %cst_180 = arith.constant dense<0.000000e+00> : vector<2x1280xf32>
    %489 = tpu.matmul %488, %487, %cst_180 {dimension_numbers = #tpu.dot_dimension_numbers<[1], [0], [0], [1], [0, 0, 1, 1], [], []>} : vector<2x512xbf16>, vector<512x1280xbf16>, vector<2x1280xf32> -> vector<2x1280xf32>
    %c0_181 = arith.constant 0 : index
    %c0_182 = arith.constant 0 : index
    %490 = vector.load %arg21[%c0_181, %c0_182] : memref<1x1280xf32, #tpu.memory_space<vmem>>, vector<1x1280xf32>
    %491 = vector.broadcast %490 : vector<1x1280xf32> to vector<2x1280xf32>
    %492 = arith.addf %489, %491 : vector<2x1280xf32>
    %c0_183 = arith.constant 0 : index
    %c0_184 = arith.constant 0 : index
    %493 = vector.load %arg22[%c0_183, %c0_184] : memref<2x1280xf32, #tpu.memory_space<vmem>>, vector<2x1280xf32>
    tpu.vector_store %arg22[%c0_183, %c0_184], %492 {strides = array<i32>} : memref<2x1280xf32, #tpu.memory_space<vmem>>, vector<2x1280xf32>,
    return
  }
}

</mosaic_0001>

<bundles_post_ra>
// kernel: forward.1
= control target key start
LH: loop header
LB: loop body
LE: loop exit
PB: predicated region body
PF: predicated region fallthrough
CT: control target
= control target key end

     0   :  { %s6612_s0 = inlined_call_operand.vmem [shape: f32[16,32], index: 0, kind: input, shape index: {}]   ;;  %s6613_s1 = inlined_call_operand.vmem [shape: f32[2,1,8], index: 1, kind: input, shape index: {}]   ;;  %s6614_s2 = inlined_call_operand.hbm [shape: f32[1,32], index: 2, kind: input, shape index: {}]   ;;  %s6615_s3 = inlined_call_operand.hbm [shape: f32[1,32], index: 3, kind: input, shape index: {}]   ;;  %s6616_s4 = inlined_call_operand.hbm [shape: f32[2,1,32], index: 4, kind: input, shape index: {}]   ;;  %s6617_s5 = inlined_call_operand.hbm [shape: f32[2,1,32], index: 5, kind: input, shape index: {}]   ;;  %s6618_s6 = inlined_call_operand.hbm [shape: bf16[2,32,96], index: 6, kind: input, shape index: {}]   ;;  %s6619_s7 = inlined_call_operand.hbm [shape: f32[2,1,96], index: 7, kind: input, shape index: {}]   ;;  %s6620_s8 = inlined_call_operand.hbm [shape: bf16[2,4,8,32], index: 8, kind: input, shape index: {}]   ;;  %s6621_s9 = inlined_call_operand.hbm [shape: f32[2,1,32], index: 9, kind: input, shape index: {}]   ;;  %s6622_s10 = inlined_call_operand.hbm [shape: f32[2,1,32], index: 10, kind: input, shape index: {}]   ;;  %s6623_s11 = inlined_call_operand.hbm [shape: f32[2,1,32], index: 11, kind: input, shape index: {}]   ;;  %s6624_s12 = inlined_call_operand.hbm [shape: bf16[2,32,128], index: 12, kind: input, shape index: {}]   ;;  %s6625_s13 = inlined_call_operand.hbm [shape: f32[2,1,128], index: 13, kind: input, shape index: {}]   ;;  %s6626_s14 = inlined_call_operand.vmem [shape: bf16[2,128,32], index: 14, kind: input, shape index: {}]   ;;  %s6627_s15 = inlined_call_operand.hbm [shape: f32[2,1,32], index: 15, kind: input, shape index: {}]   ;;  %s6628_s16 = inlined_call_operand.hbm [shape: f32[1,32], index: 16, kind: input, shape index: {}]   ;;  %s6629_s17 = inlined_call_operand.hbm [shape: f32[1,32], index: 17, kind: input, shape index: {}]   ;;  %s6630_s18 = inlined_call_operand.hbm [shape: bf16[32,512], index: 18, kind: input, shape index: {}]   ;;  %s6631_s19 = inlined_call_operand.hbm [shape: f32[1,512], index: 19, kind: input, shape index: {}]   ;;  %s6632_s20 = inlined_call_operand.hbm [shape: bf16[512,1280], index: 20, kind: input, shape index: {}]   ;;  %s6633_s21 = inlined_call_operand.hbm [shape: f32[1,1280], index: 21, kind: input, shape index: {}]   ;;  %s6634_s22 = inlined_call_operand.hbm [shape: f32[2,1280], index: 22, kind: output, shape index: {}]  }
   0x1   :  { %6643 = sst [smem:[#allocation49_spill]] %s6612_s0 }
   0x2   :  { %6644 = sst [smem:[#allocation50_spill]] %s6613_s1 }
   0x3   :  { %6645 = sst [smem:[#allocation51_spill]] %s6614_s2 }
   0x4   :  { %6646 = sst [smem:[#allocation52_spill]] %s6615_s3 }
   0x5   :  { %6647 = sst [smem:[#allocation53_spill]] %s6616_s4 }
   0x6   :  { %6648 = sst [smem:[#allocation54_spill]] %s6617_s5 }
   0x7   :  { %6649 = sst [smem:[#allocation55_spill]] %s6618_s6 }
   0x8   :  { %6650 = sst [smem:[#allocation56_spill]] %s6634_s22 }
   0x9   :  { %27 = vsyncpa [#allocation6], 0 }
   0xa   :  { %28 = vsyncpa [#allocation9], 0 }
   0xb   :  { %29 = vsyncpa [#allocation12], 0 }
   0xc   :  { %30 = vsyncpa [#allocation15], 0 }
   0xd   :  { %31 = vsyncpa [#allocation18], 0 }
   0xe   :  { %32 = vsyncpa [#allocation21], 0 }
   0xf   :  { %33 = vsyncpa [#allocation24], 0 }
  0x10   :  { %34 = vsyncpa [#allocation27], 0 }
  0x11   :  { %35 = vsyncpa [#allocation30], 0 }
  0x12   :  { %36 = vsyncpa [#allocation7], 0  ;;  %s5552_s3 = smov [#allocation8]   ;;  %s6651_s4 = sld [smem:[#allocation52_spill]] }
  0x13   :  { %s57_s28 = sshll.u32 %s5552_s3, 4  ;;  %s58_s28 = int_to_ptr.vmem [resolvable:$true] %s57_s28 }
  0x18   :  { %s5132_s0 = scalar_lea.hbm %s6651_s4, 16 }
  0x19   :  { %p5133_p0 = scmp.ne.s32.totalorder %s6651_s4, %s5132_s0  ;;  %p5136_p1 = scmp.lt.u32.totalorder %s5132_s0, %s6651_s4 }
  0x1b   :  { %p5138_p2 = pnand %p5136_p1, %p5133_p0 }
  0x1d   :  { %5141 = shalt.err (!%p5138_p2)
}
  0x1e   :  { %s5142_s6 = scalar_lea.vmem %s58_s28, 16  ;;  %s5146_s25 = scalar_lea.vmem %s58_s28, 32 }
  0x1f   :  { %p5143_p3 = scmp.ne.s32.totalorder %s58_s28, %s5142_s6  ;;  %p5147_p4 = scmp.lt.s32.totalorder %s58_s28, %s58_s28 }
  0x20   :  { %p5148_p5 = scmp.lt.s32.totalorder %s5146_s25, %s5142_s6 }
  0x22   :  { %p5149_p6 = por %p5148_p5, %p5147_p4 }
  0x24   :  { %p5150_p7 = pnand %p5149_p6, %p5143_p3 }
  0x26   :  { %5153 = shalt.err (!%p5150_p7)
}
  0x27   :  { %60 = dma.hbm_to_vmem [thread:$0]  %s6651_s4, 16, %s58_s28, [#allocation9]  }
  0x28   :  { %s5553_s27 = smov [#allocation11]   ;;  %s5554_s29 = smov [#allocation14]  }
  0x29   :  { %s78_s3 = sshll.u32 %s5553_s27, 4  ;;  %s102_s30 = sshll.u32 %s5554_s29, 4  ;;  %s79_s3 = int_to_ptr.vmem [resolvable:$true] %s78_s3  ;;  %s103_s30 = int_to_ptr.vmem [resolvable:$true] %s102_s30 }
  0x2a   :  { %s6652_s1 = sld [smem:[#allocation54_spill]] }
  0x30   :  { %s5154_s5 = scalar_lea.hbm %s6652_s1, 32 }
  0x31   :  { %p5155_p8 = scmp.ne.s32.totalorder %s6652_s1, %s5154_s5  ;;  %p5158_p9 = scmp.lt.u32.totalorder %s5154_s5, %s6652_s1 }
  0x33   :  { %p5160_p10 = pnand %p5158_p9, %p5155_p8 }
  0x35   :  { %5163 = shalt.err (!%p5160_p10)
}
  0x36   :  { %s5164_s28 = scalar_lea.vmem %s79_s3, 32  ;;  %p5169_p12 = scmp.lt.s32.totalorder %s79_s3, %s79_s3 }
  0x37   :  { %p5165_p11 = scmp.ne.s32.totalorder %s79_s3, %s5164_s28  ;;  %p5170_p13 = scmp.lt.s32.totalorder %s5164_s28, %s5164_s28 }
  0x39   :  { %p5171_p0 = por %p5170_p13, %p5169_p12 }
  0x3b   :  { %p5172_p1 = pnand %p5171_p0, %p5165_p11 }
  0x3d   :  { %5175 = shalt.err (!%p5172_p1)
}
  0x3e   :  { %s5555_s4 = smov 16   ;;  %s5556_s26 = smov 1  }
  0x3f   :  { %84 = dma.hbm_to_vmem [thread:$0]  %s6652_s1, 32, %s79_s3, [#allocation12], %s5555_s4, %s5555_s4, %s5556_s26  }
  0x40   :  { %s5176_s0 = scalar_lea.hbm %s6619_s7, 32 }
  0x41   :  { %p5177_p2 = scmp.ne.s32.totalorder %s6619_s7, %s5176_s0  ;;  %p5180_p3 = scmp.lt.u32.totalorder %s5176_s0, %s6619_s7 }
  0x43   :  { %p5182_p4 = pnand %p5180_p3, %p5177_p2 }
  0x45   :  { %5185 = shalt.err (!%p5182_p4)
}
  0x46   :  { %s5186_s25 = scalar_lea.vmem %s103_s30, 32  ;;  %p5191_p6 = scmp.lt.s32.totalorder %s103_s30, %s103_s30 }
  0x47   :  { %p5187_p5 = scmp.ne.s32.totalorder %s103_s30, %s5186_s25  ;;  %p5192_p7 = scmp.lt.s32.totalorder %s5186_s25, %s5186_s25 }
  0x49   :  { %p5193_p8 = por %p5192_p7, %p5191_p6 }
  0x4b   :  { %p5194_p9 = pnand %p5193_p8, %p5187_p5 }
  0x4d   :  { %5197 = shalt.err (!%p5194_p9)
}
  0x4e   :  { %108 = dma.hbm_to_vmem [thread:$0]  %s6619_s7, 32, %s103_s30, [#allocation15], %s5555_s4, %s5555_s4, %s5556_s26  }
  0x4f   :  { %s5557_s28 = smov [#allocation17]   ;;  %s5558_s2 = smov [#allocation20]  }
  0x50   :  { %s126_s22 = sshll.u32 %s5557_s28, 4  ;;  %s150_s27 = sshll.u32 %s5558_s2, 4  ;;  %s127_s22 = int_to_ptr.vmem [resolvable:$true] %s126_s22  ;;  %s151_s27 = int_to_ptr.vmem [resolvable:$true] %s150_s27 }
  0x51   :  { %s5198_s23 = scalar_lea.hbm %s6621_s9, 32 }
  0x52   :  { %p5199_p10 = scmp.ne.s32.totalorder %s6621_s9, %s5198_s23  ;;  %p5202_p11 = scmp.lt.u32.totalorder %s5198_s23, %s6621_s9 }
  0x54   :  { %p5204_p12 = pnand %p5202_p11, %p5199_p10 }
  0x56   :  { %5207 = shalt.err (!%p5204_p12)
}
  0x57   :  { %s5208_s7 = scalar_lea.vmem %s127_s22, 32  ;;  %p5213_p0 = scmp.lt.s32.totalorder %s127_s22, %s127_s22 }
  0x58   :  { %p5209_p13 = scmp.ne.s32.totalorder %s127_s22, %s5208_s7  ;;  %p5214_p1 = scmp.lt.s32.totalorder %s5208_s7, %s5208_s7 }
  0x5a   :  { %p5215_p2 = por %p5214_p1, %p5213_p0 }
  0x5c   :  { %p5216_p3 = pnand %p5215_p2, %p5209_p13 }
  0x5e   :  { %5219 = shalt.err (!%p5216_p3)
}
  0x5f   :  { %132 = dma.hbm_to_vmem [thread:$0]  %s6621_s9, 32, %s127_s22, [#allocation18], %s5555_s4, %s5555_s4, %s5556_s26  }
  0x60   :  { %s5220_s2 = scalar_lea.hbm %s6623_s11, 32 }
  0x61   :  { %p5221_p4 = scmp.ne.s32.totalorder %s6623_s11, %s5220_s2  ;;  %p5224_p5 = scmp.lt.u32.totalorder %s5220_s2, %s6623_s11 }
  0x63   :  { %p5226_p6 = pnand %p5224_p5, %p5221_p4 }
  0x65   :  { %5229 = shalt.err (!%p5226_p6)
}
  0x66   :  { %s5230_s24 = scalar_lea.vmem %s151_s27, 32  ;;  %p5235_p8 = scmp.lt.s32.totalorder %s151_s27, %s151_s27 }
  0x67   :  { %p5231_p7 = scmp.ne.s32.totalorder %s151_s27, %s5230_s24  ;;  %p5236_p9 = scmp.lt.s32.totalorder %s5230_s24, %s5230_s24 }
  0x69   :  { %p5237_p10 = por %p5236_p9, %p5235_p8 }
  0x6b   :  { %p5238_p11 = pnand %p5237_p10, %p5231_p7 }
  0x6d   :  { %5241 = shalt.err (!%p5238_p11)
}
  0x6e   :  { %156 = dma.hbm_to_vmem [thread:$0]  %s6623_s11, 32, %s151_s27, [#allocation21], %s5555_s4, %s5555_s4, %s5556_s26  }
  0x6f   :  { %s5559_s6 = smov [#allocation23]   ;;  %s5560_s7 = smov [#allocation26]  }
  0x70   :  { %s174_s25 = sshll.u32 %s5559_s6, 4  ;;  %s201_s30 = sshll.u32 %s5560_s7, 4  ;;  %s175_s25 = int_to_ptr.vmem [resolvable:$true] %s174_s25  ;;  %s202_s30 = int_to_ptr.vmem [resolvable:$true] %s201_s30 }
  0x71   :  { %s5242_s28 = scalar_lea.hbm %s6625_s13, 32 }
  0x72   :  { %p5243_p12 = scmp.ne.s32.totalorder %s6625_s13, %s5242_s28  ;;  %p5246_p13 = scmp.lt.u32.totalorder %s5242_s28, %s6625_s13 }
  0x74   :  { %p5248_p0 = pnand %p5246_p13, %p5243_p12 }
  0x76   :  { %5251 = shalt.err (!%p5248_p0)
}
  0x77   :  { %s5252_s11 = scalar_lea.vmem %s175_s25, 32  ;;  %p5257_p2 = scmp.lt.s32.totalorder %s175_s25, %s175_s25 }
  0x78   :  { %p5253_p1 = scmp.ne.s32.totalorder %s175_s25, %s5252_s11  ;;  %p5258_p3 = scmp.lt.s32.totalorder %s5252_s11, %s5252_s11 }
  0x7a   :  { %p5259_p4 = por %p5258_p3, %p5257_p2 }
  0x7c   :  { %p5260_p5 = pnand %p5259_p4, %p5253_p1 }
  0x7e   :  { %5263 = shalt.err (!%p5260_p5)
}
  0x7f   :  { %180 = dma.hbm_to_vmem [thread:$0]  %s6625_s13, 32, %s175_s25, [#allocation24], %s5555_s4, %s5555_s4, %s5556_s26  }
  0x80   :  { %s5264_s22 = scalar_lea.hbm %s6628_s16, 16 }
  0x81   :  { %p5265_p6 = scmp.ne.s32.totalorder %s6628_s16, %s5264_s22  ;;  %p5268_p7 = scmp.lt.u32.totalorder %s5264_s22, %s6628_s16 }
  0x83   :  { %p5270_p8 = pnand %p5268_p7, %p5265_p6 }
  0x85   :  { %5273 = shalt.err (!%p5270_p8)
}
  0x86   :  { %s5274_s28 = scalar_lea.vmem %s202_s30, 16  ;;  %s5278_s2 = scalar_lea.vmem %s202_s30, 32 }
  0x87   :  { %p5275_p9 = scmp.ne.s32.totalorder %s202_s30, %s5274_s28  ;;  %p5279_p10 = scmp.lt.s32.totalorder %s202_s30, %s202_s30 }
  0x88   :  { %p5280_p11 = scmp.lt.s32.totalorder %s5278_s2, %s5274_s28 }
  0x8a   :  { %p5281_p12 = por %p5280_p11, %p5279_p10 }
  0x8c   :  { %p5282_p13 = pnand %p5281_p12, %p5275_p9 }
  0x8e   :  { %5285 = shalt.err (!%p5282_p13)
}
  0x8f   :  { %204 = dma.hbm_to_vmem [thread:$0]  %s6628_s16, 16, %s202_s30, [#allocation27]  }
  0x90   :  { %s5561_s29 = smov [#allocation29]   ;;  %s5562_s23 = smov [#allocation5]  }
  0x91   :  { %s221_s0 = sshll.u32 %s5561_s29, 4  ;;  %s47_s11 = sshll.u32 %s5562_s23, 4  ;;  %s222_s0 = int_to_ptr.vmem [resolvable:$true] %s221_s0  ;;  %s48_s11 = int_to_ptr.vmem [resolvable:$true] %s47_s11 }
  0x92   :  { %s5286_s24 = scalar_lea.hbm %s6631_s19, 64 }
  0x93   :  { %p5287_p0 = scmp.ne.s32.totalorder %s6631_s19, %s5286_s24  ;;  %p5290_p1 = scmp.lt.u32.totalorder %s5286_s24, %s6631_s19 }
  0x95   :  { %p5292_p2 = pnand %p5290_p1, %p5287_p0 }
  0x97   :  { %5295 = shalt.err (!%p5292_p2)
}
  0x98   :  { %s5296_s16 = scalar_lea.vmem %s222_s0, 64  ;;  %p5301_p4 = scmp.lt.s32.totalorder %s222_s0, %s222_s0 }
  0x99   :  { %p5297_p3 = scmp.ne.s32.totalorder %s222_s0, %s5296_s16  ;;  %p5302_p5 = scmp.lt.s32.totalorder %s5296_s16, %s5296_s16 }
  0x9b   :  { %p5303_p6 = por %p5302_p5, %p5301_p4 }
  0x9d   :  { %p5304_p7 = pnand %p5303_p6, %p5297_p3 }
  0x9f   :  { %5307 = shalt.err (!%p5304_p7)
}
  0xa0   :  { %224 = dma.hbm_to_vmem [thread:$0]  %s6631_s19, 64, %s222_s0, [#allocation30]  }
  0xa1   :  { %s6653_s2 = sld [smem:[#allocation51_spill]] }
  0xa7   :  { %s5308_s13 = scalar_lea.hbm %s6653_s2, 16 }
  0xa8   :  { %p5309_p8 = scmp.ne.s32.totalorder %s6653_s2, %s5308_s13  ;;  %p5312_p9 = scmp.lt.u32.totalorder %s5308_s13, %s6653_s2 }
  0xaa   :  { %p5314_p10 = pnand %p5312_p9, %p5309_p8 }
  0xac   :  { %5317 = shalt.err (!%p5314_p10)
}
  0xad   :  { %s5318_s5 = scalar_lea.vmem %s48_s11, 16  ;;  %s5322_s24 = scalar_lea.vmem %s48_s11, 32 }
  0xae   :  { %p5319_p11 = scmp.ne.s32.totalorder %s48_s11, %s5318_s5  ;;  %p5323_p12 = scmp.lt.s32.totalorder %s48_s11, %s48_s11 }
  0xaf   :  { %p5324_p13 = scmp.lt.s32.totalorder %s5322_s24, %s5318_s5 }
  0xb1   :  { %p5325_p0 = por %p5324_p13, %p5323_p12 }
  0xb3   :  { %p5326_p1 = pnand %p5325_p0, %p5319_p11 }
  0xb5   :  { %5329 = shalt.err (!%p5326_p1)
}
  0xb6   :  { %50 = dma.hbm_to_vmem [thread:$0]  %s6653_s2, 16, %s48_s11, [#allocation6]  }
  0xb7   :  { %s5563_s9 = smov [#allocation10]   ;;  %s5564_s6 = smov [#allocation13]  }
  0xb8   :  { %s66_s22 = sshll.u32 %s5563_s9, 4  ;;  %s90_s7 = sshll.u32 %s5564_s6, 4  ;;  %s67_s22 = int_to_ptr.vmem [resolvable:$true] %s66_s22  ;;  %s91_s7 = int_to_ptr.vmem [resolvable:$true] %s90_s7 }
  0xb9   :  { %s6654_s3 = sld [smem:[#allocation53_spill]] }
  0xbf   :  { %s5330_s1 = scalar_lea.hbm %s6654_s3, 32 }
  0xc0   :  { %p5331_p2 = scmp.ne.s32.totalorder %s6654_s3, %s5330_s1  ;;  %p5334_p3 = scmp.lt.u32.totalorder %s5330_s1, %s6654_s3 }
  0xc2   :  { %p5336_p4 = pnand %p5334_p3, %p5331_p2 }
  0xc4   :  { %5339 = shalt.err (!%p5336_p4)
}
  0xc5   :  { %s5340_s11 = scalar_lea.vmem %s67_s22, 32  ;;  %p5345_p6 = scmp.lt.s32.totalorder %s67_s22, %s67_s22 }
  0xc6   :  { %p5341_p5 = scmp.ne.s32.totalorder %s67_s22, %s5340_s11  ;;  %p5346_p7 = scmp.lt.s32.totalorder %s5340_s11, %s5340_s11 }
  0xc8   :  { %p5347_p8 = por %p5346_p7, %p5345_p6 }
  0xca   :  { %p5348_p9 = pnand %p5347_p8, %p5341_p5 }
  0xcc   :  { %5351 = shalt.err (!%p5348_p9)
}
  0xcd   :  { %72 = dma.hbm_to_vmem [thread:$0]  %s6654_s3, 32, %s67_s22, [#allocation9], %s5555_s4, %s5555_s4, %s5556_s26  }
  0xce   :  { %s6655_s24 = sld [smem:[#allocation55_spill]] }
  0xd4   :  { %s5352_s19 = scalar_lea.hbm %s6655_s24, 512 }
  0xd5   :  { %p5353_p10 = scmp.ne.s32.totalorder %s6655_s24, %s5352_s19  ;;  %p5356_p11 = scmp.lt.u32.totalorder %s5352_s19, %s6655_s24 }
  0xd7   :  { %p5358_p12 = pnand %p5356_p11, %p5353_p10 }
  0xd9   :  { %5361 = shalt.err (!%p5358_p12)
}
  0xda   :  { %s5362_s30 = scalar_lea.vmem %s91_s7, 512  ;;  %p5367_p0 = scmp.lt.s32.totalorder %s91_s7, %s91_s7 }
  0xdb   :  { %p5363_p13 = scmp.ne.s32.totalorder %s91_s7, %s5362_s30  ;;  %p5368_p1 = scmp.lt.s32.totalorder %s5362_s30, %s5362_s30 }
  0xdd   :  { %p5369_p2 = por %p5368_p1, %p5367_p0 }
  0xdf   :  { %p5370_p3 = pnand %p5369_p2, %p5363_p13 }
  0xe1   :  { %5373 = shalt.err (!%p5370_p3)
}
  0xe2   :  { %s5565_s22 = smov 64   ;;  %s5566_s3 = smov 4  }
  0xe3   :  { %96 = dma.hbm_to_vmem [thread:$0]  %s6655_s24, 512, %s91_s7, [#allocation12], %s5565_s22, %s5565_s22, %s5566_s3  }
  0xe4   :  { %s5567_s13 = smov [#allocation16]   ;;  %s5568_s29 = smov [#allocation19]  }
  0xe5   :  { %s114_s25 = sshll.u32 %s5567_s13, 4  ;;  %s138_s11 = sshll.u32 %s5568_s29, 4  ;;  %s115_s25 = int_to_ptr.vmem [resolvable:$true] %s114_s25  ;;  %s139_s11 = int_to_ptr.vmem [resolvable:$true] %s138_s11 }
  0xe6   :  { %s5374_s27 = scalar_lea.hbm %s6620_s8, 512 }
  0xe7   :  { %p5375_p4 = scmp.ne.s32.totalorder %s6620_s8, %s5374_s27  ;;  %p5378_p5 = scmp.lt.u32.totalorder %s5374_s27, %s6620_s8 }
  0xe9   :  { %p5380_p6 = pnand %p5378_p5, %p5375_p4 }
  0xeb   :  { %5383 = shalt.err (!%p5380_p6)
}
  0xec   :  { %s5384_s7 = scalar_lea.vmem %s115_s25, 512  ;;  %p5389_p8 = scmp.lt.s32.totalorder %s115_s25, %s115_s25 }
  0xed   :  { %p5385_p7 = scmp.ne.s32.totalorder %s115_s25, %s5384_s7  ;;  %p5390_p9 = scmp.lt.s32.totalorder %s5384_s7, %s5384_s7 }
  0xef   :  { %p5391_p10 = por %p5390_p9, %p5389_p8 }
  0xf1   :  { %p5392_p11 = pnand %p5391_p10, %p5385_p7 }
  0xf3   :  { %5395 = shalt.err (!%p5392_p11)
}
  0xf4   :  { %120 = dma.hbm_to_vmem [thread:$0]  %s6620_s8, 512, %s115_s25, [#allocation15], %s5565_s22, %s5565_s22, %s5566_s3  }
  0xf5   :  { %s5396_s1 = scalar_lea.hbm %s6622_s10, 32 }
  0xf6   :  { %p5397_p12 = scmp.ne.s32.totalorder %s6622_s10, %s5396_s1  ;;  %p5400_p13 = scmp.lt.u32.totalorder %s5396_s1, %s6622_s10 }
  0xf8   :  { %p5402_p0 = pnand %p5400_p13, %p5397_p12 }
  0xfa   :  { %5405 = shalt.err (!%p5402_p0)
}
  0xfb   :  { %s5406_s23 = scalar_lea.vmem %s139_s11, 32  ;;  %p5411_p2 = scmp.lt.s32.totalorder %s139_s11, %s139_s11 }
  0xfc   :  { %p5407_p1 = scmp.ne.s32.totalorder %s139_s11, %s5406_s23  ;;  %p5412_p3 = scmp.lt.s32.totalorder %s5406_s23, %s5406_s23 }
  0xfe   :  { %p5413_p4 = por %p5412_p3, %p5411_p2 }
 0x100   :  { %p5414_p5 = pnand %p5413_p4, %p5407_p1 }
 0x102   :  { %5417 = shalt.err (!%p5414_p5)
}
 0x103   :  { %144 = dma.hbm_to_vmem [thread:$0]  %s6622_s10, 32, %s139_s11, [#allocation18], %s5555_s4, %s5555_s4, %s5556_s26  }
 0x104   :  { %s5569_s27 = smov [#allocation22]   ;;  %s5570_s19 = smov [#allocation25]  }
 0x105   :  { %s162_s5 = sshll.u32 %s5569_s27, 4  ;;  %s188_s0 = sshll.u32 %s5570_s19, 4  ;;  %s163_s5 = int_to_ptr.vmem [resolvable:$true] %s162_s5  ;;  %s189_s0 = int_to_ptr.vmem [resolvable:$true] %s188_s0 }
 0x106   :  { %s5418_s24 = scalar_lea.hbm %s6624_s12, 512 }
 0x107   :  { %p5419_p6 = scmp.ne.s32.totalorder %s6624_s12, %s5418_s24  ;;  %p5422_p7 = scmp.lt.u32.totalorder %s5418_s24, %s6624_s12 }
 0x109   :  { %p5424_p8 = pnand %p5422_p7, %p5419_p6 }
 0x10b   :  { %5427 = shalt.err (!%p5424_p8)
}
 0x10c   :  { %s5428_s10 = scalar_lea.vmem %s163_s5, 512  ;;  %p5433_p10 = scmp.lt.s32.totalorder %s163_s5, %s163_s5 }
 0x10d   :  { %p5429_p9 = scmp.ne.s32.totalorder %s163_s5, %s5428_s10  ;;  %p5434_p11 = scmp.lt.s32.totalorder %s5428_s10, %s5428_s10 }
 0x10f   :  { %p5435_p12 = por %p5434_p11, %p5433_p10 }
 0x111   :  { %p5436_p13 = pnand %p5435_p12, %p5429_p9 }
 0x113   :  { %5439 = shalt.err (!%p5436_p13)
}
 0x114   :  { %168 = dma.hbm_to_vmem [thread:$0]  %s6624_s12, 512, %s163_s5, [#allocation21], %s5565_s22, %s5565_s22, %s5566_s3  }
 0x115   :  { %s5440_s2 = scalar_lea.hbm %s6627_s15, 32 }
 0x116   :  { %p5441_p0 = scmp.ne.s32.totalorder %s6627_s15, %s5440_s2  ;;  %p5444_p1 = scmp.lt.u32.totalorder %s5440_s2, %s6627_s15 }
 0x118   :  { %p5446_p2 = pnand %p5444_p1, %p5441_p0 }
 0x11a   :  { %5449 = shalt.err (!%p5446_p2)
}
 0x11b   :  { %s5450_s19 = scalar_lea.vmem %s189_s0, 32  ;;  %p5455_p4 = scmp.lt.s32.totalorder %s189_s0, %s189_s0 }
 0x11c   :  { %p5451_p3 = scmp.ne.s32.totalorder %s189_s0, %s5450_s19  ;;  %p5456_p5 = scmp.lt.s32.totalorder %s5450_s19, %s5450_s19 }
 0x11e   :  { %p5457_p6 = por %p5456_p5, %p5455_p4 }
 0x120   :  { %p5458_p7 = pnand %p5457_p6, %p5451_p3 }
 0x122   :  { %5461 = shalt.err (!%p5458_p7)
}
 0x123   :  { %194 = dma.hbm_to_vmem [thread:$0]  %s6627_s15, 32, %s189_s0, [#allocation24], %s5555_s4, %s5555_s4, %s5556_s26  }
 0x124   :  { %s5571_s9 = smov [#allocation28]   ;;  %s5572_s24 = smov [#allocation31]  }
 0x125   :  { %s211_s7 = sshll.u32 %s5571_s9, 4  ;;  %s231_s6 = sshll.u32 %s5572_s24, 4  ;;  %s212_s7 = int_to_ptr.vmem [resolvable:$true] %s211_s7  ;;  %s232_s6 = int_to_ptr.vmem [resolvable:$true] %s231_s6 }
 0x126   :  { %s5462_s1 = scalar_lea.hbm %s6629_s17, 16 }
 0x127   :  { %p5463_p8 = scmp.ne.s32.totalorder %s6629_s17, %s5462_s1  ;;  %p5466_p9 = scmp.lt.u32.totalorder %s5462_s1, %s6629_s17 }
 0x129   :  { %p5468_p10 = pnand %p5466_p9, %p5463_p8 }
 0x12b   :  { %5471 = shalt.err (!%p5468_p10)
}
 0x12c   :  { %s5472_s15 = scalar_lea.vmem %s212_s7, 16  ;;  %s5476_s4 = scalar_lea.vmem %s212_s7, 32 }
 0x12d   :  { %p5473_p11 = scmp.ne.s32.totalorder %s212_s7, %s5472_s15  ;;  %p5477_p12 = scmp.lt.s32.totalorder %s212_s7, %s212_s7 }
 0x12e   :  { %p5478_p13 = scmp.lt.s32.totalorder %s5476_s4, %s5472_s15 }
 0x130   :  { %p5479_p0 = por %p5478_p13, %p5477_p12 }
 0x132   :  { %p5480_p1 = pnand %p5479_p0, %p5473_p11 }
 0x134   :  { %5483 = shalt.err (!%p5480_p1)
}
 0x135   :  { %214 = dma.hbm_to_vmem [thread:$0]  %s6629_s17, 16, %s212_s7, [#allocation27]  }
 0x136   :  { %s5484_s23 = scalar_lea.hbm %s6633_s21, 160 }
 0x137   :  { %p5485_p2 = scmp.ne.s32.totalorder %s6633_s21, %s5484_s23  ;;  %p5488_p3 = scmp.lt.u32.totalorder %s5484_s23, %s6633_s21 }
 0x139   :  { %p5490_p4 = pnand %p5488_p3, %p5485_p2 }
 0x13b   :  { %5493 = shalt.err (!%p5490_p4)
}
 0x13c   :  { %s5494_s12 = scalar_lea.vmem %s232_s6, 160  ;;  %p5499_p6 = scmp.lt.s32.totalorder %s232_s6, %s232_s6 }
 0x13d   :  { %p5495_p5 = scmp.ne.s32.totalorder %s232_s6, %s5494_s12  ;;  %p5500_p7 = scmp.lt.s32.totalorder %s5494_s12, %s5494_s12 }
 0x13f   :  { %p5501_p8 = por %p5500_p7, %p5499_p6 }
 0x141   :  { %p5502_p9 = pnand %p5501_p8, %p5495_p5 }
 0x143   :  { %5505 = shalt.err (!%p5502_p9)
}
 0x144   :  { %234 = dma.hbm_to_vmem [thread:$0]  %s6633_s21, 160, %s232_s6, [#allocation30]  }
 0x145   :  { %5528 = dma.done.wait [#allocation6], 16  }
 0x146   :  { %5529 = vsyncadd [#allocation6], 4294967280 }
 0x147   :  { %5530 = dma.done.wait [#allocation9], 48  }
 0x148   :  { %5531 = vsyncadd [#allocation9], 4294967248 }
 0x149   :  { %5532 = dma.done.wait [#allocation12], 544  }
 0x14a   :  { %5533 = vsyncadd [#allocation12], 4294966752 }
 0x14b   :  { %5534 = dma.done.wait [#allocation15], 544  }
 0x14c   :  { %5535 = vsyncadd [#allocation15], 4294966752 }
 0x14d   :  { %5536 = dma.done.wait [#allocation18], 64  }
 0x14e   :  { %5537 = vsyncadd [#allocation18], 4294967232 }
 0x14f   :  { %5538 = dma.done.wait [#allocation21], 544  }
 0x150   :  { %5539 = vsyncadd [#allocation21], 4294966752 }
 0x151   :  { %5540 = dma.done.wait [#allocation24], 64  }
 0x152   :  { %5541 = vsyncadd [#allocation24], 4294967232 }
 0x153   :  { %5542 = dma.done.wait [#allocation27], 32  }
 0x154   :  { %5543 = vsyncadd [#allocation27], 4294967264 }
 0x155   :  { %5544 = dma.done.wait [#allocation30], 224  }
 0x156   :  { %5545 = vsyncadd [#allocation30], 4294967072  ;;  %s291_s9 = sld [smem:[#allocation0]]   ;;  %s5573_s21 = smov 512   ;;  %vm361_vm0 = vcmask 261120   ;;  %v5586_v43 = vmov 0.0  }
 0x157   :  { %303 = sst [smem:[#allocation34]] %s5573_s21  ;;  %s5574_s7 = smov [#allocation2]   ;;  %4621 = vmatprep.subr.bf16.mxu1 %v5586_v43  ;;  %4635 = vmatprep.subr.bf16.mxu0 %v5586_v43  ;;  %vm5587_vm1 = vmmov 0   ;;  %vm540_vm2 = vcmask 64512   ;;  %vm665_vm3 = vcmask 1043456  }
 0x158   :  { %305 = sst [smem:[#allocation34 + $0x1]] %s5573_s21  ;;  %s299_s24 = sshll.u32 %s5574_s7, 4  ;;  %4625 = vmatprep.mubr.msk.bf16.mxu1 %vm5587_vm1, %v5586_v43  ;;  %4637 = vmatprep.mubr.msk.bf16.mxu0 %vm5587_vm1, %v5586_v43  ;;  %s300_s24 = int_to_ptr.vmem [resolvable:$true] %s299_s24 }
 0x159   :  { %307 = sst [smem:[#allocation34 + $0x2]] %s5566_s3  ;;  %s5575_s6 = smov 256  }
 0x15a   :  { %309 = sst [smem:[#allocation34 + $0x3]] %s5565_s22  ;;  %s5576_s1 = smov 128  }
 0x15b   :  { %315 = sst [smem:[#allocation34 + $0x6]] %s5575_s6  ;;  %s5577_s10 = smov 2  }
 0x15c   :  { %317 = sst [smem:[#allocation34 + $0x7]] %s5565_s22  ;;  %s4396_s16 = sshll.u32 %s291_s9, 26 }
 0x15d   :  { %319 = sst [smem:[#allocation34 + $0x8]] %s5566_s3  ;;  %s4397_s30 = sadd.s32 134217728, %s4396_s16 }
 0x15e   :  { %311 = sst [smem:[#allocation34 + $0x4]] %s5576_s1  ;;  %s5578_s11 = smov [#allocation4]  }
 0x15f   :  { %313 = sst [smem:[#allocation34 + $0x5]] %s5577_s10  ;;  %s5579_s28 = smov [#allocation33]  }
 0x160   :  { %321 = dma.general %s6630_s18, 1024, %s300_s24, %s5578_s11, %s5579_s28, [#allocation34], %s4397_s30, 0  }
 0x161   :  { %s5580_s4 = smov 1280   ;;  %s5581_s26 = smov 10  }
 0x162   :  { %338 = sst [smem:[#allocation36]] %s5580_s4  ;;  %s5582_s0 = smov [#allocation3]  }
 0x163   :  { %340 = sst [smem:[#allocation36 + $0x1]] %s5580_s4  ;;  %s334_s29 = sshll.u32 %s5582_s0, 4  ;;  %s335_s29 = int_to_ptr.vmem [resolvable:$true] %s334_s29 }
 0x164   :  { %342 = sst [smem:[#allocation36 + $0x2]] %s5581_s26  ;;  %s5583_s2 = smov 640  }
 0x165   :  { %344 = sst [smem:[#allocation36 + $0x3]] %s5565_s22  ;;  %s5584_s23 = smov [#allocation4 + $0x1]  }
 0x166   :  { %346 = sst [smem:[#allocation36 + $0x4]] %s5576_s1  ;;  %s5585_s18 = smov [#allocation35]  }
 0x167   :  { %348 = sst [smem:[#allocation36 + $0x5]] %s5577_s10  ;;  %s5589_s6 = smov 88  }
 0x168   :  { %350 = sst [smem:[#allocation36 + $0x6]] %s5583_s2  ;;  %s5590_s16 = smov 120  }
 0x169   :  { %352 = sst [smem:[#allocation36 + $0x7]] %s5565_s22  ;;  %s5592_s1 = smov 80  }
 0x16a   :  { %354 = sst [smem:[#allocation36 + $0x8]] %s5566_s3  ;;  %s5593_s10 = smov 112  }
 0x16b   :  { %356 = dma.general %s6632_s20, 40960, %s335_s29, %s5584_s23, %s5585_s18, [#allocation36], %s4397_s30, 0  }
 0x16c   :  { %s6656_s12 = sld [smem:[#allocation49_spill]]  ;;  %v4400_v21 = vld [vmem:[#allocation5] ss:$0 sm:$0xff]  ;;  %v4401_v23 = vld [vmem:[#allocation8] ss:$0 sm:$0xff]  ;;  %v5010_v42 = vld [vmem:[#allocation13] sm:$0xff]  }
 0x16d   :  { %4622 = vmatpush3.bf16.msra.mxu1 %v5010_v42  ;;  %v5011_v44 = vld [vmem:[#allocation13 + $0x8] sm:$0xff]   ;;  %v4404_v53 = vld [vmem:[#allocation10] ss:$0 sm:$0xff]  ;;  %v4405_v57 = vld [vmem:[#allocation11] ss:$0 sm:$0xff]  ;;  %s5588_s20 = smov 96  }
 0x16e   :  { %4623 = vmatprep.subr.bf16.mxu1 %v5586_v43  ;;  %v4406_v62 = vld [vmem:[#allocation14] ss:$0 sm:$0xff]  ;;  %s6657_s21 = sld [smem:[#allocation50_spill]]  ;;  %s5591_s30 = smov 56  }
 0x16f   :  { %s5594_s11 = smov 48   ;;  %s5595_s28 = smov 72  }
 0x170   :  { %s5596_s13 = smov 104   ;;  %s5597_s15 = smov 40  }
 0x171   :  { %4624 = vmatpush3.bf16.msra.mxu1 %v5011_v44 }
 0x172   :  { %v357_v0 = vld [vmem:[%s6656_s12] sm:$0xff]  ;;  %v358_v1 = vld [vmem:[%s6656_s12 + $0x8] sm:$0xff]  ;;  %4629 = vmatprep.subr.bf16.mxu1 %v5586_v43 }
 0x173   :  { %v362_v2 = vsel %vm361_vm0, %v357_v0, 0.0  ;;  %v365_v3 = vsel %vm361_vm0, %v358_v1, 0.0 }
 0x174   :  { %363 = vadd.xlane.f32.xlu0 %v362_v2 }
 0x178   :  { %366 = vadd.xlane.f32.xlu0 %v365_v3 }
 0x201   :  { %v364_v4 = vpop.xlane.xlu0 %363 }
 0x202   :  { %v369_v5 = vmul.f32 0.03125, %v364_v4 }
 0x204   :  { %v371_v6 = vsub.f32 %v357_v0, %v369_v5 }
 0x205   :  { %v367_v7 = vpop.xlane.xlu0 %366 }
 0x206   :  { %v370_v8 = vmul.f32 0.03125, %v367_v7  ;;  %v373_v9 = vmul.f32 %v371_v6, %v371_v6 }
 0x208   :  { %v372_v10 = vsub.f32 %v358_v1, %v370_v8  ;;  %v375_v11 = vsel %vm361_vm0, %v373_v9, 0.0 }
 0x209   :  { %376 = vadd.xlane.f32.xlu1 %v375_v11  ;;  %v6022_v11 = vld [vmem:[%s6657_s21] ss:$0 sm:$0xff] }
 0x20a   :  { %v374_v12 = vmul.f32 %v372_v10, %v372_v10 }
 0x20c   :  { %v378_v13 = vsel %vm361_vm0, %v374_v12, 0.0 }
 0x20d   :  { %379 = vadd.xlane.f32.xlu1 %v378_v13  ;;  %v6027_v13 = vld [vmem:[%s6657_s21 + $0x1] ss:$0 sm:$0xff] }
 0x296   :  { %v377_v14 = vpop.xlane.xlu1 %376 }
 0x297   :  { %v381_v15 = vmul.f32 0.03125, %v377_v14 }
 0x299   :  { %v383_v16 = vadd.f32 1e-05, %v381_v15 }
 0x29a   :  { %v380_v17 = vpop.xlane.xlu1 %379 }
 0x29b   :  { %5034 = vrsqrt.f32 %v383_v16  ;;  %v382_v18 = vmul.f32 0.03125, %v380_v17 }
 0x29d   :  { %v384_v19 = vadd.f32 1e-05, %v382_v18 }
 0x29f   :  { %5036 = vrsqrt.f32 %v384_v19 }
 0x2a5   :  { %v5035_v20 = vpop.eup %5034 }
 0x2a6   :  { %v387_v22 = vmul.f32 %v5035_v20, %v371_v6 }
 0x2a8   :  { %v395_v24 = vmul.f32 %v4400_v21, %v387_v22 }
 0x2a9   :  { %v5037_v25 = vpop.eup %5036 }
 0x2aa   :  { %v5976_v26 = vadd.f32 %v4401_v23, %v395_v24  ;;  %v388_v27 = vmul.f32 %v5037_v25, %v372_v10 }
 0x2ac   :  { %v421_v28 = vsel %vm361_vm0, %v5976_v26, 0.0  ;;  %v396_v29 = vmul.f32 %v4400_v21, %v388_v27 }
 0x2ad   :  { %422 = vadd.xlane.f32.xlu0 %v421_v28 }
 0x2ae   :  { %v5980_v30 = vadd.f32 %v4401_v23, %v396_v29 }
 0x2b0   :  { %v424_v31 = vsel %vm361_vm0, %v5980_v30, 0.0 }
 0x2b1   :  { %425 = vadd.xlane.f32.xlu1 %v424_v31 }
 0x33a   :  { %v423_v32 = vpop.xlane.xlu0 %422 }
 0x33b   :  { %v427_v33 = vmul.f32 0.03125, %v423_v32 }
 0x33d   :  { %v429_v34 = vsub.f32 %v5976_v26, %v427_v33 }
 0x33e   :  { %v426_v35 = vpop.xlane.xlu1 %425 }
 0x33f   :  { %v428_v36 = vmul.f32 0.03125, %v426_v35  ;;  %v431_v37 = vmul.f32 %v429_v34, %v429_v34 }
 0x341   :  { %v430_v38 = vsub.f32 %v5980_v30, %v428_v36  ;;  %v433_v39 = vsel %vm361_vm0, %v431_v37, 0.0 }
 0x342   :  { %434 = vadd.xlane.f32.xlu0 %v433_v39 }
 0x343   :  { %v432_v40 = vmul.f32 %v430_v38, %v430_v38 }
 0x345   :  { %v436_v41 = vsel %vm361_vm0, %v432_v40, 0.0 }
 0x346   :  { %437 = vadd.xlane.f32.xlu1 %v436_v41 }
 0x3cf   :  { %v435_v45 = vpop.xlane.xlu0 %434 }
 0x3d0   :  { %v439_v46 = vmul.f32 0.03125, %v435_v45 }
 0x3d2   :  { %v441_v47 = vadd.f32 1e-05, %v439_v46 }
 0x3d3   :  { %v438_v48 = vpop.xlane.xlu1 %437 }
 0x3d4   :  { %5038 = vrsqrt.f32 %v441_v47  ;;  %v440_v49 = vmul.f32 0.03125, %v438_v48 }
 0x3d6   :  { %v442_v50 = vadd.f32 1e-05, %v440_v49 }
 0x3d8   :  { %5040 = vrsqrt.f32 %v442_v50 }
 0x3de   :  { %v5039_v51 = vpop.eup %5038 }
 0x3df   :  { %v445_v52 = vmul.f32 %v5039_v51, %v429_v34 }
 0x3e1   :  { %v453_v56 = vmul.f32 %v4404_v53, %v445_v52 }
 0x3e2   :  { %v5041_v54 = vpop.eup %5040 }
 0x3e3   :  { %v446_v55 = vmul.f32 %v5041_v54, %v430_v38  ;;  %v461_v59 = vadd.f32 %v4405_v57, %v453_v56 }
 0x3e5   :  { %v454_v58 = vmul.f32 %v4404_v53, %v446_v55 }
 0x3e7   :  { %v462_v60 = vadd.f32 %v4405_v57, %v454_v58 }
 0x3e9   :  { %v467_v61 = vpack.c.bf16 %v462_v60, %v461_v59 }
 0x3eb   :  { %4626 = vmatmul.mubr.msk.bf16.vlgmr.msra.gmra.mrb[0].mxu1 %vm361_vm0, %v467_v61 }
 0x3ec   :  { %4631 = vmatprep.mubr.msk.bf16.mxu1 %vm5587_vm1, %v5586_v43 }
 0x4be   :  { %v524_v63 = vpop.f32.mrb[0].mxu1 }
 0x4bf   :  { %v525_v0 = vadd.f32 %v4406_v62, %v524_v63  ;;  %v4627_v1 = vpop.f32.mrb[1].mxu1 }
 0x4c0   :  { %v527_v2 = vpop.f32.mrb[2].mxu1 }
 0x4c1   :  { %v5999_v3 = vpack.c.bf16 %v525_v0, %v525_v0  ;;  %v528_v4 = vadd.f32 %v4406_v62, %v527_v2  ;;  %v4628_v5 = vpop.f32.mrb[3].mxu1 }
 0x4c3   :  { %v6001_v6 = vpack.c.bf16 %v528_v4, %v528_v4  ;;  %538 = vrot.lane.b32.xlu0 %v5999_v3, %s5588_s20 }
 0x4c5   :  { %588 = vrot.lane.b32.xlu1 %v6001_v6, %s5588_s20 }
 0x535   :  { %v539_v7 = vpop.permute.xlu0 %538 }
 0x536   :  { %v545_v8 = vsel %vm540_vm2, %v539_v7, 0 }
 0x537   :  { %4630 = vmatpush3.bf16.xpose.msra.mxu1 %v545_v8  ;;  %v589_v9 = vpop.permute.xlu1 %588 }
 0x538   :  { %v594_v10 = vsel %vm540_vm2, %v589_v9, 0  ;;  %4641 = vmatprep.subr.bf16.mxu1 %v5586_v43 }
 0x539   :  { %4636 = vmatpush3.bf16.xpose.msra.mxu0 %v594_v10 }
 0x53a   :  { %4647 = vmatprep.subr.bf16.mxu0 %v5586_v43 }
 0x53e   :  { %4632 = vmatmul.mubr.msk.bf16.vlgmr.msra.gmra.mrb[4].mxu1 %vm540_vm2, %v5999_v3 }
 0x53f   :  { %4643 = vmatprep.mubr.msk.bf16.mxu1 %vm5587_vm1, %v5586_v43 }
 0x540   :  { %4638 = vmatmul.mubr.msk.bf16.vlgmr.msra.gmra.mrb[0].mxu0 %vm540_vm2, %v6001_v6 }
 0x541   :  { %4649 = vmatprep.mubr.msk.bf16.mxu0 %vm5587_vm1, %v5586_v43 }
 0x611   :  { %v581_v12 = vpop.f32.mrb[4].mxu1 }
 0x612   :  { %v582_v14 = vadd.f32 %v6022_v11, %v581_v12  ;;  %v4633_v15 = vpop.f32.mrb[5].mxu1 }
 0x613   :  { %v584_v16 = vpop.f32.mrb[6].mxu1  ;;  %v630_v17 = vpop.f32.mrb[0].mxu0 }
 0x614   :  { %v631_v18 = vadd.f32 %v6027_v13, %v630_v17  ;;  %v4634_v19 = vpop.f32.mrb[7].mxu1  ;;  %v4639_v20 = vpop.f32.mrb[1].mxu0  ;;  %v636_v21 = vsel %vm540_vm2, %v582_v14, -inf }
 0x615   :  { %v633_v22 = vpop.f32.mrb[2].mxu0  ;;  %637 = vmax.xlane.f32.xlu1 %v636_v21 }
 0x616   :  { %v4640_v23 = vpop.f32.mrb[3].mxu0  ;;  %v639_v24 = vsel %vm540_vm2, %v631_v18, -inf }
 0x617   :  { %640 = vmax.xlane.f32.xlu0 %v639_v24 }
 0x626   :  { %709 = vrot.lane.b32.xlu1 %v6001_v6, %s5565_s22 }
 0x62a   :  { %760 = vrot.lane.b32.xlu1 %v5999_v3, %s5589_s6 }
 0x6a2   :  { %v638_v25 = vpop.xlane.xlu1 %637 }
 0x6a3   :  { %v642_v27 = vsub.f32 %v582_v14, %v638_v25 }
 0x6a4   :  { %v641_v28 = vpop.xlane.xlu0 %640 }
 0x6a5   :  { %v644_v29 = vmul.f32 1.442695, %v642_v27  ;;  %v643_v31 = vsub.f32 %v631_v18, %v641_v28 }
 0x6a6   :  { %v710_v32 = vpop.permute.xlu1 %709 }
 0x6a7   :  { %5042 = vpow2.f32 %v644_v29  ;;  %v646_v33 = vmul.f32 1.442695, %v643_v31  ;;  %v715_v34 = vsel %vm665_vm3, %v710_v32, 0 }
 0x6a8   :  { %4648 = vmatpush3.bf16.msra.mxu0 %v715_v34 }
 0x6a9   :  { %5044 = vpow2.f32 %v646_v33  ;;  %4659 = vmatprep.subr.bf16.mxu0 %v5586_v43 }
 0x6aa   :  { %v761_v39 = vpop.permute.xlu1 %760 }
 0x6ab   :  { %v766_v51 = vsel %vm540_vm2, %v761_v39, 0 }
 0x6b1   :  { %v5043_v35 = vpop.eup %5042 }
 0x6b2   :  { %v648_v36 = vsel %vm540_vm2, %v5043_v35, 0.0 }
 0x6b3   :  { %v5045_v37 = vpop.eup %5044  ;;  %649 = vadd.xlane.f32.xlu0 %v648_v36  ;;  %v532_v36 = vld [vmem:[#allocation16 + $0x4] sm:$0xf] }
 0x6b4   :  { %v651_v38 = vsel %vm540_vm2, %v5045_v37, 0.0  ;;  %v983_v39 = vsel %vm665_vm3, %v532_v36, 0 }
 0x6b5   :  { %652 = vadd.xlane.f32.xlu1 %v651_v38 }
 0x6c6   :  { %810 = vrot.lane.b32.xlu1 %v6001_v6, %s5589_s6 }
 0x6c9   :  { %660 = vrot.lane.b32.xlu0 %v5999_v3, %s5565_s22 }
 0x6ca   :  { %808 = vrot.lane.b32.xlu1 %v6001_v6, %s5590_s16 }
 0x6cd   :  { %758 = vrot.lane.b32.xlu0 %v5999_v3, %s5590_s16 }
 0x740   :  { %v650_v40 = vpop.xlane.xlu0 %649 }
 0x741   :  { %5046 = vrcp.f32 %v650_v40 }
 0x742   :  { %v653_v41 = vpop.xlane.xlu1 %652 }
 0x743   :  { %5048 = vrcp.f32 %v653_v41  ;;  %v531_v41 = vld [vmem:[#allocation16] sm:$0xf] }
 0x744   :  { %v661_v42 = vpop.permute.xlu0 %660 }
 0x745   :  { %v667_v44 = vsel %vm665_vm3, %v661_v42, 0 }
 0x746   :  { %4642 = vmatpush3.bf16.msra.mxu1 %v667_v44  ;;  %v811_v50 = vpop.permute.xlu1 %810 }
 0x747   :  { %4653 = vmatprep.subr.bf16.mxu1 %v5586_v43  ;;  %v816_v53 = vsel %vm540_vm2, %v811_v50, 0 }
 0x748   :  { %v759_v54 = vpop.permute.xlu0 %758 }
 0x74a   :  { %v809_v55 = vpop.permute.xlu1 %808 }
 0x74b   :  { %v5047_v45 = vpop.eup %5046 }
 0x74c   :  { %v656_v46 = vmul.f32 %v5047_v45, %v5043_v35  ;;  %v1030_v45 = vsel %vm665_vm3, %v531_v41, 0 }
 0x74d   :  { %v5049_v47 = vpop.eup %5048 }
 0x74e   :  { %v657_v48 = vmul.f32 %v5049_v47, %v5045_v37  ;;  %v658_v49 = vpack.c.bf16 %v656_v46, %v656_v46 }
 0x750   :  { %4644 = vmatmul.mubr.msk.bf16.vlgmr.msra.gmra.mrb[8].mxu1 %vm540_vm2, %v658_v49  ;;  %v659_v52 = vpack.c.bf16 %v657_v48, %v657_v48 }
 0x751   :  { %4654 = vmatpush3.bf16.xpose.msra.mxu1 %v766_v51  ;;  %4655 = vmatprep.mubr.msk.bf16.mxu1 %vm5587_vm1, %v5586_v43 }
 0x752   :  { %4650 = vmatmul.mubr.msk.bf16.vlgmr.msra.gmra.mrb[4].mxu0 %vm540_vm2, %v659_v52  ;;  %4665 = vmatprep.subr.bf16.mxu1 %v5586_v43 }
 0x753   :  { %4660 = vmatpush3.bf16.xpose.msra.mxu0 %v816_v53  ;;  %4661 = vmatprep.mubr.msk.bf16.mxu0 %vm5587_vm1, %v5586_v43 }
 0x754   :  { %4671 = vmatprep.subr.bf16.mxu0 %v5586_v43 }
 0x758   :  { %4656 = vmatmul.mubr.msk.bf16.vlgmr.msra.gmra.mrb[12].mxu1 %vm540_vm2, %v759_v54 }
 0x759   :  { %4667 = vmatprep.mubr.msk.bf16.mxu1 %vm5587_vm1, %v5586_v43 }
 0x75a   :  { %4662 = vmatmul.mubr.msk.bf16.vlgmr.msra.gmra.mrb[8].mxu0 %vm540_vm2, %v809_v55 }
 0x75b   :  { %4673 = vmatprep.mubr.msk.bf16.mxu0 %vm5587_vm1, %v5586_v43 }
 0x823   :  { %v6067_v56 = vpop.f32.mrb[8].mxu1 }
 0x824   :  { %v4645_v57 = vpop.f32.mrb[9].mxu1 }
 0x825   :  { %v706_v58 = vpop.f32.mrb[10].mxu1  ;;  %v6069_v59 = vpop.f32.mrb[4].mxu0 }
 0x826   :  { %v757_v60 = vpack.c.bf16 %v6069_v59, %v6067_v56  ;;  %v4646_v61 = vpop.f32.mrb[11].mxu1  ;;  %v4651_v62 = vpop.f32.mrb[5].mxu0 }
 0x827   :  { %v754_v63 = vpop.f32.mrb[6].mxu0 }
 0x828   :  { %v4652_v0 = vpop.f32.mrb[7].mxu0 }
 0x82b   :  { %v802_v1 = vpop.f32.mrb[12].mxu1 }
 0x82c   :  { %v803_v2 = vadd.f32 %v6022_v11, %v802_v1  ;;  %v4657_v4 = vpop.f32.mrb[13].mxu1 }
 0x82d   :  { %v805_v5 = vpop.f32.mrb[14].mxu1  ;;  %v852_v7 = vpop.f32.mrb[8].mxu0 }
 0x82e   :  { %v853_v8 = vadd.f32 %v6027_v13, %v852_v7  ;;  %v4658_v9 = vpop.f32.mrb[15].mxu1  ;;  %v4663_v10 = vpop.f32.mrb[9].mxu0  ;;  %v858_v12 = vsel %vm540_vm2, %v803_v2, -inf }
 0x82f   :  { %v855_v14 = vpop.f32.mrb[10].mxu0  ;;  %859 = vmax.xlane.f32.xlu0 %v858_v12 }
 0x830   :  { %v4664_v15 = vpop.f32.mrb[11].mxu0  ;;  %v861_v16 = vsel %vm540_vm2, %v853_v8, -inf }
 0x831   :  { %862 = vmax.xlane.f32.xlu1 %v861_v16 }
 0x842   :  { %930 = vrot.lane.b32.xlu1 %v6001_v6, %s5591_s30 }
 0x846   :  { %1075 = vrot.lane.b32.xlu1 %v5999_v3, %s5592_s1 }
 0x84a   :  { %1125 = vrot.lane.b32.xlu1 %v6001_v6, %s5592_s1 }
 0x84e   :  { %1123 = vrot.lane.b32.xlu1 %v6001_v6, %s5593_s10 }
 0x8bc   :  { %v860_v17 = vpop.xlane.xlu0 %859 }
 0x8bd   :  { %v864_v18 = vsub.f32 %v803_v2, %v860_v17 }
 0x8be   :  { %v863_v19 = vpop.xlane.xlu1 %862 }
 0x8bf   :  { %v866_v20 = vmul.f32 1.442695, %v864_v18  ;;  %v865_v21 = vsub.f32 %v853_v8, %v863_v19 }
 0x8c1   :  { %5050 = vpow2.f32 %v866_v20  ;;  %v868_v22 = vmul.f32 1.442695, %v865_v21 }
 0x8c2   :  { %v931_v23 = vpop.permute.xlu1 %930 }
 0x8c3   :  { %5052 = vpow2.f32 %v868_v22  ;;  %v936_v24 = vsel %vm665_vm3, %v931_v23, 0 }
 0x8c4   :  { %4672 = vmatpush3.bf16.msra.mxu0 %v936_v24 }
 0x8c5   :  { %4683 = vmatprep.subr.bf16.mxu0 %v5586_v43 }
 0x8c6   :  { %v1076_v46 = vpop.permute.xlu1 %1075 }
 0x8c7   :  { %v1081_v58 = vsel %vm540_vm2, %v1076_v46, 0 }
 0x8ca   :  { %v1126_v47 = vpop.permute.xlu1 %1125 }
 0x8cb   :  { %v5051_v25 = vpop.eup %5050  ;;  %v1131_v48 = vsel %vm540_vm2, %v1126_v47, 0 }
 0x8cc   :  { %v870_v27 = vsel %vm540_vm2, %v5051_v25, 0.0 }
 0x8cd   :  { %v5053_v28 = vpop.eup %5052  ;;  %871 = vadd.xlane.f32.xlu0 %v870_v27 }
 0x8ce   :  { %v873_v29 = vsel %vm540_vm2, %v5053_v28, 0.0  ;;  %v1124_v49 = vpop.permute.xlu1 %1123 }
 0x8d1   :  { %874 = vadd.xlane.f32.xlu0 %v873_v29 }
 0x8e7   :  { %882 = vrot.lane.b32.xlu0 %v5999_v3, %s5591_s30 }
 0x8eb   :  { %1073 = vrot.lane.b32.xlu0 %v5999_v3, %s5593_s10 }
 0x95a   :  { %v872_v31 = vpop.xlane.xlu0 %871 }
 0x95b   :  { %5054 = vrcp.f32 %v872_v31 }
 0x95e   :  { %v875_v32 = vpop.xlane.xlu0 %874 }
 0x95f   :  { %5056 = vrcp.f32 %v875_v32 }
 0x962   :  { %v883_v33 = vpop.permute.xlu0 %882 }
 0x963   :  { %v888_v34 = vsel %vm665_vm3, %v883_v33, 0 }
 0x964   :  { %4666 = vmatpush3.bf16.msra.mxu1 %v888_v34 }
 0x965   :  { %v5055_v35 = vpop.eup %5054  ;;  %4677 = vmatprep.subr.bf16.mxu1 %v5586_v43 }
 0x966   :  { %v878_v37 = vmul.f32 %v5055_v35, %v5051_v25  ;;  %v1074_v62 = vpop.permute.xlu0 %1073 }
 0x968   :  { %v880_v38 = vpack.c.bf16 %v878_v37, %v878_v37 }
 0x969   :  { %v5057_v40 = vpop.eup %5056 }
 0x96a   :  { %v879_v42 = vmul.f32 %v5057_v40, %v5053_v28  ;;  %4668 = vmatmul.mubr.msk.bf16.vlgmr.msra.gmra.mrb[16].mxu1 %vm540_vm2, %v880_v38 }
 0x96b   :  { %4678 = vmatpush3.bf16.msra.mxu1 %v983_v39  ;;  %4679 = vmatprep.mubr.msk.bf16.mxu1 %vm5587_vm1, %v5586_v43 }
 0x96c   :  { %v881_v44 = vpack.c.bf16 %v879_v42, %v879_v42  ;;  %4689 = vmatprep.subr.bf16.mxu1 %v5586_v43 }
 0x96e   :  { %4674 = vmatmul.mubr.msk.bf16.vlgmr.msra.gmra.mrb[12].mxu0 %vm540_vm2, %v881_v44 }
 0x96f   :  { %4684 = vmatpush3.bf16.msra.mxu0 %v1030_v45  ;;  %4685 = vmatprep.mubr.msk.bf16.mxu0 %vm5587_vm1, %v5586_v43 }
 0x970   :  { %4695 = vmatprep.subr.bf16.mxu0 %v5586_v43 }
 0x976   :  { %4686 = vmatmul.mubr.msk.bf16.vlgmr.msra.gmra.mrb[16].mxu0 %vm540_vm2, %v757_v60 }
 0x977   :  { %4697 = vmatprep.mubr.msk.bf16.mxu0 %vm5587_vm1, %v5586_v43 }
 0x978   :  { %4696 = vmatpush3.bf16.xpose.msra.mxu0 %v1131_v48 }
 0x979   :  { %4707 = vmatprep.subr.bf16.mxu0 %v5586_v43 }
 0x97f   :  { %4698 = vmatmul.mubr.msk.bf16.vlgmr.msra.gmra.mrb[20].mxu0 %vm540_vm2, %v1124_v49 }
 0x980   :  { %4709 = vmatprep.mubr.msk.bf16.mxu0 %vm5587_vm1, %v5586_v43 }
 0xa3d   :  { %v924_v50 = vpop.f32.mrb[16].mxu1 }
 0xa3e   :  { %v4669_v51 = vpop.f32.mrb[17].mxu1 }
 0xa3f   :  { %v927_v52 = vpop.f32.mrb[18].mxu1 }
 0xa40   :  { %v4670_v53 = vpop.f32.mrb[19].mxu1 }
 0xa41   :  { %v972_v54 = vpop.f32.mrb[12].mxu0 }
 0xa42   :  { %v978_v55 = vpack.c.bf16 %v972_v54, %v924_v50  ;;  %v4675_v56 = vpop.f32.mrb[13].mxu0 }
 0xa43   :  { %v975_v57 = vpop.f32.mrb[14].mxu0 }
 0xa44   :  { %v4676_v59 = vpop.f32.mrb[15].mxu0  ;;  %4680 = vmatmul.mubr.msk.bf16.vlgmr.msra.gmra.mrb[20].mxu1 %vm540_vm2, %v978_v55  ;;  %v533_v55 = vld [vmem:[#allocation16 + $0x8] sm:$0xf] }
 0xa45   :  { %4690 = vmatpush3.bf16.xpose.msra.mxu1 %v1081_v58  ;;  %4691 = vmatprep.mubr.msk.bf16.mxu1 %vm5587_vm1, %v5586_v43  ;;  %v1298_v56 = vsel %vm665_vm3, %v533_v55, 0 }
 0xa46   :  { %4701 = vmatprep.subr.bf16.mxu1 %v5586_v43 }
 0xa49   :  { %v1066_v60 = vpop.f32.mrb[16].mxu0 }
 0xa4a   :  { %v4687_v61 = vpop.f32.mrb[17].mxu0 }
 0xa4b   :  { %v1069_v63 = vpop.f32.mrb[18].mxu0 }
 0xa4c   :  { %v4688_v0 = vpop.f32.mrb[19].mxu0  ;;  %4692 = vmatmul.mubr.msk.bf16.vlgmr.msra.gmra.mrb[24].mxu1 %vm540_vm2, %v1074_v62 }
 0xa4d   :  { %4703 = vmatprep.mubr.msk.bf16.mxu1 %vm5587_vm1, %v5586_v43 }
 0xa52   :  { %v1167_v1 = vpop.f32.mrb[20].mxu0 }
 0xa53   :  { %v1168_v2 = vadd.f32 %v6027_v13, %v1167_v1  ;;  %v4699_v4 = vpop.f32.mrb[21].mxu0 }
 0xa54   :  { %v1170_v5 = vpop.f32.mrb[22].mxu0 }
 0xa55   :  { %v4700_v7 = vpop.f32.mrb[23].mxu0  ;;  %v1176_v8 = vsel %vm540_vm2, %v1168_v2, -inf }
 0xa56   :  { %1177 = vmax.xlane.f32.xlu1 %v1176_v8 }
 0xa67   :  { %1245 = vrot.lane.b32.xlu1 %v6001_v6, %s5594_s11 }
 0xa6b   :  { %1345 = vrot.lane.b32.xlu1 %v5999_v3, %s5595_s28 }
 0xa6f   :  { %1395 = vrot.lane.b32.xlu1 %v6001_v6, %s5595_s28 }
 0xa73   :  { %1393 = vrot.lane.b32.xlu1 %v6001_v6, %s5596_s13 }
 0xae3   :  { %v1178_v9 = vpop.xlane.xlu1 %1177 }
 0xae4   :  { %v1180_v14 = vsub.f32 %v1168_v2, %v1178_v9 }
 0xae6   :  { %v1183_v15 = vmul.f32 1.442695, %v1180_v14 }
 0xae7   :  { %v1246_v10 = vpop.permute.xlu1 %1245 }
 0xae8   :  { %v1251_v12 = vsel %vm665_vm3, %v1246_v10, 0  ;;  %5058 = vpow2.f32 %v1183_v15 }
 0xae9   :  { %4708 = vmatpush3.bf16.msra.mxu0 %v1251_v12 }
 0xaea   :  { %4719 = vmatprep.subr.bf16.mxu0 %v5586_v43 }
 0xaeb   :  { %v1346_v40 = vpop.permute.xlu1 %1345 }
 0xaec   :  { %v1351_v42 = vsel %vm540_vm2, %v1346_v40, 0 }
 0xaf2   :  { %v5059_v29 = vpop.eup %5058 }
 0xaf3   :  { %v1188_v31 = vsel %vm540_vm2, %v5059_v29, 0.0 }
 0xb17   :  { %v1019_v16 = vpop.f32.mrb[20].mxu1 }
 0xb18   :  { %v6136_v17 = vadd.f32 %v1066_v60, %v1019_v16  ;;  %v4681_v18 = vpop.f32.mrb[21].mxu1 }
 0xb19   :  { %v1022_v19 = vpop.f32.mrb[22].mxu1 }
 0xb1a   :  { %v6138_v20 = vadd.f32 %v1069_v63, %v1022_v19  ;;  %v4682_v21 = vpop.f32.mrb[23].mxu1  ;;  %v1396_v63 = vpop.permute.xlu1 %1395 }
 0xb1b   :  { %v1401_v5 = vsel %vm540_vm2, %v1396_v63, 0 }
 0xb1f   :  { %v1117_v22 = vpop.f32.mrb[24].mxu1 }
 0xb20   :  { %v1118_v23 = vadd.f32 %v6022_v11, %v1117_v22  ;;  %v4693_v24 = vpop.f32.mrb[25].mxu1 }
 0xb21   :  { %v1120_v25 = vpop.f32.mrb[26].mxu1 }
 0xb22   :  { %v4694_v27 = vpop.f32.mrb[27].mxu1  ;;  %v1173_v28 = vsel %vm540_vm2, %v1118_v23, -inf }
 0xb23   :  { %1174 = vmax.xlane.f32.xlu0 %v1173_v28 }
 0xb27   :  { %1189 = vadd.xlane.f32.xlu0 %v1188_v31 }
 0xbb0   :  { %v1175_v32 = vpop.xlane.xlu0 %1174 }
 0xbb1   :  { %v1179_v33 = vsub.f32 %v1118_v23, %v1175_v32 }
 0xbb3   :  { %v1181_v34 = vmul.f32 1.442695, %v1179_v33 }
 0xbb4   :  { %v1190_v35 = vpop.xlane.xlu0 %1189 }
 0xbb5   :  { %5060 = vpow2.f32 %v1181_v34 }
 0xbb6   :  { %5062 = vrcp.f32 %v1190_v35 }
 0xbbf   :  { %v5061_v36 = vpop.eup %5060 }
 0xbc0   :  { %v5063_v37 = vpop.eup %5062  ;;  %v1185_v38 = vsel %vm540_vm2, %v5061_v36, 0.0 }
 0xbc1   :  { %v1194_v39 = vmul.f32 %v5063_v37, %v5059_v29  ;;  %1186 = vadd.xlane.f32.xlu0 %v1185_v38 }
 0xbc3   :  { %v1196_v41 = vpack.c.bf16 %v1194_v39, %v1194_v39 }
 0xbc5   :  { %4710 = vmatmul.mubr.msk.bf16.vlgmr.msra.gmra.mrb[24].mxu0 %vm540_vm2, %v1196_v41 }
 0xbc6   :  { %4720 = vmatpush3.bf16.xpose.msra.mxu0 %v1351_v42  ;;  %4721 = vmatprep.mubr.msk.bf16.mxu0 %vm5587_vm1, %v5586_v43 }
 0xbc7   :  { %4731 = vmatprep.subr.bf16.mxu0 %v5586_v43 }
 0xbd7   :  { %1197 = vrot.lane.b32.xlu0 %v5999_v3, %s5594_s11 }
 0xbdb   :  { %1343 = vrot.lane.b32.xlu0 %v5999_v3, %s5596_s13 }
 0xc4e   :  { %v1187_v44 = vpop.xlane.xlu0 %1186 }
 0xc4f   :  { %5064 = vrcp.f32 %v1187_v44  ;;  %v534_v44 = vld [vmem:[#allocation16 + $0xc] sm:$0xf] }
 0xc52   :  { %v1198_v45 = vpop.permute.xlu0 %1197 }
 0xc53   :  { %v1203_v46 = vsel %vm665_vm3, %v1198_v45, 0  ;;  %v1568_v45 = vsel %vm665_vm3, %v534_v44, 0 }
 0xc54   :  { %4702 = vmatpush3.bf16.msra.mxu1 %v1203_v46 }
 0xc55   :  { %4713 = vmatprep.subr.bf16.mxu1 %v5586_v43 }
 0xc56   :  { %v1344_v47 = vpop.permute.xlu0 %1343 }
 0xc57   :  { %4722 = vmatmul.mubr.msk.bf16.vlgmr.msra.gmra.mrb[28].mxu0 %vm540_vm2, %v1344_v47 }
 0xc58   :  { %4733 = vmatprep.mubr.msk.bf16.mxu0 %vm5587_vm1, %v5586_v43 }
 0xc59   :  { %v5065_v48 = vpop.eup %5064 }
 0xc5a   :  { %v1193_v49 = vmul.f32 %v5065_v48, %v5061_v36 }
 0xc5c   :  { %v1195_v50 = vpack.c.bf16 %v1193_v49, %v1193_v49 }
 0xc5e   :  { %4704 = vmatmul.mubr.msk.bf16.vlgmr.msra.gmra.mrb[28].mxu1 %vm540_vm2, %v1195_v50 }
 0xc5f   :  { %4715 = vmatprep.mubr.msk.bf16.mxu1 %vm5587_vm1, %v5586_v43  ;;  %4714 = vmatpush3.bf16.msra.mxu1 %v1298_v56 }
 0xc60   :  { %4725 = vmatprep.subr.bf16.mxu1 %v5586_v43 }
 0xc98   :  { %v1287_v51 = vpop.f32.mrb[24].mxu0 }
 0xc99   :  { %v4711_v52 = vpop.f32.mrb[25].mxu0 }
 0xc9a   :  { %v1290_v53 = vpop.f32.mrb[26].mxu0 }
 0xc9b   :  { %v4712_v54 = vpop.f32.mrb[27].mxu0 }
 0xd2a   :  { %v1387_v57 = vpop.f32.mrb[28].mxu0 }
 0xd2b   :  { %v1388_v58 = vadd.f32 %v6022_v11, %v1387_v57  ;;  %v4723_v59 = vpop.f32.mrb[29].mxu0  ;;  %v1394_v11 = vpop.permute.xlu1 %1393 }
 0xd2c   :  { %v1390_v60 = vpop.f32.mrb[30].mxu0 }
 0xd2d   :  { %v4724_v61 = vpop.f32.mrb[31].mxu0  ;;  %v1443_v62 = vsel %vm540_vm2, %v1388_v58, -inf }
 0xd2e   :  { %1444 = vmax.xlane.f32.xlu0 %v1443_v62 }
 0xd31   :  { %v1239_v0 = vpop.f32.mrb[28].mxu1 }
 0xd32   :  { %v1293_v1 = vpack.c.bf16 %v1287_v51, %v1239_v0  ;;  %v4705_v2 = vpop.f32.mrb[29].mxu1 }
 0xd33   :  { %v1242_v4 = vpop.f32.mrb[30].mxu1 }
 0xd34   :  { %v4706_v7 = vpop.f32.mrb[31].mxu1  ;;  %4716 = vmatmul.mubr.msk.bf16.vlgmr.msra.gmra.mrb[32].mxu1 %vm540_vm2, %v1293_v1 }
 0xd35   :  { %4726 = vmatpush3.bf16.xpose.msra.mxu1 %v1401_v5  ;;  %4727 = vmatprep.mubr.msk.bf16.mxu1 %vm5587_vm1, %v5586_v43 }
 0xd36   :  { %4737 = vmatprep.subr.bf16.mxu1 %v5586_v43 }
 0xd3c   :  { %4728 = vmatmul.mubr.msk.bf16.vlgmr.msra.gmra.mrb[36].mxu1 %vm540_vm2, %v1394_v11 }
 0xd3d   :  { %4739 = vmatprep.mubr.msk.bf16.mxu1 %vm5587_vm1, %v5586_v43 }
 0xdbb   :  { %v1445_v8 = vpop.xlane.xlu0 %1444 }
 0xdbc   :  { %v1449_v9 = vsub.f32 %v1388_v58, %v1445_v8  ;;  %v4430_v58 = vld [vmem:[#allocation17] ss:$0 sm:$0xff] }
 0xdbe   :  { %v1451_v10 = vmul.f32 1.442695, %v1449_v9 }
 0xdc0   :  { %5066 = vpow2.f32 %v1451_v10 }
 0xdca   :  { %v5067_v12 = vpop.eup %5066 }
 0xdcb   :  { %v1455_v14 = vsel %vm540_vm2, %v5067_v12, 0.0 }
 0xdcc   :  { %1456 = vadd.xlane.f32.xlu0 %v1455_v14 }
 0xe07   :  { %v1334_v15 = vpop.f32.mrb[32].mxu1 }
 0xe08   :  { %v1341_v16 = vadd.f32 %v1334_v15, %v6136_v17  ;;  %v4717_v18 = vpop.f32.mrb[33].mxu1  ;;  %v5012_v15 = vld [vmem:[#allocation22] sm:$0xff]  }
 0xe09   :  { %v1337_v19 = vpop.f32.mrb[34].mxu1 }
 0xe0a   :  { %v1342_v21 = vadd.f32 %v1337_v19, %v6138_v20  ;;  %v4718_v22 = vpop.f32.mrb[35].mxu1 }
 0xe0f   :  { %v1437_v23 = vpop.f32.mrb[36].mxu1 }
 0xe10   :  { %v1438_v24 = vadd.f32 %v6027_v13, %v1437_v23  ;;  %v4729_v25 = vpop.f32.mrb[37].mxu1 }
 0xe11   :  { %v1440_v27 = vpop.f32.mrb[38].mxu1 }
 0xe12   :  { %v4730_v28 = vpop.f32.mrb[39].mxu1  ;;  %v1446_v29 = vsel %vm540_vm2, %v1438_v24, -inf  ;;  %v4431_v27 = vld [vmem:[#allocation19] ss:$0 sm:$0xff] }
 0xe13   :  { %1447 = vmax.xlane.f32.xlu1 %v1446_v29 }
 0xe24   :  { %1515 = vrot.lane.b32.xlu1 %v6001_v6, %s5597_s15 }
 0xe59   :  { %v1457_v35 = vpop.xlane.xlu0 %1456 }
 0xea0   :  { %v1448_v31 = vpop.xlane.xlu1 %1447 }
 0xea1   :  { %v1450_v17 = vsub.f32 %v1438_v24, %v1448_v31 }
 0xea3   :  { %v1453_v32 = vmul.f32 1.442695, %v1450_v17 }
 0xea4   :  { %v1516_v33 = vpop.permute.xlu1 %1515 }
 0xea5   :  { %5068 = vpow2.f32 %v1453_v32  ;;  %v1521_v20 = vsel %vm665_vm3, %v1516_v33, 0  ;;  %v4432_v32 = vld [vmem:[#allocation20] ss:$0 sm:$0xff] }
 0xea6   :  { %4738 = vmatpush3.bf16.msra.mxu1 %v1521_v20  ;;  %5070 = vrcp.f32 %v1457_v35  ;;  %v5014_v35 = vld [vmem:[%s6626_s14] sm:$0xff]  }
 0xea7   :  { %4749 = vmatprep.subr.bf16.mxu1 %v5586_v43 }
 0xeaf   :  { %v5069_v13 = vpop.eup %5068 }
 0xeb0   :  { %v1458_v34 = vsel %vm540_vm2, %v5069_v13, 0.0  ;;  %v5071_v6 = vpop.eup %5070 }
 0xeb1   :  { %1459 = vadd.xlane.f32.xlu0 %v1458_v34  ;;  %v1463_v37 = vmul.f32 %v5071_v6, %v5067_v12  ;;  %v5015_v6 = vld [vmem:[%s6626_s14 + $0x8] sm:$0xff]  }
 0xeb3   :  { %v1465_v40 = vpack.c.bf16 %v1463_v37, %v1463_v37  ;;  %v5017_v37 = vld [vmem:[%s6626_s14 + $0x18] sm:$0xff]  }
 0xec7   :  { %1467 = vrot.lane.b32.xlu0 %v5999_v3, %s5597_s15 }
 0xf3e   :  { %v1460_v36 = vpop.xlane.xlu0 %1459 }
 0xf3f   :  { %5072 = vrcp.f32 %v1460_v36  ;;  %v5016_v36 = vld [vmem:[%s6626_s14 + $0x10] sm:$0xff]  }
 0xf42   :  { %v1468_v38 = vpop.permute.xlu0 %1467 }
 0xf43   :  { %v1473_v39 = vsel %vm665_vm3, %v1468_v38, 0  ;;  %v5018_v38 = vld [vmem:[%s6626_s14 + $0x20] sm:$0xff]  }
 0xf44   :  { %4732 = vmatpush3.bf16.msra.mxu0 %v1473_v39  ;;  %v5019_v39 = vld [vmem:[%s6626_s14 + $0x28] sm:$0xff]  }
 0xf45   :  { %4743 = vmatprep.subr.bf16.mxu0 %v5586_v43 }
 0xf47   :  { %4734 = vmatmul.mubr.msk.bf16.vlgmr.msra.gmra.mrb[32].mxu0 %vm540_vm2, %v1465_v40  ;;  %v5020_v40 = vld [vmem:[%s6626_s14 + $0x30] sm:$0xff]  }
 0xf48   :  { %4745 = vmatprep.mubr.msk.bf16.mxu0 %vm5587_vm1, %v5586_v43  ;;  %4744 = vmatpush3.bf16.msra.mxu0 %v1568_v45 }
 0xf49   :  { %v5073_v41 = vpop.eup %5072  ;;  %4757 = vmatprep.subr.bf16.mxu0 %v5586_v43 }
 0xf4a   :  { %v1464_v3 = vmul.f32 %v5073_v41, %v5069_v13  ;;  %v5021_v41 = vld [vmem:[%s6626_s14 + $0x38] sm:$0xff]  }
 0xf4c   :  { %v1466_v42 = vpack.c.bf16 %v1464_v3, %v1464_v3  ;;  %v4433_v3 = vld [vmem:[#allocation23] ss:$0 sm:$0xff] }
 0xf4e   :  { %4740 = vmatmul.mubr.msk.bf16.vlgmr.msra.gmra.mrb[40].mxu1 %vm540_vm2, %v1466_v42 }
 0xf4f   :  { %4753 = vmatprep.mubr.msk.bf16.mxu1 %vm5587_vm1, %v5586_v43  ;;  %4750 = vmatpush3.bf16.msra.mxu1 %v5012_v15 }
 0xf50   :  { %4751 = vmatprep.subr.bf16.mxu1 %v5586_v43 }
0x101a   :  { %v1509_v46 = vpop.f32.mrb[32].mxu0 }
0x101b   :  { %v4735_v47 = vpop.f32.mrb[33].mxu0 }
0x101c   :  { %v1512_v48 = vpop.f32.mrb[34].mxu0 }
0x101d   :  { %v4736_v49 = vpop.f32.mrb[35].mxu0 }
0x1021   :  { %v1557_v50 = vpop.f32.mrb[40].mxu1 }
0x1022   :  { %v1563_v51 = vpack.c.bf16 %v1557_v50, %v1509_v46  ;;  %v4741_v52 = vpop.f32.mrb[41].mxu1 }
0x1023   :  { %v1560_v53 = vpop.f32.mrb[42].mxu1 }
0x1024   :  { %v4742_v54 = vpop.f32.mrb[43].mxu1  ;;  %4746 = vmatmul.mubr.msk.bf16.vlgmr.msra.gmra.mrb[36].mxu0 %vm540_vm2, %v1563_v51 }
0x1025   :  { %4773 = vmatprep.mubr.msk.bf16.mxu0 %vm5587_vm1, %v5586_v43  ;;  %4758 = vmatpush3.bf16.msra.mxu0 %v5014_v35 }
0x1026   :  { %4759 = vmatprep.subr.bf16.mxu0 %v5586_v43 }
0x1029   :  { %4760 = vmatpush3.bf16.msra.mxu0 %v5015_v6  ;;  %v4446_v6 = vld [vmem:[#allocation10 + $0x1] ss:$0 sm:$0xff] }
0x102a   :  { %4761 = vmatprep.subr.bf16.mxu0 %v5586_v43 }
0x102d   :  { %4762 = vmatpush3.bf16.msra.mxu0 %v5016_v36 }
0x102e   :  { %4763 = vmatprep.subr.bf16.mxu0 %v5586_v43 }
0x1031   :  { %4764 = vmatpush3.bf16.msra.mxu0 %v5017_v37 }
0x1032   :  { %4765 = vmatprep.subr.bf16.mxu0 %v5586_v43 }
0x1035   :  { %4766 = vmatpush3.bf16.msra.mxu0 %v5018_v38 }
0x1036   :  { %4767 = vmatprep.subr.bf16.mxu0 %v5586_v43 }
0x1039   :  { %4768 = vmatpush3.bf16.msra.mxu0 %v5019_v39 }
0x103a   :  { %4769 = vmatprep.subr.bf16.mxu0 %v5586_v43 }
0x103d   :  { %4770 = vmatpush3.bf16.msra.mxu0 %v5020_v40  ;;  %v4447_v40 = vld [vmem:[#allocation11 + $0x1] ss:$0 sm:$0xff] }
0x103e   :  { %4771 = vmatprep.subr.bf16.mxu0 %v5586_v43 }
0x1041   :  { %4772 = vmatpush3.bf16.msra.mxu0 %v5021_v41 }
0x1042   :  { %4803 = vmatprep.subr.bf16.mxu0 %v5586_v43 }
0x10f7   :  { %v1604_v55 = vpop.f32.mrb[36].mxu0 }
0x10f8   :  { %v1611_v56 = vadd.f32 %v1604_v55, %v1341_v16  ;;  %v4747_v57 = vpop.f32.mrb[37].mxu0  ;;  %v5013_v16 = vld [vmem:[#allocation22 + $0x8] sm:$0xff]  }
0x10f9   :  { %v1607_v59 = vpop.f32.mrb[38].mxu0  ;;  %4752 = vmatpush3.bf16.msra.mxu1 %v5013_v16 }
0x10fa   :  { %v1613_v60 = vadd.f32 %v1611_v56, %v5976_v26  ;;  %v1612_v61 = vadd.f32 %v1607_v59, %v1342_v21  ;;  %v4748_v62 = vpop.f32.mrb[39].mxu0  ;;  %4777 = vmatprep.subr.bf16.mxu1 %v5586_v43 }
0x10fc   :  { %v6199_v63 = vadd.f32 %v4430_v58, %v1613_v60  ;;  %v1614_v0 = vadd.f32 %v1612_v61, %v5980_v30 }
0x10fe   :  { %v6202_v1 = vadd.f32 %v4430_v58, %v1614_v0  ;;  %v1626_v2 = vsel %vm361_vm0, %v6199_v63, 0.0 }
0x10ff   :  { %1627 = vadd.xlane.f32.xlu1 %v1626_v2 }
0x1100   :  { %v1629_v4 = vsel %vm361_vm0, %v6202_v1, 0.0 }
0x1101   :  { %1630 = vadd.xlane.f32.xlu0 %v1629_v4 }
0x118c   :  { %v1628_v5 = vpop.xlane.xlu1 %1627 }
0x118d   :  { %v1632_v7 = vmul.f32 0.03125, %v1628_v5 }
0x118e   :  { %v1631_v11 = vpop.xlane.xlu0 %1630 }
0x118f   :  { %v1634_v26 = vsub.f32 %v6199_v63, %v1632_v7  ;;  %v1633_v8 = vmul.f32 0.03125, %v1631_v11 }
0x1191   :  { %v1635_v9 = vsub.f32 %v6202_v1, %v1633_v8  ;;  %v1636_v10 = vmul.f32 %v1634_v26, %v1634_v26 }
0x1193   :  { %v1638_v30 = vsel %vm361_vm0, %v1636_v10, 0.0  ;;  %v1637_v12 = vmul.f32 %v1635_v9, %v1635_v9 }
0x1194   :  { %1639 = vadd.xlane.f32.xlu0 %v1638_v30 }
0x1195   :  { %v1641_v14 = vsel %vm361_vm0, %v1637_v12, 0.0 }
0x1196   :  { %1642 = vadd.xlane.f32.xlu1 %v1641_v14 }
0x1221   :  { %v1640_v18 = vpop.xlane.xlu0 %1639 }
0x1222   :  { %v1644_v19 = vmul.f32 0.03125, %v1640_v18 }
0x1223   :  { %v1643_v21 = vpop.xlane.xlu1 %1642 }
0x1224   :  { %v1646_v22 = vadd.f32 1e-05, %v1644_v19  ;;  %v1645_v23 = vmul.f32 0.03125, %v1643_v21 }
0x1226   :  { %5074 = vrsqrt.f32 %v1646_v22  ;;  %v1647_v24 = vadd.f32 1e-05, %v1645_v23 }
0x1228   :  { %5076 = vrsqrt.f32 %v1647_v24 }
0x1230   :  { %v5075_v25 = vpop.eup %5074 }
0x1231   :  { %v1650_v28 = vmul.f32 %v5075_v25, %v1634_v26  ;;  %v4445_v26 = vld [vmem:[#allocation25] ss:$0 sm:$0xff] }
0x1232   :  { %v5077_v29 = vpop.eup %5076 }
0x1233   :  { %v1658_v31 = vmul.f32 %v4431_v27, %v1650_v28  ;;  %v1651_v17 = vmul.f32 %v5077_v29, %v1635_v9  ;;  %v5022_v29 = vld [vmem:[#allocation13 + $0x10] sm:$0xff]  }
0x1235   :  { %v1659_v33 = vmul.f32 %v4431_v27, %v1651_v17  ;;  %v1666_v20 = vadd.f32 %v4432_v32, %v1658_v31  ;;  %v5023_v31 = vld [vmem:[#allocation13 + $0x18] sm:$0xff]  }
0x1237   :  { %v1667_v13 = vadd.f32 %v4432_v32, %v1659_v33 }
0x1239   :  { %v1672_v34 = vpack.c.bf16 %v1667_v13, %v1666_v20 }
0x123b   :  { %4754 = vmatmul.mubr.msk.bf16.vlgmr.msra.gmra.mrb[44].mxu1 %vm361_vm0, %v1672_v34 }
0x123c   :  { %4781 = vmatprep.mubr.msk.bf16.mxu1 %vm5587_vm1, %v5586_v43  ;;  %4778 = vmatpush3.bf16.msra.mxu1 %v5022_v29 }
0x123d   :  { %4779 = vmatprep.subr.bf16.mxu1 %v5586_v43 }
0x1240   :  { %4780 = vmatpush3.bf16.msra.mxu1 %v5023_v31 }
0x1241   :  { %4785 = vmatprep.subr.bf16.mxu1 %v5586_v43 }
0x130e   :  { %v1729_v42 = vpop.f32.mrb[44].mxu1 }
0x130f   :  { %v1730_v44 = vadd.f32 %v4433_v3, %v1729_v42  ;;  %v4755_v45 = vpop.f32.mrb[45].mxu1 }
0x1310   :  { %v1732_v46 = vpop.f32.mrb[46].mxu1  ;;  %v4448_v45 = vld [vmem:[#allocation14 + $0x1] ss:$0 sm:$0xff] }
0x1311   :  { %v1738_v47 = vmul.f32 0.044715, %v1730_v44  ;;  %v1733_v48 = vadd.f32 %v4433_v3, %v1732_v46  ;;  %v4756_v49 = vpop.f32.mrb[47].mxu1  ;;  %v1736_v62 = vmul.f32 0.5, %v1730_v44 }
0x1313   :  { %v1740_v50 = vmul.f32 %v1738_v47, %v1730_v44  ;;  %v1739_v51 = vmul.f32 0.044715, %v1733_v48  ;;  %v1737_v0 = vmul.f32 0.5, %v1733_v48 }
0x1315   :  { %v1742_v52 = vmul.f32 %v1740_v50, %v1730_v44  ;;  %v1741_v53 = vmul.f32 %v1739_v51, %v1733_v48 }
0x1317   :  { %v1744_v54 = vadd.f32 %v1742_v52, %v1730_v44  ;;  %v1743_v55 = vmul.f32 %v1741_v53, %v1733_v48 }
0x1319   :  { %v1746_v56 = vmul.f32 0.7978846, %v1744_v54  ;;  %v1745_v57 = vadd.f32 %v1743_v55, %v1733_v48 }
0x131b   :  { %5078 = vtanh.f32 %v1746_v56  ;;  %v1747_v58 = vmul.f32 0.7978846, %v1745_v57 }
0x131d   :  { %5080 = vtanh.f32 %v1747_v58 }
0x1325   :  { %v5079_v59 = vpop.eup %5078 }
0x1326   :  { %v1750_v60 = vadd.f32 1.0, %v5079_v59  ;;  %v6293_v59 = vld [vmem:[%s6657_s21] ss:$0 sm:$0xff] }
0x1327   :  { %v5081_v61 = vpop.eup %5080 }
0x1328   :  { %v1751_v2 = vadd.f32 1.0, %v5081_v61  ;;  %v1752_v4 = vmul.f32 %v1750_v60, %v1736_v62 }
0x132a   :  { %v1753_v5 = vmul.f32 %v1751_v2, %v1737_v0 }
0x132c   :  { %v1770_v7 = vpack.c.bf16 %v1753_v5, %v1752_v4  ;;  %v6300_v5 = vld [vmem:[%s6657_s21 + $0x1] ss:$0 sm:$0xff] }
0x132e   :  { %4774 = vmatmul.mubr.bf16.vlgmr.msra.gmra.mrb[40].mxu0 %v1770_v7 }
0x132f   :  { %4805 = vmatprep.mubr.msk.bf16.mxu0 %vm5587_vm1, %v5586_v43 }
0x1401   :  { %v1853_v11 = vpop.f32.mrb[40].mxu0 }
0x1402   :  { %v1860_v8 = vadd.f32 %v1853_v11, %v6199_v63  ;;  %v4775_v9 = vpop.f32.mrb[41].mxu0 }
0x1403   :  { %v1856_v10 = vpop.f32.mrb[42].mxu0 }
0x1404   :  { %v6252_v30 = vadd.f32 %v4445_v26, %v1860_v8  ;;  %v1861_v12 = vadd.f32 %v1856_v10, %v6202_v1  ;;  %v4776_v14 = vpop.f32.mrb[43].mxu0 }
0x1406   :  { %v6255_v15 = vadd.f32 %v4445_v26, %v1861_v12  ;;  %v1875_v16 = vsel %vm361_vm0, %v6252_v30, 0.0 }
0x1407   :  { %1876 = vadd.xlane.f32.xlu0 %v1875_v16 }
0x1408   :  { %v1878_v18 = vsel %vm361_vm0, %v6255_v15, 0.0 }
0x1409   :  { %1879 = vadd.xlane.f32.xlu1 %v1878_v18 }
0x1494   :  { %v1877_v19 = vpop.xlane.xlu0 %1876 }
0x1495   :  { %v1881_v21 = vmul.f32 0.03125, %v1877_v19 }
0x1496   :  { %v1880_v63 = vpop.xlane.xlu1 %1879 }
0x1497   :  { %v1883_v22 = vsub.f32 %v6252_v30, %v1881_v21  ;;  %v1882_v23 = vmul.f32 0.03125, %v1880_v63 }
0x1499   :  { %v1884_v24 = vsub.f32 %v6255_v15, %v1882_v23  ;;  %v1885_v1 = vmul.f32 %v1883_v22, %v1883_v22 }
0x149b   :  { %v1887_v25 = vsel %vm361_vm0, %v1885_v1, 0.0  ;;  %v1886_v27 = vmul.f32 %v1884_v24, %v1884_v24 }
0x149c   :  { %1888 = vadd.xlane.f32.xlu0 %v1887_v25 }
0x149d   :  { %v1890_v28 = vsel %vm361_vm0, %v1886_v27, 0.0 }
0x149e   :  { %1891 = vadd.xlane.f32.xlu1 %v1890_v28 }
0x1529   :  { %v1889_v17 = vpop.xlane.xlu0 %1888 }
0x152a   :  { %v1893_v32 = vmul.f32 0.03125, %v1889_v17 }
0x152b   :  { %v1892_v33 = vpop.xlane.xlu1 %1891 }
0x152c   :  { %v1895_v20 = vadd.f32 1e-05, %v1893_v32  ;;  %v1894_v13 = vmul.f32 0.03125, %v1892_v33 }
0x152e   :  { %5082 = vrsqrt.f32 %v1895_v20  ;;  %v1896_v34 = vadd.f32 1e-05, %v1894_v13 }
0x1530   :  { %5084 = vrsqrt.f32 %v1896_v34 }
0x1538   :  { %v5083_v35 = vpop.eup %5082 }
0x1539   :  { %v1899_v36 = vmul.f32 %v5083_v35, %v1883_v22 }
0x153a   :  { %v5085_v37 = vpop.eup %5084 }
0x153b   :  { %v1907_v38 = vmul.f32 %v4446_v6, %v1899_v36  ;;  %v1900_v39 = vmul.f32 %v5085_v37, %v1884_v24 }
0x153d   :  { %v1908_v41 = vmul.f32 %v4446_v6, %v1900_v39  ;;  %v1915_v3 = vadd.f32 %v4447_v40, %v1907_v38 }
0x153f   :  { %v1916_v42 = vadd.f32 %v4447_v40, %v1908_v41 }
0x1541   :  { %v1922_v44 = vpack.c.bf16 %v1916_v42, %v1915_v3 }
0x1543   :  { %4782 = vmatmul.mubr.msk.bf16.vlgmr.msra.gmra.mrb[48].mxu1 %vm361_vm0, %v1922_v44 }
0x1544   :  { %4787 = vmatprep.mubr.msk.bf16.mxu1 %vm5587_vm1, %v5586_v43 }
0x1616   :  { %v1980_v46 = vpop.f32.mrb[48].mxu1 }
0x1617   :  { %v1981_v47 = vadd.f32 %v4448_v45, %v1980_v46  ;;  %v4783_v48 = vpop.f32.mrb[49].mxu1 }
0x1618   :  { %v1983_v49 = vpop.f32.mrb[50].mxu1 }
0x1619   :  { %v6270_v50 = vpack.c.bf16 %v1981_v47, %v1981_v47  ;;  %v1984_v51 = vadd.f32 %v4448_v45, %v1983_v49  ;;  %v4784_v52 = vpop.f32.mrb[51].mxu1 }
0x161b   :  { %v6272_v53 = vpack.c.bf16 %v1984_v51, %v1984_v51  ;;  %1995 = vrot.lane.b32.xlu0 %v6270_v50, %s5588_s20 }
0x161d   :  { %2044 = vrot.lane.b32.xlu1 %v6272_v53, %s5588_s20 }
0x168d   :  { %v1996_v54 = vpop.permute.xlu0 %1995 }
0x168e   :  { %v2001_v55 = vsel %vm540_vm2, %v1996_v54, 0 }
0x168f   :  { %4786 = vmatpush3.bf16.xpose.msra.mxu1 %v2001_v55  ;;  %v2045_v56 = vpop.permute.xlu1 %2044 }
0x1690   :  { %4791 = vmatprep.subr.bf16.mxu1 %v5586_v43  ;;  %v2050_v57 = vsel %vm540_vm2, %v2045_v56, 0 }
0x1696   :  { %4788 = vmatmul.mubr.msk.bf16.vlgmr.msra.gmra.mrb[52].mxu1 %vm540_vm2, %v6270_v50 }
0x1697   :  { %4792 = vmatpush3.bf16.xpose.msra.mxu1 %v2050_v57  ;;  %4793 = vmatprep.mubr.msk.bf16.mxu1 %vm5587_vm1, %v5586_v43 }
0x1698   :  { %4797 = vmatprep.subr.bf16.mxu1 %v5586_v43 }
0x169e   :  { %4794 = vmatmul.mubr.msk.bf16.vlgmr.msra.gmra.mrb[56].mxu1 %vm540_vm2, %v6272_v53 }
0x169f   :  { %4799 = vmatprep.mubr.msk.bf16.mxu1 %vm5587_vm1, %v5586_v43 }
0x1769   :  { %v2037_v58 = vpop.f32.mrb[52].mxu1 }
0x176a   :  { %v2038_v60 = vadd.f32 %v6293_v59, %v2037_v58  ;;  %v4789_v61 = vpop.f32.mrb[53].mxu1 }
0x176b   :  { %v2040_v62 = vpop.f32.mrb[54].mxu1 }
0x176c   :  { %v4790_v0 = vpop.f32.mrb[55].mxu1  ;;  %v2092_v2 = vsel %vm540_vm2, %v2038_v60, -inf }
0x176d   :  { %2093 = vmax.xlane.f32.xlu1 %v2092_v2 }
0x1771   :  { %v2086_v4 = vpop.f32.mrb[56].mxu1 }
0x1772   :  { %v2087_v7 = vadd.f32 %v6300_v5, %v2086_v4  ;;  %v4795_v11 = vpop.f32.mrb[57].mxu1 }
0x1773   :  { %v2089_v26 = vpop.f32.mrb[58].mxu1 }
0x1774   :  { %v4796_v8 = vpop.f32.mrb[59].mxu1  ;;  %v2095_v9 = vsel %vm540_vm2, %v2087_v7, -inf }
0x1775   :  { %2096 = vmax.xlane.f32.xlu0 %v2095_v9 }
0x177e   :  { %2164 = vrot.lane.b32.xlu1 %v6272_v53, %s5565_s22 }
0x1782   :  { %2215 = vrot.lane.b32.xlu1 %v6270_v50, %s5589_s6 }
0x17fa   :  { %v2094_v10 = vpop.xlane.xlu1 %2093 }
0x17fb   :  { %v2098_v12 = vsub.f32 %v2038_v60, %v2094_v10 }
0x17fd   :  { %v2100_v14 = vmul.f32 1.442695, %v2098_v12 }
0x17fe   :  { %v2165_v16 = vpop.permute.xlu1 %2164 }
0x17ff   :  { %5086 = vpow2.f32 %v2100_v14  ;;  %v2170_v18 = vsel %vm665_vm3, %v2165_v16, 0 }
0x1800   :  { %4804 = vmatpush3.bf16.msra.mxu0 %v2170_v18 }
0x1801   :  { %4815 = vmatprep.subr.bf16.mxu0 %v5586_v43 }
0x1802   :  { %v2097_v19 = vpop.xlane.xlu0 %2096  ;;  %v2216_v27 = vpop.permute.xlu1 %2215 }
0x1803   :  { %v2099_v21 = vsub.f32 %v2087_v7, %v2097_v19  ;;  %v2221_v20 = vsel %vm540_vm2, %v2216_v27, 0 }
0x1805   :  { %v2102_v63 = vmul.f32 1.442695, %v2099_v21 }
0x1807   :  { %5088 = vpow2.f32 %v2102_v63 }
0x1809   :  { %v5087_v22 = vpop.eup %5086 }
0x180a   :  { %v2104_v23 = vsel %vm540_vm2, %v5087_v22, 0.0 }
0x180b   :  { %2105 = vadd.xlane.f32.xlu0 %v2104_v23 }
0x1811   :  { %v5089_v24 = vpop.eup %5088 }
0x1812   :  { %v2107_v1 = vsel %vm540_vm2, %v5089_v24, 0.0 }
0x1813   :  { %2108 = vadd.xlane.f32.xlu1 %v2107_v1 }
0x1821   :  { %2116 = vrot.lane.b32.xlu0 %v6270_v50, %s5565_s22 }
0x1824   :  { %2265 = vrot.lane.b32.xlu1 %v6272_v53, %s5589_s6 }
0x1825   :  { %2213 = vrot.lane.b32.xlu0 %v6270_v50, %s5590_s16 }
0x1828   :  { %2263 = vrot.lane.b32.xlu1 %v6272_v53, %s5590_s16 }
0x1898   :  { %v2106_v25 = vpop.xlane.xlu0 %2105 }
0x1899   :  { %5090 = vrcp.f32 %v2106_v25  ;;  %v1988_v25 = vld [vmem:[#allocation16 + $0x10] sm:$0xf] }
0x189c   :  { %v2117_v28 = vpop.permute.xlu0 %2116 }
0x189d   :  { %v2122_v29 = vsel %vm665_vm3, %v2117_v28, 0 }
0x189e   :  { %4798 = vmatpush3.bf16.msra.mxu1 %v2122_v29  ;;  %v2485_v29 = vsel %vm665_vm3, %v1988_v25, 0 }
0x189f   :  { %4809 = vmatprep.subr.bf16.mxu1 %v5586_v43 }
0x18a0   :  { %v2109_v31 = vpop.xlane.xlu1 %2108  ;;  %v2214_v36 = vpop.permute.xlu0 %2213 }
0x18a1   :  { %5092 = vrcp.f32 %v2109_v31 }
0x18a3   :  { %v5091_v17 = vpop.eup %5090 }
0x18a4   :  { %v2112_v32 = vmul.f32 %v5091_v17, %v5087_v22  ;;  %v2266_v35 = vpop.permute.xlu1 %2265 }
0x18a5   :  { %v2271_v37 = vsel %vm540_vm2, %v2266_v35, 0 }
0x18a6   :  { %v2114_v33 = vpack.c.bf16 %v2112_v32, %v2112_v32 }
0x18a8   :  { %4800 = vmatmul.mubr.msk.bf16.vlgmr.msra.gmra.mrb[60].mxu1 %vm540_vm2, %v2114_v33  ;;  %v2264_v38 = vpop.permute.xlu1 %2263 }
0x18a9   :  { %4810 = vmatpush3.bf16.xpose.msra.mxu1 %v2221_v20  ;;  %4811 = vmatprep.mubr.msk.bf16.mxu1 %vm5587_vm1, %v5586_v43  ;;  %v1989_v20 = vld [vmem:[#allocation16 + $0x14] sm:$0xf] }
0x18aa   :  { %4821 = vmatprep.subr.bf16.mxu1 %v5586_v43 }
0x18ab   :  { %v5093_v13 = vpop.eup %5092 }
0x18ac   :  { %v2113_v34 = vmul.f32 %v5093_v13, %v5089_v24  ;;  %v2438_v13 = vsel %vm665_vm3, %v1989_v20, 0 }
0x18ae   :  { %v2115_v6 = vpack.c.bf16 %v2113_v34, %v2113_v34 }
0x18b0   :  { %4806 = vmatmul.mubr.msk.bf16.vlgmr.msra.gmra.mrb[44].mxu0 %vm540_vm2, %v2115_v6  ;;  %4812 = vmatmul.mubr.msk.bf16.vlgmr.msra.gmra.mrb[64].mxu1 %vm540_vm2, %v2214_v36 }
0x18b1   :  { %4816 = vmatpush3.bf16.xpose.msra.mxu0 %v2271_v37  ;;  %4817 = vmatprep.mubr.msk.bf16.mxu0 %vm5587_vm1, %v5586_v43 }
0x18b2   :  { %4827 = vmatprep.subr.bf16.mxu0 %v5586_v43  ;;  %4823 = vmatprep.mubr.msk.bf16.mxu1 %vm5587_vm1, %v5586_v43 }
0x18b8   :  { %4818 = vmatmul.mubr.msk.bf16.vlgmr.msra.gmra.mrb[48].mxu0 %vm540_vm2, %v2264_v38 }
0x18b9   :  { %4829 = vmatprep.mubr.msk.bf16.mxu0 %vm5587_vm1, %v5586_v43 }
0x197b   :  { %v6338_v39 = vpop.f32.mrb[60].mxu1 }
0x197c   :  { %v4801_v40 = vpop.f32.mrb[61].mxu1 }
0x197d   :  { %v2161_v41 = vpop.f32.mrb[62].mxu1 }
0x197e   :  { %v4802_v3 = vpop.f32.mrb[63].mxu1 }
0x1983   :  { %v6340_v42 = vpop.f32.mrb[44].mxu0  ;;  %v2257_v44 = vpop.f32.mrb[64].mxu1 }
0x1984   :  { %v2212_v45 = vpack.c.bf16 %v6340_v42, %v6338_v39  ;;  %v2258_v46 = vadd.f32 %v6293_v59, %v2257_v44  ;;  %v4807_v47 = vpop.f32.mrb[45].mxu0  ;;  %v4813_v48 = vpop.f32.mrb[65].mxu1 }
0x1985   :  { %v2209_v49 = vpop.f32.mrb[46].mxu0  ;;  %v2260_v51 = vpop.f32.mrb[66].mxu1 }
0x1986   :  { %v4808_v52 = vpop.f32.mrb[47].mxu0  ;;  %v4814_v54 = vpop.f32.mrb[67].mxu1  ;;  %v2313_v55 = vsel %vm540_vm2, %v2258_v46, -inf }
0x1987   :  { %2314 = vmax.xlane.f32.xlu0 %v2313_v55 }
0x198b   :  { %v2307_v56 = vpop.f32.mrb[48].mxu0 }
0x198c   :  { %v2308_v57 = vadd.f32 %v6300_v5, %v2307_v56  ;;  %v4819_v58 = vpop.f32.mrb[49].mxu0 }
0x198d   :  { %v2310_v60 = vpop.f32.mrb[50].mxu0 }
0x198e   :  { %v4820_v61 = vpop.f32.mrb[51].mxu0  ;;  %v2316_v62 = vsel %vm540_vm2, %v2308_v57, -inf }
0x198f   :  { %2317 = vmax.xlane.f32.xlu1 %v2316_v62 }
0x19a0   :  { %2385 = vrot.lane.b32.xlu1 %v6272_v53, %s5591_s30 }
0x19a4   :  { %2530 = vrot.lane.b32.xlu1 %v6270_v50, %s5592_s1 }
0x19a8   :  { %2580 = vrot.lane.b32.xlu1 %v6272_v53, %s5592_s1 }
0x19ac   :  { %2578 = vrot.lane.b32.xlu1 %v6272_v53, %s5593_s10 }
0x1a14   :  { %v2315_v0 = vpop.xlane.xlu0 %2314 }
0x1a15   :  { %v2319_v2 = vsub.f32 %v2258_v46, %v2315_v0 }
0x1a17   :  { %v2321_v4 = vmul.f32 1.442695, %v2319_v2 }
0x1a19   :  { %5094 = vpow2.f32 %v2321_v4 }
0x1a1c   :  { %v2318_v7 = vpop.xlane.xlu1 %2317 }
0x1a1d   :  { %v2320_v11 = vsub.f32 %v2308_v57, %v2318_v7 }
0x1a1f   :  { %v2323_v26 = vmul.f32 1.442695, %v2320_v11 }
0x1a20   :  { %v2386_v8 = vpop.permute.xlu1 %2385 }
0x1a21   :  { %5096 = vpow2.f32 %v2323_v26  ;;  %v2391_v9 = vsel %vm665_vm3, %v2386_v8, 0 }
0x1a22   :  { %4828 = vmatpush3.bf16.msra.mxu0 %v2391_v9 }
0x1a23   :  { %v5095_v10 = vpop.eup %5094  ;;  %4839 = vmatprep.subr.bf16.mxu0 %v5586_v43 }
0x1a24   :  { %v2325_v12 = vsel %vm540_vm2, %v5095_v10, 0.0  ;;  %v2531_v31 = vpop.permute.xlu1 %2530 }
0x1a25   :  { %2326 = vadd.xlane.f32.xlu0 %v2325_v12  ;;  %v2536_v41 = vsel %vm540_vm2, %v2531_v31, 0 }
0x1a28   :  { %v2581_v17 = vpop.permute.xlu1 %2580 }
0x1a29   :  { %v2586_v32 = vsel %vm540_vm2, %v2581_v17, 0 }
0x1a2b   :  { %v5097_v14 = vpop.eup %5096 }
0x1a2c   :  { %v2328_v16 = vsel %vm540_vm2, %v5097_v14, 0.0  ;;  %v2579_v33 = vpop.permute.xlu1 %2578 }
0x1a2d   :  { %2329 = vadd.xlane.f32.xlu0 %v2328_v16 }
0x1a43   :  { %2337 = vrot.lane.b32.xlu0 %v6270_v50, %s5591_s30 }
0x1a47   :  { %2528 = vrot.lane.b32.xlu0 %v6270_v50, %s5593_s10 }
0x1ab2   :  { %v2327_v18 = vpop.xlane.xlu0 %2326 }
0x1ab3   :  { %5098 = vrcp.f32 %v2327_v18 }
0x1aba   :  { %v2330_v19 = vpop.xlane.xlu0 %2329 }
0x1abb   :  { %5100 = vrcp.f32 %v2330_v19 }
0x1abd   :  { %v5099_v21 = vpop.eup %5098 }
0x1abe   :  { %v2333_v63 = vmul.f32 %v5099_v21, %v5095_v10  ;;  %v2338_v22 = vpop.permute.xlu0 %2337 }
0x1abf   :  { %v2343_v23 = vsel %vm665_vm3, %v2338_v22, 0 }
0x1ac0   :  { %4822 = vmatpush3.bf16.msra.mxu1 %v2343_v23  ;;  %v2335_v24 = vpack.c.bf16 %v2333_v63, %v2333_v63 }
0x1ac1   :  { %4833 = vmatprep.subr.bf16.mxu1 %v5586_v43 }
0x1ac3   :  { %4824 = vmatmul.mubr.msk.bf16.vlgmr.msra.gmra.mrb[68].mxu1 %vm540_vm2, %v2335_v24 }
0x1ac4   :  { %4835 = vmatprep.mubr.msk.bf16.mxu1 %vm5587_vm1, %v5586_v43  ;;  %4834 = vmatpush3.bf16.msra.mxu1 %v2438_v13 }
0x1ac5   :  { %v5101_v1 = vpop.eup %5100  ;;  %4845 = vmatprep.subr.bf16.mxu1 %v5586_v43 }
0x1ac6   :  { %v2334_v27 = vmul.f32 %v5101_v1, %v5097_v14 }
0x1ac8   :  { %v2336_v28 = vpack.c.bf16 %v2334_v27, %v2334_v27 }
0x1aca   :  { %4830 = vmatmul.mubr.msk.bf16.vlgmr.msra.gmra.mrb[52].mxu0 %vm540_vm2, %v2336_v28 }
0x1acb   :  { %4840 = vmatpush3.bf16.msra.mxu0 %v2485_v29  ;;  %4841 = vmatprep.mubr.msk.bf16.mxu0 %vm5587_vm1, %v5586_v43 }
0x1acc   :  { %4851 = vmatprep.subr.bf16.mxu0 %v5586_v43 }
0x1ad2   :  { %4842 = vmatmul.mubr.msk.bf16.vlgmr.msra.gmra.mrb[56].mxu0 %vm540_vm2, %v2212_v45  ;;  %v2529_v45 = vpop.permute.xlu0 %2528 }
0x1ad3   :  { %4853 = vmatprep.mubr.msk.bf16.mxu0 %vm5587_vm1, %v5586_v43 }
0x1ad4   :  { %4852 = vmatpush3.bf16.xpose.msra.mxu0 %v2586_v32 }
0x1ad5   :  { %4863 = vmatprep.subr.bf16.mxu0 %v5586_v43 }
0x1adb   :  { %4854 = vmatmul.mubr.msk.bf16.vlgmr.msra.gmra.mrb[60].mxu0 %vm540_vm2, %v2579_v33 }
0x1adc   :  { %4865 = vmatprep.mubr.msk.bf16.mxu0 %vm5587_vm1, %v5586_v43 }
0x1b96   :  { %v2379_v34 = vpop.f32.mrb[68].mxu1 }
0x1b97   :  { %v4825_v35 = vpop.f32.mrb[69].mxu1 }
0x1b98   :  { %v2382_v6 = vpop.f32.mrb[70].mxu1 }
0x1b99   :  { %v4826_v36 = vpop.f32.mrb[71].mxu1 }
0x1b9d   :  { %v2427_v37 = vpop.f32.mrb[52].mxu0 }
0x1b9e   :  { %v2433_v38 = vpack.c.bf16 %v2427_v37, %v2379_v34  ;;  %v4831_v39 = vpop.f32.mrb[53].mxu0 }
0x1b9f   :  { %v2430_v40 = vpop.f32.mrb[54].mxu0 }
0x1ba0   :  { %v4832_v3 = vpop.f32.mrb[55].mxu0  ;;  %4836 = vmatmul.mubr.msk.bf16.vlgmr.msra.gmra.mrb[72].mxu1 %vm540_vm2, %v2433_v38  ;;  %v1990_v38 = vld [vmem:[#allocation16 + $0x18] sm:$0xf] }
0x1ba1   :  { %4846 = vmatpush3.bf16.xpose.msra.mxu1 %v2536_v41  ;;  %4847 = vmatprep.mubr.msk.bf16.mxu1 %vm5587_vm1, %v5586_v43  ;;  %v2753_v39 = vsel %vm665_vm3, %v1990_v38, 0 }
0x1ba2   :  { %4857 = vmatprep.subr.bf16.mxu1 %v5586_v43 }
0x1ba5   :  { %v2521_v42 = vpop.f32.mrb[56].mxu0 }
0x1ba6   :  { %v4843_v44 = vpop.f32.mrb[57].mxu0 }
0x1ba7   :  { %v2524_v46 = vpop.f32.mrb[58].mxu0 }
0x1ba8   :  { %v4844_v47 = vpop.f32.mrb[59].mxu0  ;;  %4848 = vmatmul.mubr.msk.bf16.vlgmr.msra.gmra.mrb[76].mxu1 %vm540_vm2, %v2529_v45 }
0x1ba9   :  { %4859 = vmatprep.mubr.msk.bf16.mxu1 %vm5587_vm1, %v5586_v43 }
0x1bae   :  { %v2622_v48 = vpop.f32.mrb[60].mxu0 }
0x1baf   :  { %v2623_v49 = vadd.f32 %v6300_v5, %v2622_v48  ;;  %v4855_v51 = vpop.f32.mrb[61].mxu0 }
0x1bb0   :  { %v2625_v52 = vpop.f32.mrb[62].mxu0 }
0x1bb1   :  { %v4856_v54 = vpop.f32.mrb[63].mxu0  ;;  %v2631_v55 = vsel %vm540_vm2, %v2623_v49, -inf }
0x1bb2   :  { %2632 = vmax.xlane.f32.xlu1 %v2631_v55 }
0x1bc3   :  { %2700 = vrot.lane.b32.xlu1 %v6272_v53, %s5594_s11 }
0x1bc7   :  { %2800 = vrot.lane.b32.xlu1 %v6270_v50, %s5595_s28 }
0x1bcb   :  { %2850 = vrot.lane.b32.xlu1 %v6272_v53, %s5595_s28 }
0x1bcf   :  { %2848 = vrot.lane.b32.xlu1 %v6272_v53, %s5596_s13 }
0x1c3f   :  { %v2633_v56 = vpop.xlane.xlu1 %2632 }
0x1c40   :  { %v2635_v60 = vsub.f32 %v2623_v49, %v2633_v56 }
0x1c42   :  { %v2638_v61 = vmul.f32 1.442695, %v2635_v60 }
0x1c43   :  { %v2701_v57 = vpop.permute.xlu1 %2700 }
0x1c44   :  { %v2706_v58 = vsel %vm665_vm3, %v2701_v57, 0  ;;  %5102 = vpow2.f32 %v2638_v61 }
0x1c45   :  { %4864 = vmatpush3.bf16.msra.mxu0 %v2706_v58 }
0x1c46   :  { %4875 = vmatprep.subr.bf16.mxu0 %v5586_v43 }
0x1c47   :  { %v2801_v27 = vpop.permute.xlu1 %2800 }
0x1c48   :  { %v2806_v29 = vsel %vm540_vm2, %v2801_v27, 0 }
0x1c4e   :  { %v5103_v16 = vpop.eup %5102 }
0x1c4f   :  { %v2643_v18 = vsel %vm540_vm2, %v5103_v16, 0.0 }
0x1c73   :  { %v2474_v62 = vpop.f32.mrb[72].mxu1 }
0x1c74   :  { %v6407_v0 = vadd.f32 %v2521_v42, %v2474_v62  ;;  %v4837_v2 = vpop.f32.mrb[73].mxu1 }
0x1c75   :  { %v2477_v4 = vpop.f32.mrb[74].mxu1 }
0x1c76   :  { %v6409_v7 = vadd.f32 %v2524_v46, %v2477_v4  ;;  %v4838_v11 = vpop.f32.mrb[75].mxu1  ;;  %v2851_v46 = vpop.permute.xlu1 %2850 }
0x1c77   :  { %v2856_v52 = vsel %vm540_vm2, %v2851_v46, 0 }
0x1c7b   :  { %v2572_v26 = vpop.f32.mrb[76].mxu1 }
0x1c7c   :  { %v2573_v8 = vadd.f32 %v6293_v59, %v2572_v26  ;;  %v4849_v9 = vpop.f32.mrb[77].mxu1 }
0x1c7d   :  { %v2575_v10 = vpop.f32.mrb[78].mxu1 }
0x1c7e   :  { %v4850_v12 = vpop.f32.mrb[79].mxu1  ;;  %v2628_v14 = vsel %vm540_vm2, %v2573_v8, -inf }
0x1c7f   :  { %2629 = vmax.xlane.f32.xlu0 %v2628_v14 }
0x1c83   :  { %2644 = vadd.xlane.f32.xlu0 %v2643_v18 }
0x1d0c   :  { %v2630_v19 = vpop.xlane.xlu0 %2629 }
0x1d0d   :  { %v2634_v21 = vsub.f32 %v2573_v8, %v2630_v19 }
0x1d0f   :  { %v2636_v63 = vmul.f32 1.442695, %v2634_v21 }
0x1d10   :  { %v2645_v22 = vpop.xlane.xlu0 %2644 }
0x1d11   :  { %5104 = vpow2.f32 %v2636_v63 }
0x1d12   :  { %5106 = vrcp.f32 %v2645_v22 }
0x1d1b   :  { %v5105_v23 = vpop.eup %5104 }
0x1d1c   :  { %v5107_v24 = vpop.eup %5106  ;;  %v2640_v1 = vsel %vm540_vm2, %v5105_v23, 0.0 }
0x1d1d   :  { %v2649_v25 = vmul.f32 %v5107_v24, %v5103_v16  ;;  %2641 = vadd.xlane.f32.xlu0 %v2640_v1 }
0x1d1f   :  { %v2651_v28 = vpack.c.bf16 %v2649_v25, %v2649_v25 }
0x1d21   :  { %4866 = vmatmul.mubr.msk.bf16.vlgmr.msra.gmra.mrb[64].mxu0 %vm540_vm2, %v2651_v28 }
0x1d22   :  { %4876 = vmatpush3.bf16.xpose.msra.mxu0 %v2806_v29  ;;  %4877 = vmatprep.mubr.msk.bf16.mxu0 %vm5587_vm1, %v5586_v43 }
0x1d23   :  { %4887 = vmatprep.subr.bf16.mxu0 %v5586_v43 }
0x1d33   :  { %2652 = vrot.lane.b32.xlu0 %v6270_v50, %s5594_s11 }
0x1d37   :  { %2798 = vrot.lane.b32.xlu0 %v6270_v50, %s5596_s13 }
0x1daa   :  { %v2642_v31 = vpop.xlane.xlu0 %2641 }
0x1dab   :  { %5108 = vrcp.f32 %v2642_v31  ;;  %v1991_v31 = vld [vmem:[#allocation16 + $0x1c] sm:$0xf] }
0x1dae   :  { %v2653_v17 = vpop.permute.xlu0 %2652 }
0x1daf   :  { %v2658_v32 = vsel %vm665_vm3, %v2653_v17, 0  ;;  %v3023_v17 = vsel %vm665_vm3, %v1991_v31, 0 }
0x1db0   :  { %4858 = vmatpush3.bf16.msra.mxu1 %v2658_v32 }
0x1db1   :  { %4869 = vmatprep.subr.bf16.mxu1 %v5586_v43 }
0x1db2   :  { %v2799_v33 = vpop.permute.xlu0 %2798 }
0x1db3   :  { %4878 = vmatmul.mubr.msk.bf16.vlgmr.msra.gmra.mrb[68].mxu0 %vm540_vm2, %v2799_v33 }
0x1db4   :  { %4889 = vmatprep.mubr.msk.bf16.mxu0 %vm5587_vm1, %v5586_v43 }
0x1db5   :  { %v5109_v20 = vpop.eup %5108 }
0x1db6   :  { %v2648_v13 = vmul.f32 %v5109_v20, %v5105_v23 }
0x1db8   :  { %v2650_v34 = vpack.c.bf16 %v2648_v13, %v2648_v13 }
0x1dba   :  { %4860 = vmatmul.mubr.msk.bf16.vlgmr.msra.gmra.mrb[80].mxu1 %vm540_vm2, %v2650_v34 }
0x1dbb   :  { %4871 = vmatprep.mubr.msk.bf16.mxu1 %vm5587_vm1, %v5586_v43  ;;  %4870 = vmatpush3.bf16.msra.mxu1 %v2753_v39 }
0x1dbc   :  { %4881 = vmatprep.subr.bf16.mxu1 %v5586_v43 }
0x1df4   :  { %v2742_v35 = vpop.f32.mrb[64].mxu0 }
0x1df5   :  { %v4867_v6 = vpop.f32.mrb[65].mxu0 }
0x1df6   :  { %v2745_v36 = vpop.f32.mrb[66].mxu0 }
0x1df7   :  { %v4868_v37 = vpop.f32.mrb[67].mxu0 }
0x1e86   :  { %v2842_v40 = vpop.f32.mrb[68].mxu0 }
0x1e87   :  { %v2843_v41 = vadd.f32 %v6293_v59, %v2842_v40  ;;  %v4879_v3 = vpop.f32.mrb[69].mxu0  ;;  %v2849_v59 = vpop.permute.xlu1 %2848 }
0x1e88   :  { %v2845_v42 = vpop.f32.mrb[70].mxu0 }
0x1e89   :  { %v4880_v44 = vpop.f32.mrb[71].mxu0  ;;  %v2898_v45 = vsel %vm540_vm2, %v2843_v41, -inf }
0x1e8a   :  { %2899 = vmax.xlane.f32.xlu0 %v2898_v45 }
0x1e8d   :  { %v2694_v47 = vpop.f32.mrb[80].mxu1 }
0x1e8e   :  { %v2748_v48 = vpack.c.bf16 %v2742_v35, %v2694_v47  ;;  %v4861_v49 = vpop.f32.mrb[81].mxu1 }
0x1e8f   :  { %v2697_v51 = vpop.f32.mrb[82].mxu1 }
0x1e90   :  { %v4862_v54 = vpop.f32.mrb[83].mxu1  ;;  %4872 = vmatmul.mubr.msk.bf16.vlgmr.msra.gmra.mrb[84].mxu1 %vm540_vm2, %v2748_v48 }
0x1e91   :  { %4882 = vmatpush3.bf16.xpose.msra.mxu1 %v2856_v52  ;;  %4883 = vmatprep.mubr.msk.bf16.mxu1 %vm5587_vm1, %v5586_v43 }
0x1e92   :  { %4893 = vmatprep.subr.bf16.mxu1 %v5586_v43 }
0x1e98   :  { %4884 = vmatmul.mubr.msk.bf16.vlgmr.msra.gmra.mrb[88].mxu1 %vm540_vm2, %v2849_v59 }
0x1e99   :  { %4895 = vmatprep.mubr.msk.bf16.mxu1 %vm5587_vm1, %v5586_v43 }
0x1f17   :  { %v2900_v55 = vpop.xlane.xlu0 %2899 }
0x1f18   :  { %v2904_v56 = vsub.f32 %v2843_v41, %v2900_v55  ;;  %v4472_v41 = vld [vmem:[#allocation17 + $0x1] ss:$0 sm:$0xff] }
0x1f1a   :  { %v2906_v57 = vmul.f32 1.442695, %v2904_v56 }
0x1f1c   :  { %5110 = vpow2.f32 %v2906_v57 }
0x1f26   :  { %v5111_v58 = vpop.eup %5110 }
0x1f27   :  { %v2910_v60 = vsel %vm540_vm2, %v5111_v58, 0.0 }
0x1f28   :  { %2911 = vadd.xlane.f32.xlu0 %v2910_v60 }
0x1f63   :  { %v2789_v61 = vpop.f32.mrb[84].mxu1 }
0x1f64   :  { %v2796_v62 = vadd.f32 %v2789_v61, %v6407_v0  ;;  %v4873_v2 = vpop.f32.mrb[85].mxu1  ;;  %v5024_v61 = vld [vmem:[#allocation22 + $0x10] sm:$0xff]  }
0x1f65   :  { %v2792_v4 = vpop.f32.mrb[86].mxu1 }
0x1f66   :  { %v2797_v11 = vadd.f32 %v2792_v4, %v6409_v7  ;;  %v4874_v26 = vpop.f32.mrb[87].mxu1 }
0x1f6b   :  { %v2892_v8 = vpop.f32.mrb[88].mxu1 }
0x1f6c   :  { %v2893_v9 = vadd.f32 %v6300_v5, %v2892_v8  ;;  %v4885_v10 = vpop.f32.mrb[89].mxu1 }
0x1f6d   :  { %v2895_v12 = vpop.f32.mrb[90].mxu1 }
0x1f6e   :  { %v4886_v14 = vpop.f32.mrb[91].mxu1  ;;  %v2901_v16 = vsel %vm540_vm2, %v2893_v9, -inf  ;;  %v4473_v12 = vld [vmem:[#allocation19 + $0x1] ss:$0 sm:$0xff] }
0x1f6f   :  { %2902 = vmax.xlane.f32.xlu1 %v2901_v16 }
0x1f80   :  { %2970 = vrot.lane.b32.xlu1 %v6272_v53, %s5597_s15 }
0x1fb5   :  { %v2912_v22 = vpop.xlane.xlu0 %2911 }
0x1ffc   :  { %v2903_v18 = vpop.xlane.xlu1 %2902 }
0x1ffd   :  { %v2905_v19 = vsub.f32 %v2893_v9, %v2903_v18 }
0x1fff   :  { %v2908_v0 = vmul.f32 1.442695, %v2905_v19 }
0x2000   :  { %v2971_v21 = vpop.permute.xlu1 %2970 }
0x2001   :  { %5112 = vpow2.f32 %v2908_v0  ;;  %v2976_v7 = vsel %vm665_vm3, %v2971_v21, 0  ;;  %v4474_v0 = vld [vmem:[#allocation20 + $0x1] ss:$0 sm:$0xff] }
0x2002   :  { %4894 = vmatpush3.bf16.msra.mxu1 %v2976_v7  ;;  %5114 = vrcp.f32 %v2912_v22  ;;  %v5026_v22 = vld [vmem:[%s6626_s14 + $0x40] sm:$0xff]  }
0x2003   :  { %4905 = vmatprep.subr.bf16.mxu1 %v5586_v43 }
0x200b   :  { %v5113_v5 = vpop.eup %5112 }
0x200c   :  { %v2913_v63 = vsel %vm540_vm2, %v5113_v5, 0.0  ;;  %v5115_v53 = vpop.eup %5114 }
0x200d   :  { %2914 = vadd.xlane.f32.xlu0 %v2913_v63  ;;  %v2918_v24 = vmul.f32 %v5115_v53, %v5111_v58  ;;  %v5027_v53 = vld [vmem:[%s6626_s14 + $0x48] sm:$0xff]  }
0x200f   :  { %v2920_v27 = vpack.c.bf16 %v2918_v24, %v2918_v24  ;;  %v5029_v24 = vld [vmem:[%s6626_s14 + $0x58] sm:$0xff]  }
0x2023   :  { %2922 = vrot.lane.b32.xlu0 %v6270_v50, %s5597_s15 }
0x209a   :  { %v2915_v23 = vpop.xlane.xlu0 %2914 }
0x209b   :  { %5116 = vrcp.f32 %v2915_v23  ;;  %v5028_v23 = vld [vmem:[%s6626_s14 + $0x50] sm:$0xff]  }
0x209e   :  { %v2923_v1 = vpop.permute.xlu0 %2922 }
0x209f   :  { %v2928_v25 = vsel %vm665_vm3, %v2923_v1, 0  ;;  %v5030_v1 = vld [vmem:[%s6626_s14 + $0x60] sm:$0xff]  }
0x20a0   :  { %4888 = vmatpush3.bf16.msra.mxu0 %v2928_v25  ;;  %v5031_v25 = vld [vmem:[%s6626_s14 + $0x68] sm:$0xff]  }
0x20a1   :  { %4899 = vmatprep.subr.bf16.mxu0 %v5586_v43 }
0x20a3   :  { %4890 = vmatmul.mubr.msk.bf16.vlgmr.msra.gmra.mrb[72].mxu0 %vm540_vm2, %v2920_v27  ;;  %v5032_v27 = vld [vmem:[%s6626_s14 + $0x70] sm:$0xff]  }
0x20a4   :  { %4901 = vmatprep.mubr.msk.bf16.mxu0 %vm5587_vm1, %v5586_v43  ;;  %4900 = vmatpush3.bf16.msra.mxu0 %v3023_v17 }
0x20a5   :  { %v5117_v28 = vpop.eup %5116  ;;  %4913 = vmatprep.subr.bf16.mxu0 %v5586_v43 }
0x20a6   :  { %v2919_v50 = vmul.f32 %v5117_v28, %v5113_v5  ;;  %v5033_v28 = vld [vmem:[%s6626_s14 + $0x78] sm:$0xff]  }
0x20a8   :  { %v2921_v29 = vpack.c.bf16 %v2919_v50, %v2919_v50  ;;  %v4475_v50 = vld [vmem:[#allocation23 + $0x1] ss:$0 sm:$0xff] }
0x20aa   :  { %4896 = vmatmul.mubr.msk.bf16.vlgmr.msra.gmra.mrb[92].mxu1 %vm540_vm2, %v2921_v29 }
0x20ab   :  { %4909 = vmatprep.mubr.msk.bf16.mxu1 %vm5587_vm1, %v5586_v43  ;;  %4906 = vmatpush3.bf16.msra.mxu1 %v5024_v61 }
0x20ac   :  { %4907 = vmatprep.subr.bf16.mxu1 %v5586_v43 }
0x2176   :  { %v2964_v32 = vpop.f32.mrb[72].mxu0 }
0x2177   :  { %v4891_v33 = vpop.f32.mrb[73].mxu0 }
0x2178   :  { %v2967_v20 = vpop.f32.mrb[74].mxu0 }
0x2179   :  { %v4892_v13 = vpop.f32.mrb[75].mxu0 }
0x217d   :  { %v3012_v34 = vpop.f32.mrb[92].mxu1 }
0x217e   :  { %v3018_v35 = vpack.c.bf16 %v3012_v34, %v2964_v32  ;;  %v4897_v6 = vpop.f32.mrb[93].mxu1 }
0x217f   :  { %v3015_v36 = vpop.f32.mrb[94].mxu1 }
0x2180   :  { %v4898_v37 = vpop.f32.mrb[95].mxu1  ;;  %4902 = vmatmul.mubr.msk.bf16.vlgmr.msra.gmra.mrb[76].mxu0 %vm540_vm2, %v3018_v35 }
0x2181   :  { %4929 = vmatprep.mubr.msk.bf16.mxu0 %vm5587_vm1, %v5586_v43  ;;  %4914 = vmatpush3.bf16.msra.mxu0 %v5026_v22 }
0x2182   :  { %4915 = vmatprep.subr.bf16.mxu0 %v5586_v43 }
0x2185   :  { %4916 = vmatpush3.bf16.msra.mxu0 %v5027_v53  ;;  %v4505_v53 = vld [vmem:[#allocation28] ss:$0 sm:$0xff] }
0x2186   :  { %4917 = vmatprep.subr.bf16.mxu0 %v5586_v43 }
0x2189   :  { %4918 = vmatpush3.bf16.msra.mxu0 %v5028_v23 }
0x218a   :  { %4919 = vmatprep.subr.bf16.mxu0 %v5586_v43 }
0x218d   :  { %4920 = vmatpush3.bf16.msra.mxu0 %v5029_v24 }
0x218e   :  { %4921 = vmatprep.subr.bf16.mxu0 %v5586_v43 }
0x2191   :  { %4922 = vmatpush3.bf16.msra.mxu0 %v5030_v1 }
0x2192   :  { %4923 = vmatprep.subr.bf16.mxu0 %v5586_v43 }
0x2195   :  { %4924 = vmatpush3.bf16.msra.mxu0 %v5031_v25 }
0x2196   :  { %4925 = vmatprep.subr.bf16.mxu0 %v5586_v43 }
0x2199   :  { %4926 = vmatpush3.bf16.msra.mxu0 %v5032_v27 }
0x219a   :  { %4927 = vmatprep.subr.bf16.mxu0 %v5586_v43 }
0x219d   :  { %4928 = vmatpush3.bf16.msra.mxu0 %v5033_v28 }
0x2253   :  { %v3059_v38 = vpop.f32.mrb[76].mxu0 }
0x2254   :  { %v3066_v39 = vadd.f32 %v3059_v38, %v2796_v62  ;;  %v4903_v40 = vpop.f32.mrb[77].mxu0  ;;  %v5025_v62 = vld [vmem:[#allocation22 + $0x18] sm:$0xff]  }
0x2255   :  { %v3062_v3 = vpop.f32.mrb[78].mxu0  ;;  %4908 = vmatpush3.bf16.msra.mxu1 %v5025_v62 }
0x2256   :  { %v3068_v42 = vadd.f32 %v3066_v39, %v6252_v30  ;;  %v3067_v44 = vadd.f32 %v3062_v3, %v2797_v11  ;;  %v4904_v45 = vpop.f32.mrb[79].mxu0 }
0x2258   :  { %v6470_v46 = vadd.f32 %v4472_v41, %v3068_v42  ;;  %v3069_v47 = vadd.f32 %v3067_v44, %v6255_v15 }
0x225a   :  { %v6473_v48 = vadd.f32 %v4472_v41, %v3069_v47  ;;  %v3084_v49 = vsel %vm361_vm0, %v6470_v46, 0.0 }
0x225b   :  { %3085 = vadd.xlane.f32.xlu1 %v3084_v49 }
0x225c   :  { %v3087_v51 = vsel %vm361_vm0, %v6473_v48, 0.0 }
0x225d   :  { %3088 = vadd.xlane.f32.xlu0 %v3087_v51 }
0x22e8   :  { %v3086_v52 = vpop.xlane.xlu1 %3085 }
0x22e9   :  { %v3090_v54 = vmul.f32 0.03125, %v3086_v52 }
0x22ea   :  { %v3089_v59 = vpop.xlane.xlu0 %3088 }
0x22eb   :  { %v3092_v30 = vsub.f32 %v6470_v46, %v3090_v54  ;;  %v3091_v55 = vmul.f32 0.03125, %v3089_v59  ;;  %v4503_v59 = vld [vmem:[#allocation25 + $0x1] ss:$0 sm:$0xff] }
0x22ed   :  { %v3093_v56 = vsub.f32 %v6473_v48, %v3091_v55  ;;  %v3094_v57 = vmul.f32 %v3092_v30, %v3092_v30 }
0x22ef   :  { %v3096_v15 = vsel %vm361_vm0, %v3094_v57, 0.0  ;;  %v3095_v58 = vmul.f32 %v3093_v56, %v3093_v56 }
0x22f0   :  { %3097 = vadd.xlane.f32.xlu0 %v3096_v15 }
0x22f1   :  { %v3099_v60 = vsel %vm361_vm0, %v3095_v58, 0.0 }
0x22f2   :  { %3100 = vadd.xlane.f32.xlu1 %v3099_v60 }
0x237d   :  { %v3098_v2 = vpop.xlane.xlu0 %3097 }
0x237e   :  { %v3102_v4 = vmul.f32 0.03125, %v3098_v2 }
0x237f   :  { %v3101_v11 = vpop.xlane.xlu1 %3100 }
0x2380   :  { %v3104_v26 = vadd.f32 1e-05, %v3102_v4  ;;  %v3103_v8 = vmul.f32 0.03125, %v3101_v11 }
0x2382   :  { %5118 = vrsqrt.f32 %v3104_v26  ;;  %v3105_v9 = vadd.f32 1e-05, %v3103_v8 }
0x2384   :  { %5120 = vrsqrt.f32 %v3105_v9 }
0x238c   :  { %v5119_v10 = vpop.eup %5118 }
0x238d   :  { %v3108_v14 = vmul.f32 %v5119_v10, %v3092_v30 }
0x238e   :  { %v5121_v16 = vpop.eup %5120 }
0x238f   :  { %v3116_v18 = vmul.f32 %v4473_v12, %v3108_v14  ;;  %v3109_v19 = vmul.f32 %v5121_v16, %v3093_v56 }
0x2391   :  { %v3117_v21 = vmul.f32 %v4473_v12, %v3109_v19  ;;  %v3124_v7 = vadd.f32 %v4474_v0, %v3116_v18 }
0x2393   :  { %v3125_v5 = vadd.f32 %v4474_v0, %v3117_v21 }
0x2395   :  { %v3131_v63 = vpack.c.bf16 %v3125_v5, %v3124_v7  ;;  %v4504_v5 = vld [vmem:[#allocation26] ss:$0 sm:$0xff] }
0x2397   :  { %4910 = vmatmul.mubr.msk.bf16.vlgmr.msra.gmra.mrb[96].mxu1 %vm361_vm0, %v3131_v63 }
0x246a   :  { %v3189_v29 = vpop.f32.mrb[96].mxu1 }
0x246b   :  { %v3190_v31 = vadd.f32 %v4475_v50, %v3189_v29  ;;  %v4911_v17 = vpop.f32.mrb[97].mxu1 }
0x246c   :  { %v3192_v32 = vpop.f32.mrb[98].mxu1 }
0x246d   :  { %v3198_v33 = vmul.f32 0.044715, %v3190_v31  ;;  %v3193_v20 = vadd.f32 %v4475_v50, %v3192_v32  ;;  %v4912_v13 = vpop.f32.mrb[99].mxu1  ;;  %v3196_v44 = vmul.f32 0.5, %v3190_v31 }
0x246f   :  { %v3200_v34 = vmul.f32 %v3198_v33, %v3190_v31  ;;  %v3199_v35 = vmul.f32 0.044715, %v3193_v20  ;;  %v3197_v45 = vmul.f32 0.5, %v3193_v20 }
0x2471   :  { %v3202_v6 = vmul.f32 %v3200_v34, %v3190_v31  ;;  %v3201_v36 = vmul.f32 %v3199_v35, %v3193_v20 }
0x2473   :  { %v3204_v37 = vadd.f32 %v3202_v6, %v3190_v31  ;;  %v3203_v38 = vmul.f32 %v3201_v36, %v3193_v20 }
0x2475   :  { %v3206_v39 = vmul.f32 0.7978846, %v3204_v37  ;;  %v3205_v40 = vadd.f32 %v3203_v38, %v3193_v20 }
0x2477   :  { %5122 = vtanh.f32 %v3206_v39  ;;  %v3207_v41 = vmul.f32 0.7978846, %v3205_v40 }
0x2479   :  { %5124 = vtanh.f32 %v3207_v41 }
0x2481   :  { %v5123_v43 = vpop.eup %5122 }
0x2482   :  { %v3210_v3 = vadd.f32 1.0, %v5123_v43 }
0x2483   :  { %v5125_v42 = vpop.eup %5124 }
0x2484   :  { %v3211_v47 = vadd.f32 1.0, %v5125_v42  ;;  %v3212_v49 = vmul.f32 %v3210_v3, %v3196_v44 }
0x2486   :  { %v3213_v51 = vmul.f32 %v3211_v47, %v3197_v45 }
0x2488   :  { %v3231_v52 = vpack.c.bf16 %v3213_v51, %v3212_v49 }
0x248a   :  { %4930 = vmatmul.mubr.bf16.vlgmr.msra.gmra.mrb[80].mxu0 %v3231_v52 }
0x255d   :  { %v3314_v54 = vpop.f32.mrb[80].mxu0 }
0x255e   :  { %v3321_v30 = vadd.f32 %v3314_v54, %v6470_v46  ;;  %v4931_v55 = vpop.f32.mrb[81].mxu0 }
0x255f   :  { %v3317_v56 = vpop.f32.mrb[82].mxu0 }
0x2560   :  { %v3322_v57 = vadd.f32 %v3317_v56, %v6473_v48  ;;  %v4932_v15 = vpop.f32.mrb[83].mxu0  ;;  %v3331_v58 = vadd.f32 %v4503_v59, %v3321_v30 }
0x2562   :  { %v3335_v60 = vsel %vm361_vm0, %v3331_v58, 0.0  ;;  %v3332_v61 = vadd.f32 %v4503_v59, %v3322_v57 }
0x2563   :  { %3336 = vadd.xlane.f32.xlu0 %v3335_v60 }
0x2564   :  { %v3338_v62 = vsel %vm361_vm0, %v3332_v61, 0.0 }
0x2565   :  { %3339 = vadd.xlane.f32.xlu1 %v3338_v62 }
0x25f0   :  { %v3337_v2 = vpop.xlane.xlu0 %3336 }
0x25f1   :  { %v3341_v4 = vmul.f32 0.03125, %v3337_v2 }
0x25f2   :  { %v3340_v11 = vpop.xlane.xlu1 %3339 }
0x25f3   :  { %v3343_v26 = vsub.f32 %v3331_v58, %v3341_v4  ;;  %v3342_v8 = vmul.f32 0.03125, %v3340_v11 }
0x25f5   :  { %v3344_v9 = vsub.f32 %v3332_v61, %v3342_v8  ;;  %v3345_v46 = vmul.f32 %v3343_v26, %v3343_v26 }
0x25f7   :  { %v3347_v10 = vsel %vm361_vm0, %v3345_v46, 0.0  ;;  %v3346_v12 = vmul.f32 %v3344_v9, %v3344_v9 }
0x25f8   :  { %3348 = vadd.xlane.f32.xlu0 %v3347_v10 }
0x25f9   :  { %v3350_v48 = vsel %vm361_vm0, %v3346_v12, 0.0 }
0x25fa   :  { %3351 = vadd.xlane.f32.xlu1 %v3350_v48 }
0x2685   :  { %v3349_v14 = vpop.xlane.xlu0 %3348 }
0x2686   :  { %v3353_v16 = vmul.f32 0.03125, %v3349_v14 }
0x2687   :  { %v3352_v18 = vpop.xlane.xlu1 %3351 }
0x2688   :  { %v3355_v19 = vadd.f32 1e-05, %v3353_v16  ;;  %v3354_v0 = vmul.f32 0.03125, %v3352_v18 }
0x268a   :  { %5126 = vrsqrt.f32 %v3355_v19  ;;  %v3356_v21 = vadd.f32 1e-05, %v3354_v0 }
0x268c   :  { %5128 = vrsqrt.f32 %v3356_v21 }
0x2694   :  { %v5127_v7 = vpop.eup %5126 }
0x2695   :  { %v3359_v63 = vmul.f32 %v5127_v7, %v3343_v26 }
0x2696   :  { %v5129_v22 = vpop.eup %5128 }
0x2697   :  { %v3367_v23 = vmul.f32 %v4504_v5, %v3359_v63  ;;  %v3360_v24 = vmul.f32 %v5129_v22, %v3344_v9 }
0x2699   :  { %v3375_v1 = vadd.f32 %v4505_v53, %v3367_v23  ;;  %v3368_v25 = vmul.f32 %v4504_v5, %v3360_v24 }
0x269b   :  { %v3376_v27 = vadd.f32 %v4505_v53, %v3368_v25 }
0x269c   :  { %5546 = dma.done.wait [#allocation4], 1024 }
0x269d   :  { %5547 = vsyncadd [#allocation4], 4294966272 }
0x269e   :  { %5548 = dma.done.wait [#allocation4 + $0x1], 40960 }
0x269f   :  { %5549 = vsyncadd [#allocation4 + $0x1], 4294926336  ;;  %v3394_v28 = vpack.c.bf16 %v3376_v27, %v3376_v27  ;;  %v5598_v50 = vmov 0   ;;  %v3393_v29 = vpack.c.bf16 %v3375_v1, %v3375_v1  ;;  %vm3422_vm4 = vcmask 1041409   ;;  %v3386_v33 = vld [vmem:[#allocation2 + $0x8] sm:$0xff]  ;;  %v3385_v20 = vld [vmem:[#allocation2] sm:$0xff] }
0x26a0   :  { %3460 = vmatprep.mubr.bf16.mxu1 %v5598_v50  ;;  %v3390_v13 = vld [vmem:[#allocation2 + $0x28] sm:$0xff]  ;;  %3428 = vmatprep.subr.bf16.mxu1 %v3386_v33  ;;  %v3389_v6 = vld [vmem:[#allocation2 + $0x20] sm:$0xff]  ;;  %v3525_v37 = vld [vmem:[#allocation3 + $0x58] sm:$0xff]  ;;  %s5600_s14 = smov [#allocation32]  }
0x26a1   :  { %v3420_v31 = vunpack.c.l.b16 %v3394_v28  ;;  %v3419_v17 = vunpack.c.l.b16 %v3393_v29  ;;  %3429 = vmatpush1.bf16.msra.mxu1 %v3385_v20  ;;  %v3515_v35 = vld [vmem:[#allocation3 + $0x8] sm:$0xff]  ;;  %v3514_v36 = vld [vmem:[#allocation3] sm:$0xff]  ;;  %v3388_v38 = vld [vmem:[#allocation2 + $0x18] sm:$0xff]  ;;  %s4366_s18 = sshll.u32 %s5600_s14, 4  ;;  %s4367_s18 = int_to_ptr.vmem [resolvable:$true] %s4366_s18 }
0x26a2   :  { %3430 = vmatprep.subr.bf16.mxu1 %v3390_v13  ;;  %3892 = vmatprep.subr.bf16.mxu0 %v3515_v35  ;;  %v3524_v40 = vld [vmem:[#allocation3 + $0x50] sm:$0xff]  ;;  %v3535_v41 = vld [vmem:[#allocation3 + $0xa8] sm:$0xff]  ;;  %v3392_v3 = vld [vmem:[#allocation2 + $0x38] sm:$0xff]  ;;  %s5506_s8 = scalar_lea.vmem %s4367_s18, 320  ;;  %p5511_p11 = scmp.lt.s32.totalorder %s4367_s18, %s4367_s18 }
0x26a3   :  { %v3421_v32 = vrot.slane %v3420_v31, 7  ;;  %3893 = vmatpush1.bf16.msra.mxu0 %v3514_v36  ;;  %v3387_v43 = vld [vmem:[#allocation2 + $0x10] sm:$0xff]  ;;  %v3534_v42 = vld [vmem:[#allocation3 + $0xa0] sm:$0xff]  ;;  %v3545_v44 = vld [vmem:[#allocation3 + $0xf8] sm:$0xff]  ;;  %p5507_p10 = scmp.ne.s32.totalorder %s4367_s18, %s5506_s8  ;;  %p5512_p12 = scmp.lt.s32.totalorder %s5506_s8, %s5506_s8 }
0x26a4   :  { %3894 = vmatprep.subr.bf16.mxu0 %v3525_v37  ;;  %v3391_v45 = vld [vmem:[#allocation2 + $0x30] sm:$0xff]  ;;  %v3675_v47 = vld [vmem:[#allocation3 + $0x508] sm:$0xff]  ;;  %v3674_v52 = vld [vmem:[#allocation3 + $0x500] sm:$0xff] }
0x26a5   :  { %v3423_v34 = vsel %vm3422_vm4, %v3421_v32, %v3419_v17  ;;  %3431 = vmatpush1.bf16.msra.mxu1 %v3389_v6  ;;  %v3544_v49 = vld [vmem:[#allocation3 + $0xf0] sm:$0xff]  ;;  %v3555_v51 = vld [vmem:[#allocation3 + $0x148] sm:$0xff]  ;;  %v3685_v54 = vld [vmem:[#allocation3 + $0x558] sm:$0xff]  ;;  %p5513_p13 = por %p5512_p12, %p5511_p11 }
0x26a6   :  { %v3424_v39 = vpack.c.b16 %v3423_v34, %v3423_v34  ;;  %3469 = vmatprep.subr.bf16.mxu1 %v3388_v38  ;;  %v3554_v59 = vld [vmem:[#allocation3 + $0x140] sm:$0xff]  ;;  %v3565_v30 = vld [vmem:[#allocation3 + $0x198] sm:$0xff]  ;;  %v3684_v55 = vld [vmem:[#allocation3 + $0x550] sm:$0xff] }
0x26a7   :  { %3895 = vmatpush1.bf16.msra.mxu0 %v3524_v40  ;;  %v3695_v56 = vld [vmem:[#allocation3 + $0x5a8] sm:$0xff]  ;;  %v3564_v57 = vld [vmem:[#allocation3 + $0x190] sm:$0xff]  ;;  %v3694_v58 = vld [vmem:[#allocation3 + $0x5a0] sm:$0xff]  ;;  %p5514_p0 = pnand %p5513_p13, %p5507_p10 }
0x26a8   :  { %4506 = vmatmul.mubr.msk.bf16.vlgmr.msra.gmra.mrb[100].mxu1 %vm361_vm0, %v3424_v39  ;;  %3896 = vmatprep.subr.bf16.mxu0 %v3535_v41  ;;  %v3575_v15 = vld [vmem:[#allocation3 + $0x1e8] sm:$0xff]  ;;  %v3705_v60 = vld [vmem:[#allocation3 + $0x5f8] sm:$0xff]  ;;  %v3574_v61 = vld [vmem:[#allocation3 + $0x1e0] sm:$0xff] }
0x26a9   :  { %3470 = vmatpush1.bf16.msra.mxu1 %v3387_v43  ;;  %3501 = vmatprep.mubr.bf16.mxu1 %v5598_v50  ;;  %v3585_v62 = vld [vmem:[#allocation3 + $0x238] sm:$0xff]  ;;  %v3704_v2 = vld [vmem:[#allocation3 + $0x5f0] sm:$0xff]  ;;  %v3715_v4 = vld [vmem:[#allocation3 + $0x648] sm:$0xff]  ;;  %v3397_v43 = vlaneseq }
0x26aa   :  { %3471 = vmatprep.subr.bf16.mxu1 %v3392_v3  ;;  %v3584_v11 = vld [vmem:[#allocation3 + $0x230] sm:$0xff]  ;;  %v3595_v26 = vld [vmem:[#allocation3 + $0x288] sm:$0xff]  ;;  %v3714_v8 = vld [vmem:[#allocation3 + $0x640] sm:$0xff] }
0x26ab   :  { %3897 = vmatpush1.bf16.msra.mxu0 %v3534_v42  ;;  %v3725_v9 = vld [vmem:[#allocation3 + $0x698] sm:$0xff]  ;;  %v3594_v46 = vld [vmem:[#allocation3 + $0x280] sm:$0xff]  ;;  %v3724_v12 = vld [vmem:[#allocation3 + $0x690] sm:$0xff]  ;;  %v6524_v3 = vshrl.u32 %v3397_v43, 7 }
0x26ac   :  { %3898 = vmatprep.subr.bf16.mxu0 %v3545_v44  ;;  %v3605_v10 = vld [vmem:[#allocation3 + $0x2d8] sm:$0xff]  ;;  %v3735_v48 = vld [vmem:[#allocation3 + $0x6e8] sm:$0xff]  ;;  %v3604_v14 = vld [vmem:[#allocation3 + $0x2d0] sm:$0xff] }
0x26ad   :  { %3472 = vmatpush1.bf16.msra.mxu1 %v3391_v45  ;;  %v3615_v16 = vld [vmem:[#allocation3 + $0x328] sm:$0xff]  ;;  %v3734_v18 = vld [vmem:[#allocation3 + $0x6e0] sm:$0xff]  ;;  %v3745_v19 = vld [vmem:[#allocation3 + $0x738] sm:$0xff]  ;;  %v6527_v42 = vsub.s32 0, %v6524_v3  ;;  %v6530_v45 = vsub.s32 1, %v6524_v3 }
0x26ae   :  { %3933 = vmatprep.subr.bf16.mxu1 %v3675_v47  ;;  %v3614_v0 = vld [vmem:[#allocation3 + $0x320] sm:$0xff]  ;;  %v3625_v21 = vld [vmem:[#allocation3 + $0x378] sm:$0xff]  ;;  %v3744_v7 = vld [vmem:[#allocation3 + $0x730] sm:$0xff] }
0x26af   :  { %3899 = vmatpush1.bf16.msra.mxu0 %v3544_v49  ;;  %v3755_v5 = vld [vmem:[#allocation3 + $0x788] sm:$0xff]  ;;  %v3624_v63 = vld [vmem:[#allocation3 + $0x370] sm:$0xff]  ;;  %v3754_v53 = vld [vmem:[#allocation3 + $0x780] sm:$0xff] }
0x26b0   :  { %4507 = vmatmul.mubr.msk.bf16.vlgmr.msra.gmra.mrb[104].mxu1 %vm361_vm0, %v3424_v39  ;;  %3900 = vmatprep.subr.bf16.mxu0 %v3555_v51  ;;  %v3635_v22 = vld [vmem:[#allocation3 + $0x3c8] sm:$0xff]  ;;  %v3765_v23 = vld [vmem:[#allocation3 + $0x7d8] sm:$0xff]  ;;  %v3634_v24 = vld [vmem:[#allocation3 + $0x3c0] sm:$0xff] }
0x26b1   :  { %3934 = vmatpush1.bf16.msra.mxu1 %v3674_v52  ;;  %v3645_v1 = vld [vmem:[#allocation3 + $0x418] sm:$0xff]  ;;  %v3764_v25 = vld [vmem:[#allocation3 + $0x7d0] sm:$0xff]  ;;  %v3775_v27 = vld [vmem:[#allocation3 + $0x828] sm:$0xff] }
0x26b2   :  { %3935 = vmatprep.subr.bf16.mxu1 %v3685_v54  ;;  %v3644_v28 = vld [vmem:[#allocation3 + $0x410] sm:$0xff]  ;;  %v3774_v50 = vld [vmem:[#allocation3 + $0x820] sm:$0xff]  ;;  %v3785_v29 = vld [vmem:[#allocation3 + $0x878] sm:$0xff] }
0x26b3   :  { %3901 = vmatpush1.bf16.msra.mxu0 %v3554_v59  ;;  %v3784_v31 = vld [vmem:[#allocation3 + $0x870] sm:$0xff]  ;;  %v3655_v17 = vld [vmem:[#allocation3 + $0x468] sm:$0xff]  ;;  %v3654_v33 = vld [vmem:[#allocation3 + $0x460] sm:$0xff]  ;;  %v3407_v59 = vsub.s32 2, %v6524_v3 }
0x26b4   :  { %3902 = vmatprep.subr.bf16.mxu0 %v3565_v30  ;;  %v3795_v32 = vld [vmem:[#allocation3 + $0x8c8] sm:$0xff]  ;;  %v3794_v20 = vld [vmem:[#allocation3 + $0x8c0] sm:$0xff]  ;;  %v3665_v13 = vld [vmem:[#allocation3 + $0x4b8] sm:$0xff] }
0x26b5   :  { %3936 = vmatpush1.bf16.msra.mxu1 %v3684_v55  ;;  %v3805_v34 = vld [vmem:[#allocation3 + $0x918] sm:$0xff]  ;;  %v3664_v35 = vld [vmem:[#allocation3 + $0x4b0] sm:$0xff]  ;;  %v3815_v36 = vld [vmem:[#allocation3 + $0x968] sm:$0xff] }
0x26b6   :  { %3937 = vmatprep.subr.bf16.mxu1 %v3695_v56  ;;  %v3804_v6 = vld [vmem:[#allocation3 + $0x910] sm:$0xff]  ;;  %v3517_v37 = vld [vmem:[#allocation3 + $0x18] sm:$0xff]  ;;  %v3814_v38 = vld [vmem:[#allocation3 + $0x960] sm:$0xff]  ;;  %v3411_v56 = vsub.s32 3, %v6524_v3 }
0x26b7   :  { %3903 = vmatpush1.bf16.msra.mxu0 %v3564_v57  ;;  %v3825_v39 = vld [vmem:[#allocation3 + $0x9b8] sm:$0xff]  ;;  %v3824_v40 = vld [vmem:[#allocation3 + $0x9b0] sm:$0xff]  ;;  %v3519_v41 = vld [vmem:[#allocation3 + $0x28] sm:$0xff] }
0x26b8   :  { %3904 = vmatprep.subr.bf16.mxu0 %v3575_v15  ;;  %v3395_v44 = vld [vmem:[#allocation29] sm:$0xf]  ;;  %v3588_v43 = vld [vmem:[#allocation3 + $0x250] sm:$0xff] }
0x26b9   :  { %3938 = vmatpush1.bf16.msra.mxu1 %v3694_v58  ;;  %v3400_v47 = vrot.slane %v3395_v44, %v6527_v42  ;;  %v3404_v49 = vrot.slane %v3395_v44, %v6530_v45 }
0x26ba   :  { %3939 = vmatprep.subr.bf16.mxu1 %v3705_v60  ;;  %v3408_v60 = vrot.slane %v3395_v44, %v3407_v59 }
0x26bb   :  { %3905 = vmatpush1.bf16.msra.mxu0 %v3574_v61 }
0x26bc   :  { %3906 = vmatprep.subr.bf16.mxu0 %v3585_v62  ;;  %v3412_v62 = vrot.slane %v3395_v44, %v3411_v56  ;;  %v3617_v44 = vld [vmem:[#allocation3 + $0x338] sm:$0xff] }
0x26bd   :  { %3940 = vmatpush1.bf16.msra.mxu1 %v3704_v2 }
0x26be   :  { %3941 = vmatprep.subr.bf16.mxu1 %v3715_v4  ;;  %v3516_v4 = vld [vmem:[#allocation3 + $0x10] sm:$0xff] }
0x26bf   :  { %3907 = vmatpush1.bf16.msra.mxu0 %v3584_v11 }
0x26c0   :  { %3908 = vmatprep.subr.bf16.mxu0 %v3595_v26  ;;  %v3527_v26 = vld [vmem:[#allocation3 + $0x68] sm:$0xff] }
0x26c1   :  { %3942 = vmatpush1.bf16.msra.mxu1 %v3714_v8 }
0x26c2   :  { %3943 = vmatprep.subr.bf16.mxu1 %v3725_v9 }
0x26c3   :  { %3909 = vmatpush1.bf16.msra.mxu0 %v3594_v46 }
0x26c4   :  { %3910 = vmatprep.subr.bf16.mxu0 %v3605_v10 }
0x26c5   :  { %3944 = vmatpush1.bf16.msra.mxu1 %v3724_v12 }
0x26c6   :  { %3945 = vmatprep.subr.bf16.mxu1 %v3735_v48 }
0x26c7   :  { %3911 = vmatpush1.bf16.msra.mxu0 %v3604_v14  ;;  %v3526_v14 = vld [vmem:[#allocation3 + $0x60] sm:$0xff] }
0x26c8   :  { %3912 = vmatprep.subr.bf16.mxu0 %v3615_v16 }
0x26c9   :  { %3946 = vmatpush1.bf16.msra.mxu1 %v3734_v18  ;;  %v3537_v18 = vld [vmem:[#allocation3 + $0xb8] sm:$0xff] }
0x26ca   :  { %3947 = vmatprep.subr.bf16.mxu1 %v3745_v19 }
0x26cb   :  { %3913 = vmatpush1.bf16.msra.mxu0 %v3614_v0 }
0x26cc   :  { %3914 = vmatprep.subr.bf16.mxu0 %v3625_v21  ;;  %v3536_v21 = vld [vmem:[#allocation3 + $0xb0] sm:$0xff] }
0x26cd   :  { %3948 = vmatpush1.bf16.msra.mxu1 %v3744_v7  ;;  %v3518_v7 = vld [vmem:[#allocation3 + $0x20] sm:$0xff] }
0x26ce   :  { %3949 = vmatprep.subr.bf16.mxu1 %v3755_v5  ;;  %v3547_v5 = vld [vmem:[#allocation3 + $0x108] sm:$0xff] }
0x26cf   :  { %3915 = vmatpush1.bf16.msra.mxu0 %v3624_v63  ;;  %v3529_v63 = vld [vmem:[#allocation3 + $0x78] sm:$0xff] }
0x26d0   :  { %3916 = vmatprep.subr.bf16.mxu0 %v3635_v22  ;;  %v3546_v22 = vld [vmem:[#allocation3 + $0x100] sm:$0xff] }
0x26d1   :  { %3950 = vmatpush1.bf16.msra.mxu1 %v3754_v53  ;;  %v3528_v53 = vld [vmem:[#allocation3 + $0x70] sm:$0xff] }
0x26d2   :  { %3951 = vmatprep.subr.bf16.mxu1 %v3765_v23  ;;  %v3557_v23 = vld [vmem:[#allocation3 + $0x158] sm:$0xff] }
0x26d3   :  { %3917 = vmatpush1.bf16.msra.mxu0 %v3634_v24  ;;  %v3539_v24 = vld [vmem:[#allocation3 + $0xc8] sm:$0xff] }
0x26d4   :  { %3918 = vmatprep.subr.bf16.mxu0 %v3645_v1  ;;  %v3556_v1 = vld [vmem:[#allocation3 + $0x150] sm:$0xff] }
0x26d5   :  { %3952 = vmatpush1.bf16.msra.mxu1 %v3764_v25  ;;  %v3538_v25 = vld [vmem:[#allocation3 + $0xc0] sm:$0xff] }
0x26d6   :  { %3953 = vmatprep.subr.bf16.mxu1 %v3775_v27  ;;  %v3567_v27 = vld [vmem:[#allocation3 + $0x1a8] sm:$0xff] }
0x26d7   :  { %3919 = vmatpush1.bf16.msra.mxu0 %v3644_v28  ;;  %v3549_v28 = vld [vmem:[#allocation3 + $0x118] sm:$0xff] }
0x26d8   :  { %3920 = vmatprep.subr.bf16.mxu0 %v3655_v17  ;;  %v3559_v17 = vld [vmem:[#allocation3 + $0x168] sm:$0xff] }
0x26d9   :  { %3954 = vmatpush1.bf16.msra.mxu1 %v3774_v50  ;;  %v3566_v50 = vld [vmem:[#allocation3 + $0x1a0] sm:$0xff] }
0x26da   :  { %3955 = vmatprep.subr.bf16.mxu1 %v3785_v29  ;;  %v3548_v29 = vld [vmem:[#allocation3 + $0x110] sm:$0xff] }
0x26db   :  { %3921 = vmatpush1.bf16.msra.mxu0 %v3654_v33  ;;  %v3558_v33 = vld [vmem:[#allocation3 + $0x160] sm:$0xff] }
0x26dc   :  { %3922 = vmatprep.subr.bf16.mxu0 %v3665_v13  ;;  %v3569_v13 = vld [vmem:[#allocation3 + $0x1b8] sm:$0xff] }
0x26dd   :  { %3956 = vmatpush1.bf16.msra.mxu1 %v3784_v31  ;;  %v3577_v31 = vld [vmem:[#allocation3 + $0x1f8] sm:$0xff] }
0x26de   :  { %3957 = vmatprep.subr.bf16.mxu1 %v3795_v32  ;;  %v3576_v32 = vld [vmem:[#allocation3 + $0x1f0] sm:$0xff] }
0x26df   :  { %3923 = vmatpush1.bf16.msra.mxu0 %v3664_v35  ;;  %v3568_v35 = vld [vmem:[#allocation3 + $0x1b0] sm:$0xff] }
0x26e0   :  { %3974 = vmatprep.subr.bf16.mxu0 %v3517_v37  ;;  %v3596_v37 = vld [vmem:[#allocation3 + $0x290] sm:$0xff] }
0x26e1   :  { %3958 = vmatpush1.bf16.msra.mxu1 %v3794_v20  ;;  %v3587_v20 = vld [vmem:[#allocation3 + $0x248] sm:$0xff] }
0x26e2   :  { %3959 = vmatprep.subr.bf16.mxu1 %v3805_v34  ;;  %v3586_v34 = vld [vmem:[#allocation3 + $0x240] sm:$0xff] }
0x26e5   :  { %3960 = vmatpush1.bf16.msra.mxu1 %v3804_v6  ;;  %v3597_v6 = vld [vmem:[#allocation3 + $0x298] sm:$0xff] }
0x26e6   :  { %3961 = vmatprep.subr.bf16.mxu1 %v3815_v36  ;;  %v3579_v36 = vld [vmem:[#allocation3 + $0x208] sm:$0xff] }
0x26e9   :  { %3962 = vmatpush1.bf16.msra.mxu1 %v3814_v38  ;;  %v3578_v38 = vld [vmem:[#allocation3 + $0x200] sm:$0xff] }
0x26ea   :  { %3963 = vmatprep.subr.bf16.mxu1 %v3825_v39  ;;  %v3607_v39 = vld [vmem:[#allocation3 + $0x2e8] sm:$0xff] }
0x26ed   :  { %3964 = vmatpush1.bf16.msra.mxu1 %v3824_v40  ;;  %v3589_v40 = vld [vmem:[#allocation3 + $0x258] sm:$0xff] }
0x26ee   :  { %4056 = vmatprep.subr.bf16.mxu1 %v3519_v41  ;;  %v3606_v41 = vld [vmem:[#allocation3 + $0x2e0] sm:$0xff] }
0x277b   :  { %v3462_v51 = vpop.f32.mrb[100].mxu1 }
0x277c   :  { %v3463_v52 = vadd.f32 %v3462_v51, %v3400_v47  ;;  %v3464_v54 = vpop.f32.mrb[101].mxu1  ;;  %v3599_v47 = vld [vmem:[#allocation3 + $0x2a8] sm:$0xff]  ;;  %v3598_v51 = vld [vmem:[#allocation3 + $0x2a0] sm:$0xff] }
0x277d   :  { %v3465_v30 = vadd.f32 %v3464_v54, %v3404_v49  ;;  %v3466_v55 = vpop.f32.mrb[102].mxu1  ;;  %v3616_v49 = vld [vmem:[#allocation3 + $0x330] sm:$0xff]  ;;  %v3609_v54 = vld [vmem:[#allocation3 + $0x2f8] sm:$0xff] }
0x277e   :  { %v3510_v57 = vmax.f32 %v3463_v52, 0.0  ;;  %v3467_v15 = vpop.f32.mrb[103].mxu1  ;;  %v3627_v52 = vld [vmem:[#allocation3 + $0x388] sm:$0xff]  ;;  %v3608_v55 = vld [vmem:[#allocation3 + $0x2f0] sm:$0xff] }
0x277f   :  { %v3511_v58 = vmax.f32 %v3465_v30, 0.0  ;;  %v3626_v30 = vld [vmem:[#allocation3 + $0x380] sm:$0xff]  ;;  %v3619_v15 = vld [vmem:[#allocation3 + $0x348] sm:$0xff] }
0x2780   :  { %v6542_v2 = vpack.c.bf16 %v3510_v57, %v3510_v57  ;;  %v3637_v57 = vld [vmem:[#allocation3 + $0x3d8] sm:$0xff] }
0x2781   :  { %v6538_v61 = vpack.c.bf16 %v3511_v58, %v3511_v58  ;;  %v3636_v58 = vld [vmem:[#allocation3 + $0x3d0] sm:$0xff] }
0x2783   :  { %v3503_v11 = vpop.f32.mrb[104].mxu1  ;;  %3924 = vmatprep.mubr.bf16.mxu0 %v6538_v61 }
0x2784   :  { %v3504_v8 = vadd.f32 %v3503_v11, %v3408_v60  ;;  %v3505_v9 = vpop.f32.mrb[105].mxu1  ;;  %3925 = vmatmul.mubr.bf16.vlgmr.msra.gmra.mrb[84].mxu0 %v6542_v2  ;;  %v3618_v60 = vld [vmem:[#allocation3 + $0x340] sm:$0xff] }
0x2785   :  { %v3506_v46 = vadd.f32 %v3505_v9, %v3412_v62  ;;  %3975 = vmatpush1.bf16.msra.mxu0 %v3516_v4  ;;  %v3507_v10 = vpop.f32.mrb[106].mxu1  ;;  %4006 = vmatprep.mubr.bf16.mxu0 %v6538_v61  ;;  %v3647_v62 = vld [vmem:[#allocation3 + $0x428] sm:$0xff]  ;;  %v3629_v4 = vld [vmem:[#allocation3 + $0x398] sm:$0xff]  ;;  %v3646_v11 = vld [vmem:[#allocation3 + $0x420] sm:$0xff] }
0x2786   :  { %v3512_v12 = vmax.f32 %v3504_v8, 0.0  ;;  %v3508_v48 = vpop.f32.mrb[107].mxu1  ;;  %3976 = vmatprep.subr.bf16.mxu0 %v3527_v26  ;;  %v3628_v26 = vld [vmem:[#allocation3 + $0x390] sm:$0xff]  ;;  %v3657_v8 = vld [vmem:[#allocation3 + $0x478] sm:$0xff]  ;;  %v3639_v9 = vld [vmem:[#allocation3 + $0x3e8] sm:$0xff] }
0x2787   :  { %v3513_v16 = vmax.f32 %v3506_v46, 0.0  ;;  %v3656_v46 = vld [vmem:[#allocation3 + $0x470] sm:$0xff]  ;;  %v3638_v10 = vld [vmem:[#allocation3 + $0x3e0] sm:$0xff]  ;;  %v3649_v48 = vld [vmem:[#allocation3 + $0x438] sm:$0xff] }
0x2788   :  { %v6549_v0 = vpack.c.bf16 %v3512_v12, %v3512_v12  ;;  %v3667_v12 = vld [vmem:[#allocation3 + $0x4c8] sm:$0xff] }
0x2789   :  { %v6547_v19 = vpack.c.bf16 %v3513_v16, %v3513_v16  ;;  %3977 = vmatpush1.bf16.msra.mxu0 %v3526_v14  ;;  %v3666_v14 = vld [vmem:[#allocation3 + $0x4c0] sm:$0xff]  ;;  %v3648_v16 = vld [vmem:[#allocation3 + $0x430] sm:$0xff] }
0x278a   :  { %3978 = vmatprep.subr.bf16.mxu0 %v3537_v18  ;;  %v3677_v18 = vld [vmem:[#allocation3 + $0x518] sm:$0xff] }
0x278b   :  { %3965 = vmatprep.mubr.bf16.mxu1 %v6547_v19 }
0x278c   :  { %3966 = vmatmul.mubr.bf16.vlgmr.msra.gmra.mrb[108].mxu1 %v6549_v0 }
0x278d   :  { %3979 = vmatpush1.bf16.msra.mxu0 %v3536_v21  ;;  %4057 = vmatpush1.bf16.msra.mxu1 %v3518_v7  ;;  %v3659_v21 = vld [vmem:[#allocation3 + $0x488] sm:$0xff]  ;;  %v3676_v7 = vld [vmem:[#allocation3 + $0x510] sm:$0xff] }
0x278e   :  { %4088 = vmatprep.mubr.bf16.mxu1 %v6538_v61  ;;  %3980 = vmatprep.subr.bf16.mxu0 %v3547_v5  ;;  %v3658_v5 = vld [vmem:[#allocation3 + $0x480] sm:$0xff] }
0x278f   :  { %4058 = vmatprep.subr.bf16.mxu1 %v3529_v63  ;;  %v3687_v63 = vld [vmem:[#allocation3 + $0x568] sm:$0xff] }
0x2791   :  { %3981 = vmatpush1.bf16.msra.mxu0 %v3546_v22  ;;  %4059 = vmatpush1.bf16.msra.mxu1 %v3528_v53  ;;  %v3669_v22 = vld [vmem:[#allocation3 + $0x4d8] sm:$0xff]  ;;  %v3686_v53 = vld [vmem:[#allocation3 + $0x560] sm:$0xff] }
0x2792   :  { %3982 = vmatprep.subr.bf16.mxu0 %v3557_v23  ;;  %4060 = vmatprep.subr.bf16.mxu1 %v3539_v24  ;;  %v3668_v23 = vld [vmem:[#allocation3 + $0x4d0] sm:$0xff]  ;;  %v3697_v24 = vld [vmem:[#allocation3 + $0x5b8] sm:$0xff] }
0x2795   :  { %3983 = vmatpush1.bf16.msra.mxu0 %v3556_v1  ;;  %4061 = vmatpush1.bf16.msra.mxu1 %v3538_v25  ;;  %v3679_v1 = vld [vmem:[#allocation3 + $0x528] sm:$0xff]  ;;  %v3696_v25 = vld [vmem:[#allocation3 + $0x5b0] sm:$0xff] }
0x2796   :  { %3984 = vmatprep.subr.bf16.mxu0 %v3567_v27  ;;  %4062 = vmatprep.subr.bf16.mxu1 %v3549_v28  ;;  %v3678_v27 = vld [vmem:[#allocation3 + $0x520] sm:$0xff]  ;;  %v3707_v28 = vld [vmem:[#allocation3 + $0x608] sm:$0xff] }
0x2799   :  { %3985 = vmatpush1.bf16.msra.mxu0 %v3566_v50  ;;  %4063 = vmatpush1.bf16.msra.mxu1 %v3548_v29  ;;  %v3689_v50 = vld [vmem:[#allocation3 + $0x578] sm:$0xff]  ;;  %v3706_v29 = vld [vmem:[#allocation3 + $0x600] sm:$0xff] }
0x279a   :  { %3986 = vmatprep.subr.bf16.mxu0 %v3577_v31  ;;  %4064 = vmatprep.subr.bf16.mxu1 %v3559_v17  ;;  %v3688_v31 = vld [vmem:[#allocation3 + $0x570] sm:$0xff]  ;;  %v3717_v17 = vld [vmem:[#allocation3 + $0x658] sm:$0xff] }
0x279d   :  { %3987 = vmatpush1.bf16.msra.mxu0 %v3576_v32  ;;  %4065 = vmatpush1.bf16.msra.mxu1 %v3558_v33  ;;  %v3699_v32 = vld [vmem:[#allocation3 + $0x5c8] sm:$0xff]  ;;  %v3716_v33 = vld [vmem:[#allocation3 + $0x650] sm:$0xff] }
0x279e   :  { %3988 = vmatprep.subr.bf16.mxu0 %v3587_v20  ;;  %4066 = vmatprep.subr.bf16.mxu1 %v3569_v13  ;;  %v3698_v20 = vld [vmem:[#allocation3 + $0x5c0] sm:$0xff]  ;;  %v3727_v13 = vld [vmem:[#allocation3 + $0x6a8] sm:$0xff] }
0x27a1   :  { %3989 = vmatpush1.bf16.msra.mxu0 %v3586_v34  ;;  %4067 = vmatpush1.bf16.msra.mxu1 %v3568_v35  ;;  %v3709_v34 = vld [vmem:[#allocation3 + $0x618] sm:$0xff]  ;;  %v3726_v35 = vld [vmem:[#allocation3 + $0x6a0] sm:$0xff] }
0x27a2   :  { %3990 = vmatprep.subr.bf16.mxu0 %v3597_v6  ;;  %4068 = vmatprep.subr.bf16.mxu1 %v3579_v36  ;;  %v3708_v6 = vld [vmem:[#allocation3 + $0x610] sm:$0xff]  ;;  %v3737_v36 = vld [vmem:[#allocation3 + $0x6f8] sm:$0xff] }
0x27a5   :  { %3991 = vmatpush1.bf16.msra.mxu0 %v3596_v37  ;;  %4069 = vmatpush1.bf16.msra.mxu1 %v3578_v38  ;;  %v3719_v37 = vld [vmem:[#allocation3 + $0x668] sm:$0xff]  ;;  %v3736_v38 = vld [vmem:[#allocation3 + $0x6f0] sm:$0xff] }
0x27a6   :  { %3992 = vmatprep.subr.bf16.mxu0 %v3607_v39  ;;  %4070 = vmatprep.subr.bf16.mxu1 %v3589_v40  ;;  %v3718_v39 = vld [vmem:[#allocation3 + $0x660] sm:$0xff]  ;;  %v3747_v40 = vld [vmem:[#allocation3 + $0x748] sm:$0xff] }
0x27a9   :  { %3993 = vmatpush1.bf16.msra.mxu0 %v3606_v41  ;;  %4071 = vmatpush1.bf16.msra.mxu1 %v3588_v43  ;;  %v3729_v41 = vld [vmem:[#allocation3 + $0x6b8] sm:$0xff]  ;;  %v3746_v43 = vld [vmem:[#allocation3 + $0x740] sm:$0xff] }
0x27aa   :  { %3994 = vmatprep.subr.bf16.mxu0 %v3617_v44  ;;  %4072 = vmatprep.subr.bf16.mxu1 %v3599_v47  ;;  %v3728_v44 = vld [vmem:[#allocation3 + $0x6b0] sm:$0xff]  ;;  %v3757_v47 = vld [vmem:[#allocation3 + $0x798] sm:$0xff] }
0x27ad   :  { %3995 = vmatpush1.bf16.msra.mxu0 %v3616_v49  ;;  %4073 = vmatpush1.bf16.msra.mxu1 %v3598_v51  ;;  %v3739_v49 = vld [vmem:[#allocation3 + $0x708] sm:$0xff]  ;;  %v3756_v51 = vld [vmem:[#allocation3 + $0x790] sm:$0xff] }
0x27ae   :  { %3996 = vmatprep.subr.bf16.mxu0 %v3627_v52  ;;  %4074 = vmatprep.subr.bf16.mxu1 %v3609_v54  ;;  %v3738_v52 = vld [vmem:[#allocation3 + $0x700] sm:$0xff]  ;;  %v3767_v54 = vld [vmem:[#allocation3 + $0x7e8] sm:$0xff] }
0x27b1   :  { %3997 = vmatpush1.bf16.msra.mxu0 %v3626_v30  ;;  %4075 = vmatpush1.bf16.msra.mxu1 %v3608_v55  ;;  %v3749_v30 = vld [vmem:[#allocation3 + $0x758] sm:$0xff]  ;;  %v3766_v55 = vld [vmem:[#allocation3 + $0x7e0] sm:$0xff] }
0x27b2   :  { %3998 = vmatprep.subr.bf16.mxu0 %v3637_v57  ;;  %4076 = vmatprep.subr.bf16.mxu1 %v3619_v15  ;;  %v3748_v57 = vld [vmem:[#allocation3 + $0x750] sm:$0xff]  ;;  %v3777_v15 = vld [vmem:[#allocation3 + $0x838] sm:$0xff] }
0x27b5   :  { %3999 = vmatpush1.bf16.msra.mxu0 %v3636_v58  ;;  %4077 = vmatpush1.bf16.msra.mxu1 %v3618_v60  ;;  %v3759_v58 = vld [vmem:[#allocation3 + $0x7a8] sm:$0xff]  ;;  %v3776_v60 = vld [vmem:[#allocation3 + $0x830] sm:$0xff] }
0x27b6   :  { %4000 = vmatprep.subr.bf16.mxu0 %v3647_v62  ;;  %4078 = vmatprep.subr.bf16.mxu1 %v3629_v4  ;;  %v3758_v62 = vld [vmem:[#allocation3 + $0x7a0] sm:$0xff]  ;;  %v3787_v4 = vld [vmem:[#allocation3 + $0x888] sm:$0xff] }
0x27b9   :  { %4001 = vmatpush1.bf16.msra.mxu0 %v3646_v11  ;;  %4079 = vmatpush1.bf16.msra.mxu1 %v3628_v26  ;;  %v3769_v11 = vld [vmem:[#allocation3 + $0x7f8] sm:$0xff]  ;;  %v3786_v26 = vld [vmem:[#allocation3 + $0x880] sm:$0xff] }
0x27ba   :  { %4002 = vmatprep.subr.bf16.mxu0 %v3657_v8  ;;  %4080 = vmatprep.subr.bf16.mxu1 %v3639_v9  ;;  %v3768_v8 = vld [vmem:[#allocation3 + $0x7f0] sm:$0xff]  ;;  %v3797_v9 = vld [vmem:[#allocation3 + $0x8d8] sm:$0xff] }
0x27bd   :  { %4003 = vmatpush1.bf16.msra.mxu0 %v3656_v46  ;;  %4081 = vmatpush1.bf16.msra.mxu1 %v3638_v10  ;;  %v3779_v46 = vld [vmem:[#allocation3 + $0x848] sm:$0xff]  ;;  %v3796_v10 = vld [vmem:[#allocation3 + $0x8d0] sm:$0xff] }
0x27be   :  { %4004 = vmatprep.subr.bf16.mxu0 %v3667_v12  ;;  %4082 = vmatprep.subr.bf16.mxu1 %v3649_v48  ;;  %v3778_v12 = vld [vmem:[#allocation3 + $0x840] sm:$0xff]  ;;  %v3807_v48 = vld [vmem:[#allocation3 + $0x928] sm:$0xff] }
0x27c1   :  { %4005 = vmatpush1.bf16.msra.mxu0 %v3666_v14  ;;  %4083 = vmatpush1.bf16.msra.mxu1 %v3648_v16  ;;  %v3789_v14 = vld [vmem:[#allocation3 + $0x898] sm:$0xff]  ;;  %v3806_v16 = vld [vmem:[#allocation3 + $0x920] sm:$0xff] }
0x27c2   :  { %4015 = vmatprep.subr.bf16.mxu0 %v3677_v18  ;;  %4084 = vmatprep.subr.bf16.mxu1 %v3659_v21  ;;  %v3788_v18 = vld [vmem:[#allocation3 + $0x890] sm:$0xff]  ;;  %v3817_v21 = vld [vmem:[#allocation3 + $0x978] sm:$0xff] }
0x27c4   :  { %4007 = vmatmul.mubr.bf16.vlgmr.msra.gmra.mrb[88].mxu0 %v6542_v2 }
0x27c5   :  { %4016 = vmatpush1.bf16.msra.mxu0 %v3676_v7  ;;  %4047 = vmatprep.mubr.bf16.mxu0 %v6547_v19  ;;  %v3799_v7 = vld [vmem:[#allocation3 + $0x8e8] sm:$0xff] }
0x27c6   :  { %4085 = vmatpush1.bf16.msra.mxu1 %v3658_v5  ;;  %4017 = vmatprep.subr.bf16.mxu0 %v3687_v63  ;;  %v3816_v5 = vld [vmem:[#allocation3 + $0x970] sm:$0xff]  ;;  %v3798_v63 = vld [vmem:[#allocation3 + $0x8e0] sm:$0xff] }
0x27c7   :  { %4086 = vmatprep.subr.bf16.mxu1 %v3669_v22  ;;  %v3827_v22 = vld [vmem:[#allocation3 + $0x9c8] sm:$0xff] }
0x27c9   :  { %4018 = vmatpush1.bf16.msra.mxu0 %v3686_v53  ;;  %v3809_v53 = vld [vmem:[#allocation3 + $0x938] sm:$0xff] }
0x27ca   :  { %4087 = vmatpush1.bf16.msra.mxu1 %v3668_v23  ;;  %4019 = vmatprep.subr.bf16.mxu0 %v3697_v24  ;;  %v3826_v23 = vld [vmem:[#allocation3 + $0x9c0] sm:$0xff]  ;;  %v3808_v24 = vld [vmem:[#allocation3 + $0x930] sm:$0xff] }
0x27cb   :  { %4097 = vmatprep.subr.bf16.mxu1 %v3679_v1  ;;  %v3521_v1 = vld [vmem:[#allocation3 + $0x38] sm:$0xff] }
0x27cd   :  { %4089 = vmatmul.mubr.bf16.vlgmr.msra.gmra.mrb[112].mxu1 %v6542_v2  ;;  %4020 = vmatpush1.bf16.msra.mxu0 %v3696_v25  ;;  %v3819_v25 = vld [vmem:[#allocation3 + $0x988] sm:$0xff] }
0x27ce   :  { %4098 = vmatpush1.bf16.msra.mxu1 %v3678_v27  ;;  %4129 = vmatprep.mubr.bf16.mxu1 %v6547_v19  ;;  %v3520_v27 = vld [vmem:[#allocation3 + $0x30] sm:$0xff] }
0x27cf   :  { %4021 = vmatprep.subr.bf16.mxu0 %v3707_v28  ;;  %4099 = vmatprep.subr.bf16.mxu1 %v3689_v50  ;;  %v3818_v28 = vld [vmem:[#allocation3 + $0x980] sm:$0xff]  ;;  %v3531_v50 = vld [vmem:[#allocation3 + $0x88] sm:$0xff] }
0x27d1   :  { %4022 = vmatpush1.bf16.msra.mxu0 %v3706_v29  ;;  %v3829_v29 = vld [vmem:[#allocation3 + $0x9d8] sm:$0xff] }
0x27d2   :  { %4100 = vmatpush1.bf16.msra.mxu1 %v3688_v31  ;;  %4023 = vmatprep.subr.bf16.mxu0 %v3717_v17  ;;  %v3530_v31 = vld [vmem:[#allocation3 + $0x80] sm:$0xff]  ;;  %v3828_v17 = vld [vmem:[#allocation3 + $0x9d0] sm:$0xff] }
0x27d3   :  { %4101 = vmatprep.subr.bf16.mxu1 %v3699_v32  ;;  %v3541_v32 = vld [vmem:[#allocation3 + $0xd8] sm:$0xff] }
0x27d5   :  { %4024 = vmatpush1.bf16.msra.mxu0 %v3716_v33  ;;  %v3523_v33 = vld [vmem:[#allocation3 + $0x48] sm:$0xff] }
0x27d6   :  { %4102 = vmatpush1.bf16.msra.mxu1 %v3698_v20  ;;  %4025 = vmatprep.subr.bf16.mxu0 %v3727_v13  ;;  %v3540_v20 = vld [vmem:[#allocation3 + $0xd0] sm:$0xff]  ;;  %v3522_v13 = vld [vmem:[#allocation3 + $0x40] sm:$0xff] }
0x27d7   :  { %4103 = vmatprep.subr.bf16.mxu1 %v3709_v34  ;;  %v3551_v34 = vld [vmem:[#allocation3 + $0x128] sm:$0xff] }
0x27d9   :  { %4026 = vmatpush1.bf16.msra.mxu0 %v3726_v35  ;;  %v3533_v35 = vld [vmem:[#allocation3 + $0x98] sm:$0xff] }
0x27da   :  { %4104 = vmatpush1.bf16.msra.mxu1 %v3708_v6  ;;  %4027 = vmatprep.subr.bf16.mxu0 %v3737_v36  ;;  %v3550_v6 = vld [vmem:[#allocation3 + $0x120] sm:$0xff]  ;;  %v3532_v36 = vld [vmem:[#allocation3 + $0x90] sm:$0xff] }
0x27db   :  { %4105 = vmatprep.subr.bf16.mxu1 %v3719_v37  ;;  %v3561_v37 = vld [vmem:[#allocation3 + $0x178] sm:$0xff] }
0x27dd   :  { %4028 = vmatpush1.bf16.msra.mxu0 %v3736_v38  ;;  %v3543_v38 = vld [vmem:[#allocation3 + $0xe8] sm:$0xff] }
0x27de   :  { %4106 = vmatpush1.bf16.msra.mxu1 %v3718_v39  ;;  %4029 = vmatprep.subr.bf16.mxu0 %v3747_v40  ;;  %v3560_v39 = vld [vmem:[#allocation3 + $0x170] sm:$0xff]  ;;  %v3542_v40 = vld [vmem:[#allocation3 + $0xe0] sm:$0xff] }
0x27df   :  { %4107 = vmatprep.subr.bf16.mxu1 %v3729_v41  ;;  %v3571_v41 = vld [vmem:[#allocation3 + $0x1c8] sm:$0xff] }
0x27e1   :  { %4030 = vmatpush1.bf16.msra.mxu0 %v3746_v43  ;;  %v3553_v43 = vld [vmem:[#allocation3 + $0x138] sm:$0xff] }
0x27e2   :  { %4108 = vmatpush1.bf16.msra.mxu1 %v3728_v44  ;;  %4031 = vmatprep.subr.bf16.mxu0 %v3757_v47  ;;  %v3570_v44 = vld [vmem:[#allocation3 + $0x1c0] sm:$0xff]  ;;  %v3581_v47 = vld [vmem:[#allocation3 + $0x218] sm:$0xff] }
0x27e3   :  { %4109 = vmatprep.subr.bf16.mxu1 %v3739_v49  ;;  %v3563_v49 = vld [vmem:[#allocation3 + $0x188] sm:$0xff] }
0x27e5   :  { %4032 = vmatpush1.bf16.msra.mxu0 %v3756_v51  ;;  %v3580_v51 = vld [vmem:[#allocation3 + $0x210] sm:$0xff] }
0x27e6   :  { %4110 = vmatpush1.bf16.msra.mxu1 %v3738_v52  ;;  %4033 = vmatprep.subr.bf16.mxu0 %v3767_v54  ;;  %v3562_v52 = vld [vmem:[#allocation3 + $0x180] sm:$0xff]  ;;  %v3591_v54 = vld [vmem:[#allocation3 + $0x268] sm:$0xff] }
0x27e7   :  { %4111 = vmatprep.subr.bf16.mxu1 %v3749_v30  ;;  %v3573_v30 = vld [vmem:[#allocation3 + $0x1d8] sm:$0xff] }
0x27e9   :  { %4034 = vmatpush1.bf16.msra.mxu0 %v3766_v55  ;;  %v3590_v55 = vld [vmem:[#allocation3 + $0x260] sm:$0xff] }
0x27ea   :  { %4112 = vmatpush1.bf16.msra.mxu1 %v3748_v57  ;;  %4035 = vmatprep.subr.bf16.mxu0 %v3777_v15  ;;  %v3572_v57 = vld [vmem:[#allocation3 + $0x1d0] sm:$0xff]  ;;  %v3601_v15 = vld [vmem:[#allocation3 + $0x2b8] sm:$0xff] }
0x27eb   :  { %4113 = vmatprep.subr.bf16.mxu1 %v3759_v58  ;;  %v3583_v58 = vld [vmem:[#allocation3 + $0x228] sm:$0xff] }
0x27ed   :  { %4036 = vmatpush1.bf16.msra.mxu0 %v3776_v60  ;;  %v3600_v60 = vld [vmem:[#allocation3 + $0x2b0] sm:$0xff] }
0x27ee   :  { %4114 = vmatpush1.bf16.msra.mxu1 %v3758_v62  ;;  %4037 = vmatprep.subr.bf16.mxu0 %v3787_v4  ;;  %v3582_v62 = vld [vmem:[#allocation3 + $0x220] sm:$0xff]  ;;  %v3611_v4 = vld [vmem:[#allocation3 + $0x308] sm:$0xff] }
0x27ef   :  { %4115 = vmatprep.subr.bf16.mxu1 %v3769_v11  ;;  %v3593_v11 = vld [vmem:[#allocation3 + $0x278] sm:$0xff] }
0x27f1   :  { %4038 = vmatpush1.bf16.msra.mxu0 %v3786_v26  ;;  %v3610_v26 = vld [vmem:[#allocation3 + $0x300] sm:$0xff] }
0x27f2   :  { %4116 = vmatpush1.bf16.msra.mxu1 %v3768_v8  ;;  %4039 = vmatprep.subr.bf16.mxu0 %v3797_v9  ;;  %v3592_v8 = vld [vmem:[#allocation3 + $0x270] sm:$0xff]  ;;  %v3621_v9 = vld [vmem:[#allocation3 + $0x358] sm:$0xff] }
0x27f3   :  { %4117 = vmatprep.subr.bf16.mxu1 %v3779_v46  ;;  %v3603_v46 = vld [vmem:[#allocation3 + $0x2c8] sm:$0xff] }
0x27f5   :  { %4040 = vmatpush1.bf16.msra.mxu0 %v3796_v10  ;;  %v3620_v10 = vld [vmem:[#allocation3 + $0x350] sm:$0xff] }
0x27f6   :  { %4118 = vmatpush1.bf16.msra.mxu1 %v3778_v12  ;;  %4041 = vmatprep.subr.bf16.mxu0 %v3807_v48  ;;  %v3602_v12 = vld [vmem:[#allocation3 + $0x2c0] sm:$0xff]  ;;  %v3631_v48 = vld [vmem:[#allocation3 + $0x3a8] sm:$0xff] }
0x27f7   :  { %4119 = vmatprep.subr.bf16.mxu1 %v3789_v14  ;;  %v3613_v14 = vld [vmem:[#allocation3 + $0x318] sm:$0xff] }
0x27f9   :  { %4042 = vmatpush1.bf16.msra.mxu0 %v3806_v16  ;;  %v3630_v16 = vld [vmem:[#allocation3 + $0x3a0] sm:$0xff] }
0x27fa   :  { %4120 = vmatpush1.bf16.msra.mxu1 %v3788_v18  ;;  %4043 = vmatprep.subr.bf16.mxu0 %v3817_v21  ;;  %v3612_v18 = vld [vmem:[#allocation3 + $0x310] sm:$0xff]  ;;  %v3641_v21 = vld [vmem:[#allocation3 + $0x3f8] sm:$0xff] }
0x27fb   :  { %4121 = vmatprep.subr.bf16.mxu1 %v3799_v7  ;;  %v3623_v7 = vld [vmem:[#allocation3 + $0x368] sm:$0xff] }
0x27fd   :  { %4044 = vmatpush1.bf16.msra.mxu0 %v3816_v5  ;;  %v3640_v5 = vld [vmem:[#allocation3 + $0x3f0] sm:$0xff] }
0x27fe   :  { %4122 = vmatpush1.bf16.msra.mxu1 %v3798_v63  ;;  %4045 = vmatprep.subr.bf16.mxu0 %v3827_v22  ;;  %v3622_v63 = vld [vmem:[#allocation3 + $0x360] sm:$0xff]  ;;  %v3651_v22 = vld [vmem:[#allocation3 + $0x448] sm:$0xff] }
0x27ff   :  { %4123 = vmatprep.subr.bf16.mxu1 %v3809_v53  ;;  %v3633_v53 = vld [vmem:[#allocation3 + $0x3b8] sm:$0xff] }
0x2801   :  { %4046 = vmatpush1.bf16.msra.mxu0 %v3826_v23  ;;  %v3650_v23 = vld [vmem:[#allocation3 + $0x440] sm:$0xff] }
0x2802   :  { %4124 = vmatpush1.bf16.msra.mxu1 %v3808_v24  ;;  %4138 = vmatprep.subr.bf16.mxu0 %v3521_v1  ;;  %v3632_v24 = vld [vmem:[#allocation3 + $0x3b0] sm:$0xff]  ;;  %v3661_v1 = vld [vmem:[#allocation3 + $0x498] sm:$0xff] }
0x2803   :  { %4125 = vmatprep.subr.bf16.mxu1 %v3819_v25  ;;  %v3643_v25 = vld [vmem:[#allocation3 + $0x408] sm:$0xff] }
0x2804   :  { %4048 = vmatmul.mubr.bf16.vlgmr.msra.gmra.mrb[88].mxu0 %v6549_v0 }
0x2805   :  { %4139 = vmatpush1.bf16.msra.mxu0 %v3520_v27  ;;  %4170 = vmatprep.mubr.bf16.mxu0 %v6538_v61  ;;  %v3660_v27 = vld [vmem:[#allocation3 + $0x490] sm:$0xff] }
0x2806   :  { %4126 = vmatpush1.bf16.msra.mxu1 %v3818_v28  ;;  %4140 = vmatprep.subr.bf16.mxu0 %v3531_v50  ;;  %v3642_v28 = vld [vmem:[#allocation3 + $0x400] sm:$0xff]  ;;  %v3671_v50 = vld [vmem:[#allocation3 + $0x4e8] sm:$0xff] }
0x2807   :  { %4127 = vmatprep.subr.bf16.mxu1 %v3829_v29  ;;  %v3653_v29 = vld [vmem:[#allocation3 + $0x458] sm:$0xff] }
0x2809   :  { %4141 = vmatpush1.bf16.msra.mxu0 %v3530_v31  ;;  %v3670_v31 = vld [vmem:[#allocation3 + $0x4e0] sm:$0xff] }
0x280a   :  { %4128 = vmatpush1.bf16.msra.mxu1 %v3828_v17  ;;  %4142 = vmatprep.subr.bf16.mxu0 %v3541_v32  ;;  %v3652_v17 = vld [vmem:[#allocation3 + $0x450] sm:$0xff]  ;;  %v3681_v32 = vld [vmem:[#allocation3 + $0x538] sm:$0xff] }
0x280b   :  { %4220 = vmatprep.subr.bf16.mxu1 %v3523_v33  ;;  %v3663_v33 = vld [vmem:[#allocation3 + $0x4a8] sm:$0xff] }
0x280d   :  { %4130 = vmatmul.mubr.bf16.vlgmr.msra.gmra.mrb[112].mxu1 %v6549_v0  ;;  %4143 = vmatpush1.bf16.msra.mxu0 %v3540_v20  ;;  %v3680_v20 = vld [vmem:[#allocation3 + $0x530] sm:$0xff] }
0x280e   :  { %4221 = vmatpush1.bf16.msra.mxu1 %v3522_v13  ;;  %4252 = vmatprep.mubr.bf16.mxu1 %v6538_v61  ;;  %v3552_v61 = vld [vmem:[#allocation3 + $0x130] sm:$0xff]  ;;  %v3662_v13 = vld [vmem:[#allocation3 + $0x4a0] sm:$0xff] }
0x280f   :  { %4144 = vmatprep.subr.bf16.mxu0 %v3551_v34  ;;  %4222 = vmatprep.subr.bf16.mxu1 %v3533_v35  ;;  %v3691_v34 = vld [vmem:[#allocation3 + $0x588] sm:$0xff]  ;;  %v3673_v35 = vld [vmem:[#allocation3 + $0x4f8] sm:$0xff] }
0x2811   :  { %4145 = vmatpush1.bf16.msra.mxu0 %v3550_v6  ;;  %v3690_v6 = vld [vmem:[#allocation3 + $0x580] sm:$0xff] }
0x2812   :  { %4223 = vmatpush1.bf16.msra.mxu1 %v3532_v36  ;;  %4146 = vmatprep.subr.bf16.mxu0 %v3561_v37  ;;  %v3672_v36 = vld [vmem:[#allocation3 + $0x4f0] sm:$0xff]  ;;  %v3701_v37 = vld [vmem:[#allocation3 + $0x5d8] sm:$0xff] }
0x2813   :  { %4224 = vmatprep.subr.bf16.mxu1 %v3543_v38  ;;  %v3683_v38 = vld [vmem:[#allocation3 + $0x548] sm:$0xff] }
0x2815   :  { %4147 = vmatpush1.bf16.msra.mxu0 %v3560_v39  ;;  %v3700_v39 = vld [vmem:[#allocation3 + $0x5d0] sm:$0xff] }
0x2816   :  { %4225 = vmatpush1.bf16.msra.mxu1 %v3542_v40  ;;  %4148 = vmatprep.subr.bf16.mxu0 %v3571_v41  ;;  %v3682_v40 = vld [vmem:[#allocation3 + $0x540] sm:$0xff]  ;;  %v3711_v41 = vld [vmem:[#allocation3 + $0x628] sm:$0xff] }
0x2817   :  { %4226 = vmatprep.subr.bf16.mxu1 %v3553_v43  ;;  %v3693_v43 = vld [vmem:[#allocation3 + $0x598] sm:$0xff] }
0x2819   :  { %4149 = vmatpush1.bf16.msra.mxu0 %v3570_v44  ;;  %v3710_v44 = vld [vmem:[#allocation3 + $0x620] sm:$0xff] }
0x281a   :  { %4227 = vmatpush1.bf16.msra.mxu1 %v3552_v61  ;;  %4150 = vmatprep.subr.bf16.mxu0 %v3581_v47  ;;  %v3692_v61 = vld [vmem:[#allocation3 + $0x590] sm:$0xff]  ;;  %v3721_v47 = vld [vmem:[#allocation3 + $0x678] sm:$0xff] }
0x281b   :  { %4228 = vmatprep.subr.bf16.mxu1 %v3563_v49  ;;  %v3703_v49 = vld [vmem:[#allocation3 + $0x5e8] sm:$0xff] }
0x281d   :  { %4151 = vmatpush1.bf16.msra.mxu0 %v3580_v51  ;;  %v3720_v51 = vld [vmem:[#allocation3 + $0x670] sm:$0xff] }
0x281e   :  { %4229 = vmatpush1.bf16.msra.mxu1 %v3562_v52  ;;  %4152 = vmatprep.subr.bf16.mxu0 %v3591_v54  ;;  %v3702_v52 = vld [vmem:[#allocation3 + $0x5e0] sm:$0xff]  ;;  %v3731_v54 = vld [vmem:[#allocation3 + $0x6c8] sm:$0xff] }
0x281f   :  { %4230 = vmatprep.subr.bf16.mxu1 %v3573_v30  ;;  %v3713_v30 = vld [vmem:[#allocation3 + $0x638] sm:$0xff] }
0x2821   :  { %4153 = vmatpush1.bf16.msra.mxu0 %v3590_v55  ;;  %v6566_v55 = vld [vmem:[#allocation31] sm:$0xff] }
0x2822   :  { %4231 = vmatpush1.bf16.msra.mxu1 %v3572_v57  ;;  %4154 = vmatprep.subr.bf16.mxu0 %v3601_v15  ;;  %v3712_v57 = vld [vmem:[#allocation3 + $0x630] sm:$0xff]  ;;  %v3741_v15 = vld [vmem:[#allocation3 + $0x718] sm:$0xff] }
0x2823   :  { %4232 = vmatprep.subr.bf16.mxu1 %v3583_v58 }
0x2825   :  { %4155 = vmatpush1.bf16.msra.mxu0 %v3600_v60  ;;  %v3723_v60 = vld [vmem:[#allocation3 + $0x688] sm:$0xff] }
0x2826   :  { %4233 = vmatpush1.bf16.msra.mxu1 %v3582_v62  ;;  %4156 = vmatprep.subr.bf16.mxu0 %v3611_v4  ;;  %v3845_v4 = vrot.slane %v6566_v55, %v6527_v42 }
0x2827   :  { %4234 = vmatprep.subr.bf16.mxu1 %v3593_v11 }
0x2829   :  { %4157 = vmatpush1.bf16.msra.mxu0 %v3610_v26  ;;  %v3740_v26 = vld [vmem:[#allocation3 + $0x710] sm:$0xff] }
0x282a   :  { %4235 = vmatpush1.bf16.msra.mxu1 %v3592_v8  ;;  %4158 = vmatprep.subr.bf16.mxu0 %v3621_v9  ;;  %v3849_v8 = vrot.slane %v6566_v55, %v6530_v45  ;;  %v3722_v9 = vld [vmem:[#allocation3 + $0x680] sm:$0xff] }
0x282b   :  { %4236 = vmatprep.subr.bf16.mxu1 %v3603_v46  ;;  %v3751_v46 = vld [vmem:[#allocation3 + $0x768] sm:$0xff] }
0x282d   :  { %4159 = vmatpush1.bf16.msra.mxu0 %v3620_v10  ;;  %v3733_v10 = vld [vmem:[#allocation3 + $0x6d8] sm:$0xff] }
0x282e   :  { %4237 = vmatpush1.bf16.msra.mxu1 %v3602_v12  ;;  %4160 = vmatprep.subr.bf16.mxu0 %v3631_v48  ;;  %v3750_v48 = vld [vmem:[#allocation3 + $0x760] sm:$0xff] }
0x282f   :  { %4238 = vmatprep.subr.bf16.mxu1 %v3613_v14 }
0x2831   :  { %4161 = vmatpush1.bf16.msra.mxu0 %v3630_v16 }
0x2832   :  { %4239 = vmatpush1.bf16.msra.mxu1 %v3612_v18  ;;  %4162 = vmatprep.subr.bf16.mxu0 %v3641_v21  ;;  %v3732_v18 = vld [vmem:[#allocation3 + $0x6d0] sm:$0xff]  ;;  %v3761_v21 = vld [vmem:[#allocation3 + $0x7b8] sm:$0xff] }
0x2833   :  { %4240 = vmatprep.subr.bf16.mxu1 %v3623_v7 }
0x2835   :  { %4163 = vmatpush1.bf16.msra.mxu0 %v3640_v5 }
0x2836   :  { %4241 = vmatpush1.bf16.msra.mxu1 %v3622_v63  ;;  %4164 = vmatprep.subr.bf16.mxu0 %v3651_v22  ;;  %v3743_v63 = vld [vmem:[#allocation3 + $0x728] sm:$0xff] }
0x2837   :  { %4242 = vmatprep.subr.bf16.mxu1 %v3633_v53 }
0x2839   :  { %4165 = vmatpush1.bf16.msra.mxu0 %v3650_v23 }
0x283a   :  { %4243 = vmatpush1.bf16.msra.mxu1 %v3632_v24  ;;  %4166 = vmatprep.subr.bf16.mxu0 %v3661_v1  ;;  %v3760_v24 = vld [vmem:[#allocation3 + $0x7b0] sm:$0xff] }
0x283b   :  { %4244 = vmatprep.subr.bf16.mxu1 %v3643_v25  ;;  %v3742_v25 = vld [vmem:[#allocation3 + $0x720] sm:$0xff] }
0x283d   :  { %4167 = vmatpush1.bf16.msra.mxu0 %v3660_v27  ;;  %v3771_v27 = vld [vmem:[#allocation3 + $0x808] sm:$0xff] }
0x283e   :  { %4245 = vmatpush1.bf16.msra.mxu1 %v3642_v28  ;;  %4168 = vmatprep.subr.bf16.mxu0 %v3671_v50  ;;  %v3753_v28 = vld [vmem:[#allocation3 + $0x778] sm:$0xff]  ;;  %v3770_v50 = vld [vmem:[#allocation3 + $0x800] sm:$0xff] }
0x283f   :  { %4246 = vmatprep.subr.bf16.mxu1 %v3653_v29  ;;  %v3752_v29 = vld [vmem:[#allocation3 + $0x770] sm:$0xff] }
0x2841   :  { %4169 = vmatpush1.bf16.msra.mxu0 %v3670_v31  ;;  %v3781_v31 = vld [vmem:[#allocation3 + $0x858] sm:$0xff] }
0x2842   :  { %4247 = vmatpush1.bf16.msra.mxu1 %v3652_v17  ;;  %4179 = vmatprep.subr.bf16.mxu0 %v3681_v32  ;;  %v3763_v17 = vld [vmem:[#allocation3 + $0x7c8] sm:$0xff]  ;;  %v3780_v32 = vld [vmem:[#allocation3 + $0x850] sm:$0xff] }
0x2843   :  { %4248 = vmatprep.subr.bf16.mxu1 %v3663_v33  ;;  %v3762_v33 = vld [vmem:[#allocation3 + $0x7c0] sm:$0xff] }
0x2844   :  { %4171 = vmatmul.mubr.bf16.vlgmr.msra.gmra.mrb[92].mxu0 %v6542_v2 }
0x2845   :  { %4180 = vmatpush1.bf16.msra.mxu0 %v3680_v20  ;;  %4211 = vmatprep.mubr.bf16.mxu0 %v6547_v19  ;;  %v3791_v20 = vld [vmem:[#allocation3 + $0x8a8] sm:$0xff] }
0x2846   :  { %4249 = vmatpush1.bf16.msra.mxu1 %v3662_v13  ;;  %4181 = vmatprep.subr.bf16.mxu0 %v3691_v34  ;;  %v3773_v13 = vld [vmem:[#allocation3 + $0x818] sm:$0xff]  ;;  %v3790_v34 = vld [vmem:[#allocation3 + $0x8a0] sm:$0xff] }
0x2847   :  { %4250 = vmatprep.subr.bf16.mxu1 %v3673_v35  ;;  %v3772_v35 = vld [vmem:[#allocation3 + $0x810] sm:$0xff] }
0x2849   :  { %4182 = vmatpush1.bf16.msra.mxu0 %v3690_v6  ;;  %v3801_v6 = vld [vmem:[#allocation3 + $0x8f8] sm:$0xff] }
0x284a   :  { %4251 = vmatpush1.bf16.msra.mxu1 %v3672_v36  ;;  %4183 = vmatprep.subr.bf16.mxu0 %v3701_v37  ;;  %v3783_v36 = vld [vmem:[#allocation3 + $0x868] sm:$0xff]  ;;  %v3800_v37 = vld [vmem:[#allocation3 + $0x8f0] sm:$0xff] }
0x284b   :  { %4261 = vmatprep.subr.bf16.mxu1 %v3683_v38  ;;  %v3782_v38 = vld [vmem:[#allocation3 + $0x860] sm:$0xff] }
0x284d   :  { %4253 = vmatmul.mubr.bf16.vlgmr.msra.gmra.mrb[116].mxu1 %v6542_v2  ;;  %4184 = vmatpush1.bf16.msra.mxu0 %v3700_v39  ;;  %v3730_v2 = vld [vmem:[#allocation3 + $0x6c0] sm:$0xff]  ;;  %v3811_v39 = vld [vmem:[#allocation3 + $0x948] sm:$0xff] }
0x284e   :  { %4262 = vmatpush1.bf16.msra.mxu1 %v3682_v40  ;;  %4293 = vmatprep.mubr.bf16.mxu1 %v6547_v19  ;;  %v3793_v40 = vld [vmem:[#allocation3 + $0x8b8] sm:$0xff] }
0x284f   :  { %4185 = vmatprep.subr.bf16.mxu0 %v3711_v41  ;;  %4263 = vmatprep.subr.bf16.mxu1 %v3693_v43  ;;  %v3810_v41 = vld [vmem:[#allocation3 + $0x940] sm:$0xff]  ;;  %v3792_v43 = vld [vmem:[#allocation3 + $0x8b0] sm:$0xff] }
0x2851   :  { %4186 = vmatpush1.bf16.msra.mxu0 %v3710_v44  ;;  %v3821_v44 = vld [vmem:[#allocation3 + $0x998] sm:$0xff] }
0x2852   :  { %4264 = vmatpush1.bf16.msra.mxu1 %v3692_v61  ;;  %4187 = vmatprep.subr.bf16.mxu0 %v3721_v47  ;;  %v3803_v61 = vld [vmem:[#allocation3 + $0x908] sm:$0xff]  ;;  %v3820_v47 = vld [vmem:[#allocation3 + $0x990] sm:$0xff] }
0x2853   :  { %4265 = vmatprep.subr.bf16.mxu1 %v3703_v49  ;;  %v3802_v49 = vld [vmem:[#allocation3 + $0x900] sm:$0xff] }
0x2855   :  { %4188 = vmatpush1.bf16.msra.mxu0 %v3720_v51  ;;  %v3831_v51 = vld [vmem:[#allocation3 + $0x9e8] sm:$0xff] }
0x2856   :  { %4266 = vmatpush1.bf16.msra.mxu1 %v3702_v52  ;;  %4189 = vmatprep.subr.bf16.mxu0 %v3731_v54  ;;  %v3813_v52 = vld [vmem:[#allocation3 + $0x958] sm:$0xff]  ;;  %v3830_v54 = vld [vmem:[#allocation3 + $0x9e0] sm:$0xff] }
0x2857   :  { %v3926_v19 = vpop.f32.mrb[84].mxu0  ;;  %4267 = vmatprep.subr.bf16.mxu1 %v3713_v30  ;;  %v3812_v30 = vld [vmem:[#allocation3 + $0x950] sm:$0xff] }
0x2858   :  { %v3928_v58 = vpop.f32.mrb[85].mxu0  ;;  %v3927_v12 = vadd.f32 %v3926_v19, %v3845_v4  ;;  %v3822_v19 = vld [vmem:[#allocation3 + $0x9a0] sm:$0xff] }
0x2859   :  { %4190 = vmatpush1.bf16.msra.mxu0 %v3730_v2  ;;  %v3930_v62 = vpop.f32.mrb[86].mxu0  ;;  %v3929_v14 = vadd.f32 %v3928_v58, %v3849_v8  ;;  %v3823_v2 = vld [vmem:[#allocation3 + $0x9a8] sm:$0xff]  ;;  %v5599_v58 = vmov 1983009808  }
0x285a   :  { %4268 = vmatpush1.bf16.msra.mxu1 %v3712_v57  ;;  %v3931_v11 = vpop.f32.mrb[87].mxu0  ;;  %4191 = vmatprep.subr.bf16.mxu0 %v3741_v15  ;;  %v3833_v57 = vld [vmem:[#allocation3 + $0x9f8] sm:$0xff]  ;;  %v3832_v15 = vld [vmem:[#allocation3 + $0x9f0] sm:$0xff]  ;;  %v3853_v62 = vrot.slane %v6566_v55, %v3407_v59 }
0x285b   :  { %4269 = vmatprep.subr.bf16.mxu1 %v3723_v60  ;;  %v4315_v60 = vunpack.c.l.s4 %v5599_v58  ;;  %v3857_v11 = vrot.slane %v6566_v55, %v3411_v56 }
0x285d   :  { %4192 = vmatpush1.bf16.msra.mxu0 %v3740_v26  ;;  %v4316_v4 = vunpack.c.0.s8 %v4315_v60 }
0x285e   :  { %4270 = vmatpush1.bf16.msra.mxu1 %v3722_v9  ;;  %4193 = vmatprep.subr.bf16.mxu0 %v3751_v46 }
0x285f   :  { %v3967_v16 = vpop.f32.mrb[108].mxu1  ;;  %4271 = vmatprep.subr.bf16.mxu1 %v3733_v10  ;;  %v4319_v46 = vsub.s32 %v4316_v4, %v6524_v3 }
0x2860   :  { %v6572_v7 = vadd.f32 %v3967_v16, %v3927_v12  ;;  %v3969_v5 = vpop.f32.mrb[109].mxu1 }
0x2861   :  { %v6574_v22 = vadd.f32 %v3969_v5, %v3929_v14  ;;  %4194 = vmatpush1.bf16.msra.mxu0 %v3750_v48  ;;  %v3971_v53 = vpop.f32.mrb[110].mxu1  ;;  %v3864_v14 = vsub.s32 5, %v6524_v3 }
0x2862   :  { %4272 = vmatpush1.bf16.msra.mxu1 %v3732_v18  ;;  %v3972_v23 = vpop.f32.mrb[111].mxu1  ;;  %4195 = vmatprep.subr.bf16.mxu0 %v3761_v21 }
0x2863   :  { %v4312_v1 = vcombine.low %v6572_v7, %v6574_v22  ;;  %4273 = vmatprep.subr.bf16.mxu1 %v3743_v63  ;;  %v3865_v21 = vrot.slane %v6566_v55, %v3864_v14 }
0x2865   :  { %4196 = vmatpush1.bf16.msra.mxu0 %v3760_v24  ;;  %v4320_v59 = vrot.slane %v4312_v1, %v4319_v46 }
0x2866   :  { %4274 = vmatpush1.bf16.msra.mxu1 %v3742_v25  ;;  %4197 = vmatprep.subr.bf16.mxu0 %v3771_v27 }
0x2867   :  { %4275 = vmatprep.subr.bf16.mxu1 %v3753_v28 }
0x2869   :  { %4198 = vmatpush1.bf16.msra.mxu0 %v3770_v50  ;;  %v3868_v50 = vsub.s32 6, %v6524_v3 }
0x286a   :  { %4276 = vmatpush1.bf16.msra.mxu1 %v3752_v29  ;;  %4199 = vmatprep.subr.bf16.mxu0 %v3781_v31  ;;  %v3872_v29 = vsub.s32 7, %v6524_v3 }
0x286b   :  { %4277 = vmatprep.subr.bf16.mxu1 %v3763_v17  ;;  %v3869_v7 = vrot.slane %v6566_v55, %v3868_v50 }
0x286c   :  { %v3873_v22 = vrot.slane %v6566_v55, %v3872_v29 }
0x286d   :  { %4200 = vmatpush1.bf16.msra.mxu0 %v3780_v32 }
0x286e   :  { %4278 = vmatpush1.bf16.msra.mxu1 %v3762_v33  ;;  %4201 = vmatprep.subr.bf16.mxu0 %v3791_v20 }
0x286f   :  { %4279 = vmatprep.subr.bf16.mxu1 %v3773_v13  ;;  %v3839_v13 = vld [vmem:[#allocation31 + $0x8] sm:$0x3] }
0x2871   :  { %4202 = vmatpush1.bf16.msra.mxu0 %v3790_v34 }
0x2872   :  { %4280 = vmatpush1.bf16.msra.mxu1 %v3772_v35  ;;  %4203 = vmatprep.subr.bf16.mxu0 %v3801_v6 }
0x2873   :  { %4281 = vmatprep.subr.bf16.mxu1 %v3783_v36  ;;  %v3877_v36 = vrot.slane %v3839_v13, %v6527_v42 }
0x2875   :  { %4204 = vmatpush1.bf16.msra.mxu0 %v3800_v37  ;;  %v3881_v37 = vrot.slane %v3839_v13, %v6530_v45 }
0x2876   :  { %4282 = vmatpush1.bf16.msra.mxu1 %v3782_v38  ;;  %4205 = vmatprep.subr.bf16.mxu0 %v3811_v39 }
0x2877   :  { %4283 = vmatprep.subr.bf16.mxu1 %v3793_v40 }
0x2879   :  { %4206 = vmatpush1.bf16.msra.mxu0 %v3810_v41 }
0x287a   :  { %4284 = vmatpush1.bf16.msra.mxu1 %v3792_v43  ;;  %4207 = vmatprep.subr.bf16.mxu0 %v3821_v44 }
0x287b   :  { %4285 = vmatprep.subr.bf16.mxu1 %v3803_v61 }
0x287d   :  { %4208 = vmatpush1.bf16.msra.mxu0 %v3820_v47 }
0x287e   :  { %4286 = vmatpush1.bf16.msra.mxu1 %v3802_v49  ;;  %4209 = vmatprep.subr.bf16.mxu0 %v3831_v51 }
0x287f   :  { %4287 = vmatprep.subr.bf16.mxu1 %v3813_v52 }
0x2881   :  { %4210 = vmatpush1.bf16.msra.mxu0 %v3830_v54 }
0x2882   :  { %4288 = vmatpush1.bf16.msra.mxu1 %v3812_v30 }
0x2883   :  { %4289 = vmatprep.subr.bf16.mxu1 %v3823_v2 }
0x2884   :  { %4212 = vmatmul.mubr.bf16.vlgmr.msra.gmra.mrb[92].mxu0 %v6549_v0 }
0x2886   :  { %4290 = vmatpush1.bf16.msra.mxu1 %v3822_v19 }
0x2887   :  { %4291 = vmatprep.subr.bf16.mxu1 %v3833_v57 }
0x288a   :  { %4292 = vmatpush1.bf16.msra.mxu1 %v3832_v15 }
0x288d   :  { %4294 = vmatmul.mubr.bf16.vlgmr.msra.gmra.mrb[116].mxu1 %v6549_v0  ;;  %v3860_v0 = vsub.s32 4, %v6524_v3 }
0x288f   :  { %v3861_v56 = vrot.slane %v6566_v55, %v3860_v0 }
0x28d7   :  { %v4049_v26 = vpop.f32.mrb[88].mxu0 }
0x28d8   :  { %v4937_v8 = vadd.f32 %v4049_v26, %v3853_v62  ;;  %v4051_v9 = vpop.f32.mrb[89].mxu0 }
0x28d9   :  { %v4938_v10 = vadd.f32 %v4051_v9, %v3857_v11  ;;  %v4053_v12 = vpop.f32.mrb[90].mxu0 }
0x28da   :  { %v4054_v48 = vpop.f32.mrb[91].mxu0 }
0x28db   :  { %v4313_v16 = vcombine.low %v4937_v8, %v4938_v10 }
0x28dd   :  { %v4327_v18 = vrot.slane %v4313_v16, %v4319_v46 }
0x28df   :  { %v4328_v5 = vcombine.low %v4320_v59, %v4327_v18 }
0x28e0   :  { %v4131_v63 = vpop.f32.mrb[112].mxu1 }
0x28e1   :  { %4357 = vst [vmem:[#allocation32] sm:$0xff] %v4328_v5  ;;  %v4939_v53 = vadd.f32 %v4131_v63, %v3861_v56  ;;  %v4133_v23 = vpop.f32.mrb[113].mxu1 }
0x28e2   :  { %v4940_v24 = vadd.f32 %v4133_v23, %v3865_v21  ;;  %v4135_v25 = vpop.f32.mrb[114].mxu1 }
0x28e3   :  { %v4136_v27 = vpop.f32.mrb[115].mxu1 }
0x28e4   :  { %v4329_v28 = vcombine.low %v4939_v53, %v4940_v24 }
0x28e6   :  { %v4337_v35 = vrot.slane %v4329_v28, %v4319_v46 }
0x2957   :  { %v4213_v1 = vpop.f32.mrb[92].mxu0 }
0x2958   :  { %v4941_v31 = vadd.f32 %v4213_v1, %v3869_v7  ;;  %v4215_v17 = vpop.f32.mrb[93].mxu0 }
0x2959   :  { %v4942_v32 = vadd.f32 %v4215_v17, %v3873_v22  ;;  %v4217_v33 = vpop.f32.mrb[94].mxu0 }
0x295a   :  { %v4218_v20 = vpop.f32.mrb[95].mxu0 }
0x295b   :  { %v4330_v34 = vcombine.low %v4941_v31, %v4942_v32 }
0x295d   :  { %v4344_v6 = vrot.slane %v4330_v34, %v4319_v46 }
0x295f   :  { %v4345_v38 = vcombine.low %v4337_v35, %v4344_v6 }
0x2960   :  { %v4295_v3 = vpop.f32.mrb[116].mxu1 }
0x2961   :  { %4358 = vst [vmem:[#allocation32 + $0x8] sm:$0xff] %v4345_v38  ;;  %v4943_v39 = vadd.f32 %v4295_v3, %v3877_v36  ;;  %v4297_v40 = vpop.f32.mrb[117].mxu1 }
0x2962   :  { %v4944_v55 = vadd.f32 %v4297_v40, %v3881_v37  ;;  %v4299_v41 = vpop.f32.mrb[118].mxu1 }
0x2963   :  { %v4300_v43 = vpop.f32.mrb[119].mxu1 }
0x2964   :  { %v4346_v44 = vcombine.low %v4943_v39, %v4944_v55 }
0x2966   :  { %4508 = vst.sshfl [vmem:[#allocation32 + $0x10] sm:$0x33 pattern:$0x76325410] %v4346_v44 }
0x2967   :  { %5517 = shalt.err (!%p5514_p0)
}
0x2968   :  { %s6658_s19 = sld [smem:[#allocation56_spill]] }
0x296e   :  { %s5518_s12 = scalar_lea.hbm %s6658_s19, 320 }
0x296f   :  { %p5519_p1 = scmp.ne.s32.totalorder %s6658_s19, %s5518_s12  ;;  %p5522_p2 = scmp.lt.u32.totalorder %s5518_s12, %s6658_s19 }
0x2971   :  { %p5524_p3 = pnand %p5522_p2, %p5519_p1 }
0x2973   :  { %5527 = shalt.err (!%p5524_p3)
}
0x2974   :  { %4369 = dma.vmem_to_hbm [thread:$0]  %s4367_s18, 320, %s6658_s19, [#allocation7]  }
0x2975   :  { %5550 = dma.done.wait [#allocation7], 320  }
0x2976   :  { %5551 = vsyncadd [#allocation7], 4294966976 }
0x2977   :  { %4373 = vsyncpa [#allocation6], 1 }
0x2978   :  { %4374 = vsyncpa [#allocation9], 1 }
0x2979   :  { %4375 = vsyncpa [#allocation12], 1 }
0x297a   :  { %4376 = vsyncpa [#allocation15], 1 }
0x297b   :  { %4377 = vsyncpa [#allocation18], 1 }
0x297c   :  { %4378 = vsyncpa [#allocation21], 1 }
0x297d   :  { %4379 = vsyncpa [#allocation24], 1 }
0x297e   :  { %4380 = vsyncpa [#allocation27], 1 }
0x297f   :  { %4381 = vsyncpa [#allocation30], 1 }
0x2980   :  { %4382 = vsyncpa [#allocation7], 1 }
0x2981   :  { %4383 = vsyncmov [#allocation4] }
0x2984   :  { %s4384_s24 = vpop.sfrf %4383 }
0x2985   :  { %p4509_p4 = scmp.ne.s32.totalorder %s4384_s24, 0 }
0x2987   :  { %4388 = shalt.err (%p4509_p4)  }
0x2988   :  { %4390 = vsyncmov [#allocation4 + $0x1] }
0x298b   :  { %s4391_s4 = vpop.sfrf %4390 }
0x298c   :  { %p4510_p5 = scmp.ne.s32.totalorder %s4391_s4, 0 }
0x298e   :  { %4395 = shalt.err (%p4510_p5)  }

</bundles_post_ra>
